<compile_context>
chip_gen: v7x
topology: tpu7x:2x2x1
jax: 0.10.0
libtpu: 0.0.40
codegen_flags: <defaults>
</compile_context>

<pallas_src>
import math
import functools

import jax
import jax.numpy as jnp
from jax import lax
from jax.experimental import pallas as pl
from jax.experimental.pallas import tpu as pltpu


# ----------------------------------------------------------------------------
# Small utilities
# ----------------------------------------------------------------------------

def _round_up(x, m):
    return ((x + m - 1) // m) * m


@functools.lru_cache(maxsize=None)
def _vmem_limit_bytes():
    # Per-generation scoped-VMEM budget: ~100 MiB on v5e/v6e (128 MiB physical),
    # ~54 MiB on v7x (64 MiB physical).
    cap = 128 * 1024 * 1024
    try:
        cap = int(pltpu.get_tpu_info().vmem_capacity_bytes)
    except Exception:
        pass
    return int(min(100 * 1024 * 1024, int(cap * 0.85)))


def _wspec(shape):
    # Weights / LN params / biases: constant index map over the whole grid ->
    # single-buffered (no wasted double-buffer VMEM for resident operands).
    n = len(shape)
    return pl.BlockSpec(shape, lambda *_, _n=n: (0,) * _n,
                        pipeline_mode=pl.Buffered(1))


# ----------------------------------------------------------------------------
# In-kernel helpers (traced inside Pallas kernels)
# ----------------------------------------------------------------------------

def _softmax_last(s):
    # s: f32 (Sq, Sk)
    s = s - jnp.max(s, axis=-1, keepdims=True)
    p = jnp.exp(s)
    return p * pl.reciprocal(jnp.sum(p, axis=-1, keepdims=True), approx=True)


def _attend(ctx_ref, q, kv, wo, *, h, dk, dv):
    """q: (Sq, h*dk) bf16; kv: (Sk, h*dk + h*dv) bf16; wo: (h*dv, D) bf16 -> (Sq, D) f32.

    Per-head contexts are stored into the ctx_ref VMEM slab (Sq, h*dv) and the output
    projection is a single full-depth (Sq, h*dv) @ (h*dv, D) MXU matmul.
    """
    for i in range(h):  # h is a small static python int -> unrolled
        qh = q[:, i * dk:(i + 1) * dk]
        kh = kv[:, i * dk:(i + 1) * dk]
        vh = kv[:, h * dk + i * dv: h * dk + (i + 1) * dv]
        # scores = q_h @ k_h^T (1/sqrt(d_k) already folded into W_Q); contract d_k, no K.T copy
        s = lax.dot_general(qh, kh, (((1,), (1,)), ((), ())),
                            preferred_element_type=jnp.float32)
        p = _softmax_last(s).astype(jnp.bfloat16)
        ctx_ref[:, i * dv:(i + 1) * dv] = jnp.dot(
            p, vh, preferred_element_type=jnp.float32).astype(jnp.bfloat16)
    return jnp.dot(ctx_ref[...], wo, preferred_element_type=jnp.float32)


def _layernorm(x, gamma, beta, eps=1e-5):
    # x f32 (rows, D); biased variance like torch.nn.LayerNorm
    mean = jnp.mean(x, axis=-1, keepdims=True)
    c = x - mean
    var = jnp.mean(c * c, axis=-1, keepdims=True)
    return c * lax.rsqrt(var + eps) * gamma + beta


def _ffn(x, w1, b1, w2, b2):
    hid = jnp.dot(x.astype(jnp.bfloat16), w1, preferred_element_type=jnp.float32) + b1
    hid = jnp.maximum(hid, 0.0)  # ReLU
    return jnp.dot(hid.astype(jnp.bfloat16), w2, preferred_element_type=jnp.float32) + b2


# ----------------------------------------------------------------------------
# Fused block kernels
# ----------------------------------------------------------------------------

def _encoder_block_kernel(xq_ref, xkv_ref, wq_ref, wkv_ref, wo_ref,
                          g1_ref, be1_ref, w1_ref, fb1_ref, w2_ref, fb2_ref,
                          g2_ref, be2_ref, o_ref, ctx_ref, *, h, dk, dv):
    xq = xq_ref[...]                       # (tq, D) bf16 query/residual tile
    xkv = xkv_ref[...]                     # (S, D)  bf16 full sequence (K/V source)
    q = jnp.dot(xq, wq_ref[...], preferred_element_type=jnp.float32).astype(jnp.bfloat16)
    kv = jnp.dot(xkv, wkv_ref[...], preferred_element_type=jnp.float32).astype(jnp.bfloat16)
    attn = _attend(ctx_ref, q, kv, wo_ref[...], h=h, dk=dk, dv=dv)
    x1 = _layernorm(attn + xq.astype(jnp.float32), g1_ref[...], be1_ref[...])
    f = _ffn(x1, w1_ref[...], fb1_ref[...], w2_ref[...], fb2_ref[...])
    x2 = _layernorm(f + x1, g2_ref[...], be2_ref[...])
    o_ref[...] = x2.astype(o_ref.dtype)


def _decoder_block_kernel(xq_ref, xkv_ref, mem_ref,
                          s_wq_ref, s_wkv_ref, s_wo_ref, g1_ref, be1_ref,
                          c_wq_ref, c_wkv_ref, c_wo_ref, g2_ref, be2_ref,
                          w1_ref, fb1_ref, w2_ref, fb2_ref, g3_ref, be3_ref,
                          o_ref, ctx_ref, *, h, dk, dv):
    xq = xq_ref[...]                       # (tq, D) bf16 decoder query/residual tile
    xkv = xkv_ref[...]                     # (St, D) bf16 full target sequence (self K/V)
    mem = mem_ref[...]                     # (Ss, D) bf16 encoder output (cross K/V)
    # --- masked/unmasked self-attention (reference module applies no mask) ---
    q = jnp.dot(xq, s_wq_ref[...], preferred_element_type=jnp.float32).astype(jnp.bfloat16)
    kv = jnp.dot(xkv, s_wkv_ref[...], preferred_element_type=jnp.float32).astype(jnp.bfloat16)
    a1 = _attend(ctx_ref, q, kv, s_wo_ref[...], h=h, dk=dk, dv=dv)
    x1 = _layernorm(a1 + xq.astype(jnp.float32), g1_ref[...], be1_ref[...])
    # --- cross-attention ---
    cq = jnp.dot(x1.astype(jnp.bfloat16), c_wq_ref[...],
                 preferred_element_type=jnp.float32).astype(jnp.bfloat16)
    ckv = jnp.dot(mem, c_wkv_ref[...],
                  preferred_element_type=jnp.float32).astype(jnp.bfloat16)
    a2 = _attend(ctx_ref, cq, ckv, c_wo_ref[...], h=h, dk=dk, dv=dv)
    x2 = _layernorm(a2 + x1, g2_ref[...], be2_ref[...])
    # --- FFN ---
    f = _ffn(x2, w1_ref[...], fb1_ref[...], w2_ref[...], fb2_ref[...])
    x3 = _layernorm(f + x2, g3_ref[...], be3_ref[...])
    o_ref[...] = x3.astype(o_ref.dtype)


def _logits_kernel(x_ref, emb_ref, b_ref, o_ref, m_sc, l_sc):
    # grid = (token_tiles, 2, vocab_tiles):
    #   phase 0: online logsumexp over vocab tiles (scratch m/l), output block pinned at (t,0),
    #   phase 1: recompute each logits tile and write log-softmax (lane-dense blocks, bf16).
    phase = pl.program_id(1)
    j = pl.program_id(2)

    @pl.when(jnp.logical_and(phase == 0, j == 0))
    def _():
        m_sc[...] = jnp.full(m_sc.shape, -jnp.inf, jnp.float32)
        l_sc[...] = jnp.zeros(l_sc.shape, jnp.float32)
        # Guard: explicitly init the resident (t, 0) output block so it never holds stale VMEM.
        o_ref[...] = jnp.zeros(o_ref.shape, o_ref.dtype)

    # logits tile = x (tm, D) @ emb_tile (tv, D)^T + bias tile  (contract D; no emb.T in HBM)
    logits = lax.dot_general(x_ref[...], emb_ref[...], (((1,), (1,)), ((), ())),
                             preferred_element_type=jnp.float32) + b_ref[...]

    @pl.when(phase == 0)
    def _():
        m_prev = m_sc[...]
        m_new = jnp.maximum(m_prev, jnp.max(logits, axis=-1, keepdims=True))
        l_sc[...] = (l_sc[...] * jnp.exp(m_prev - m_new)
                     + jnp.sum(jnp.exp(logits - m_new), axis=-1, keepdims=True))
        m_sc[...] = m_new

    @pl.when(phase == 1)
    def _():
        o_ref[...] = (logits - (m_sc[...] + jnp.log(l_sc[...]))).astype(o_ref.dtype)


# ----------------------------------------------------------------------------
# pallas_call wrappers
# ----------------------------------------------------------------------------

def encoder_block(x, p, h, *, tq=256):
    B, S, D = x.shape
    if S < tq or S % tq != 0:
        tq = S                    # demo-sized sequences use the full sequence per tile
    nq = S // tq
    wq, wkv, wo = p["attn"]["wq"], p["attn"]["wkv"], p["attn"]["wo"]
    w1, fb1, w2, fb2 = p["ffn"]
    g1, be1 = p["ln1"]
    g2, be2 = p["ln2"]
    hdv = wo.shape[0]
    dv = hdv // h
    dk = wq.shape[1] // h
    kernel = functools.partial(_encoder_block_kernel, h=h, dk=dk, dv=dv)
    return pl.pallas_call(
        kernel,
        out_shape=jax.ShapeDtypeStruct((B, S, D), jnp.bfloat16),
        grid=(B, nq),
        in_specs=[
            pl.BlockSpec((None, tq, D), lambda b, s: (b, s, 0)),   # query / residual tile
            pl.BlockSpec((None, S, D), lambda b, s: (b, 0, 0)),    # full sequence (K/V source)
            _wspec(wq.shape), _wspec(wkv.shape), _wspec(wo.shape),
            _wspec(g1.shape), _wspec(be1.shape),
            _wspec(w1.shape), _wspec(fb1.shape),
            _wspec(w2.shape), _wspec(fb2.shape),
            _wspec(g2.shape), _wspec(be2.shape),
        ],
        out_specs=pl.BlockSpec((None, tq, D), lambda b, s: (b, s, 0)),
        scratch_shapes=[pltpu.VMEM((tq, hdv), jnp.bfloat16)],      # per-head context slab
        compiler_params=pltpu.CompilerParams(
            dimension_semantics=("parallel", "parallel"),
            vmem_limit_bytes=_vmem_limit_bytes()),
    )(x, x, wq, wkv, wo, g1, be1, w1, fb1, w2, fb2, g2, be2)


def decoder_block(x, mem, p, h, *, tq=256):
    B, St, D = x.shape
    Ss = mem.shape[1]
    if St < tq or St % tq != 0:
        tq = St
    nq = St // tq
    sa, ca = p["self_attn"], p["cross_attn"]
    w1, fb1, w2, fb2 = p["ffn"]
    g1, be1 = p["ln1"]
    g2, be2 = p["ln2"]
    g3, be3 = p["ln3"]
    hdv = sa["wo"].shape[0]
    dv = hdv // h
    dk = sa["wq"].shape[1] // h
    kernel = functools.partial(_decoder_block_kernel, h=h, dk=dk, dv=dv)
    return pl.pallas_call(
        kernel,
        out_shape=jax.ShapeDtypeStruct((B, St, D), jnp.bfloat16),
        grid=(B, nq),
        in_specs=[
            pl.BlockSpec((None, tq, D), lambda b, s: (b, s, 0)),   # query / residual tile
            pl.BlockSpec((None, St, D), lambda b, s: (b, 0, 0)),   # full target seq (self K/V)
            pl.BlockSpec((None, Ss, D), lambda b, s: (b, 0, 0)),   # encoder memory (cross K/V)
            _wspec(sa["wq"].shape), _wspec(sa["wkv"].shape), _wspec(sa["wo"].shape),
            _wspec(g1.shape), _wspec(be1.shape),
            _wspec(ca["wq"].shape), _wspec(ca["wkv"].shape), _wspec(ca["wo"].shape),
            _wspec(g2.shape), _wspec(be2.shape),
            _wspec(w1.shape), _wspec(fb1.shape),
            _wspec(w2.shape), _wspec(fb2.shape),
            _wspec(g3.shape), _wspec(be3.shape),
        ],
        out_specs=pl.BlockSpec((None, tq, D), lambda b, s: (b, s, 0)),
        scratch_shapes=[pltpu.VMEM((tq, hdv), jnp.bfloat16)],
        compiler_params=pltpu.CompilerParams(
            dimension_semantics=("parallel", "parallel"),
            vmem_limit_bytes=_vmem_limit_bytes()),
    )(x, x, mem, sa["wq"], sa["wkv"], sa["wo"], g1, be1,
      ca["wq"], ca["wkv"], ca["wo"], g2, be2,
      w1, fb1, w2, fb2, g3, be3)


def logits_log_softmax(x, emb, bias, *, tm=256, tv=512, out_dtype=jnp.bfloat16):
    """x: (T, D) bf16 tokens (batch*seq flattened); emb: (V, D) bf16; bias: (1, V) f32.

    Returns (T, V) log-softmax in bf16. Token and vocab axes are padded up to the tile
    multiples (pad bias columns get -1e30 so they never contribute to the logsumexp).
    Defaults (tm=256, tv=512) target v6e/v7x; on v5e tm=128 also fully feeds the MXU.
    """
    T, D = x.shape
    V = emb.shape[0]
    tm = min(tm, _round_up(T, 8))
    tv = min(tv, _round_up(V, 128))
    Tp, Vp = _round_up(T, tm), _round_up(V, tv)
    if Tp != T:
        x = jnp.pad(x, ((0, Tp - T), (0, 0)))
    if Vp != V:
        emb = jnp.pad(emb, ((0, Vp - V), (0, 0)))
        bias = jnp.pad(bias, ((0, 0), (0, Vp - V)), constant_values=-1e30)
    nt, nv = Tp // tm, Vp // tv
    out = pl.pallas_call(
        _logits_kernel,
        out_shape=jax.ShapeDtypeStruct((Tp, Vp), out_dtype),
        grid=(nt, 2, nv),
        in_specs=[
            # token tile is resident across (phase, vocab) -> single-buffered
            pl.BlockSpec((tm, D), lambda t, p, j: (t, 0), pipeline_mode=pl.Buffered(1)),
            pl.BlockSpec((tv, D), lambda t, p, j: (j, 0)),   # embedding vocab tile (streamed)
            pl.BlockSpec((1, tv), lambda t, p, j: (0, j)),   # bias vocab tile
        ],
        # phase 0 pins the output index to (t, 0) so no block is flushed before it is written
        out_specs=pl.BlockSpec((tm, tv), lambda t, p, j: (t, j * p)),
        scratch_shapes=[pltpu.VMEM((tm, 1), jnp.float32),    # running max
                        pltpu.VMEM((tm, 1), jnp.float32)],   # running sum-exp
        compiler_params=pltpu.CompilerParams(
            dimension_semantics=("parallel", "arbitrary", "arbitrary"),
            vmem_limit_bytes=_vmem_limit_bytes()),
    )(x, emb, bias)
    return out[:T, :V]


# ----------------------------------------------------------------------------
# Glue: positional encoding, parameter init/packing, model assembly (plain JAX)
# ----------------------------------------------------------------------------

def positional_encoding(seq_len, d_model):
    pos = jnp.arange(seq_len, dtype=jnp.float32)[:, None]
    i = jnp.arange(0, d_model, 2, dtype=jnp.float32)[None, :]
    div = jnp.exp(i * (-math.log(10000.0) / d_model))
    pe_even = jnp.sin(pos * div)
    pe_odd = jnp.cos(pos * div)
    pe = jnp.stack([pe_even, pe_odd], axis=-1).reshape(seq_len, d_model)
    return pe[None]  # (1, seq_len, d_model)


def _xavier(key, shape, fan_in, fan_out):
    a = math.sqrt(6.0 / (fan_in + fan_out))
    return jax.random.uniform(key, shape, jnp.float32, -a, a)


def init_mha_params(key, h, d_model, d_k, d_v):
    k1, k2, k3, k4 = jax.random.split(key, 4)
    wq = _xavier(k1, (h, d_model, d_k), d_model * d_k, h * d_k)
    wk = _xavier(k2, (h, d_model, d_k), d_model * d_k, h * d_k)
    wv = _xavier(k3, (h, d_model, d_v), d_model * d_v, h * d_v)
    wo = _xavier(k4, (h * d_v, d_model), h * d_v, d_model)
    return wq, wk, wv, wo


def _pack_mha(wq, wk, wv, wo):
    # torch layout (h, D, d_k) -> MXU-friendly (D, h*d_k); fold 1/sqrt(d_k) into W_Q columns.
    h, D, d_k = wq.shape
    scale = 1.0 / math.sqrt(d_k)
    to2d = lambda w: jnp.transpose(w, (1, 0, 2)).reshape(D, -1)
    return {
        "wq": (to2d(wq) * scale).astype(jnp.bfloat16),
        "wkv": jnp.concatenate([to2d(wk), to2d(wv)], axis=1).astype(jnp.bfloat16),
        "wo": wo.astype(jnp.bfloat16),
    }


def init_ffn_params(key, d_model, d_ff):
    k1, k2, k3, k4 = jax.random.split(key, 4)
    w1 = _xavier(k1, (d_model, d_ff), d_model, d_ff).astype(jnp.bfloat16)
    b1 = jax.random.uniform(k2, (1, d_ff), jnp.float32, -0.01, 0.01)
    w2 = _xavier(k3, (d_ff, d_model), d_ff, d_model).astype(jnp.bfloat16)
    b2 = jax.random.uniform(k4, (1, d_model), jnp.float32, -0.01, 0.01)
    return (w1, b1, w2, b2)


def init_ln_params(d_model):
    return (jnp.ones((1, d_model), jnp.float32), jnp.zeros((1, d_model), jnp.float32))


def init_transformer_params(key, n_layer, h, d_model, d_ff, vocab_size):
    d_k = d_v = d_model // h
    keys = jax.random.split(key, 2 + 2 * n_layer + 3 * n_layer)
    ki = iter(keys)
    emb = jax.random.normal(next(ki), (vocab_size, d_model), jnp.float32) * 0.02
    params = {
        "emb": emb,                               # (V, D) f32 for embedding lookup
        "emb_bf": emb.astype(jnp.bfloat16),       # tied output projection, bf16 MXU copy
        "out_bias": jax.random.uniform(next(ki), (1, vocab_size), jnp.float32, -0.01, 0.01),
        "encoder": [],
        "decoder": [],
    }
    for _ in range(n_layer):
        params["encoder"].append({
            "attn": _pack_mha(*init_mha_params(next(ki), h, d_model, d_k, d_v)),
            "ffn": init_ffn_params(next(ki), d_model, d_ff),
            "ln1": init_ln_params(d_model),
            "ln2": init_ln_params(d_model),
        })
    for _ in range(n_layer):
        params["decoder"].append({
            "self_attn": _pack_mha(*init_mha_params(next(ki), h, d_model, d_k, d_v)),
            "cross_attn": _pack_mha(*init_mha_params(next(ki), h, d_model, d_k, d_v)),
            "ffn": init_ffn_params(next(ki), d_model, d_ff),
            "ln1": init_ln_params(d_model),
            "ln2": init_ln_params(d_model),
            "ln3": init_ln_params(d_model),
        })
    return params


def transformer_forward(src, tgt, params, *, h):
    emb = params["emb"]                           # (V, D) f32
    d_model = emb.shape[1]
    scale = math.sqrt(d_model)
    src_emb = emb[src] * scale + positional_encoding(src.shape[1], d_model)
    tgt_emb = emb[tgt] * scale + positional_encoding(tgt.shape[1], d_model)
    # TODO(synk): dropout (p=0.1) is identity (eval mode); stochastic dropout not replicated.

    x = src_emb.astype(jnp.bfloat16)
    for p in params["encoder"]:
        x = encoder_block(x, p, h)

    y = tgt_emb.astype(jnp.bfloat16)
    for p in params["decoder"]:
        y = decoder_block(y, x, p, h)

    B, T, _ = y.shape
    logp = logits_log_softmax(y.reshape(B * T, d_model),
                              params["emb_bf"], params["out_bias"])
    return logp.reshape(B, T, -1)


# ----------------------------------------------------------------------------
# Main
# ----------------------------------------------------------------------------

if __name__ == "__main__":
    # small config consistent with Transformer(__init__) semantics
    # (note: D=32 only uses 32/128 lanes — demo-sized; production D>=128 is lane-dense)
    n_layer, h, d_model, d_ff, vocab_size = 2, 2, 32, 64, 256
    batch, src_len, tgt_len = 2, 8, 8

    root = jax.random.PRNGKey(0)
    k_params, k_src, k_tgt = jax.random.split(root, 3)

    params = init_transformer_params(k_params, n_layer, h, d_model, d_ff, vocab_size)
    src = jax.random.randint(k_src, (batch, src_len), 0, vocab_size, dtype=jnp.int32)
    tgt = jax.random.randint(k_tgt, (batch, tgt_len), 0, vocab_size, dtype=jnp.int32)

    fwd = jax.jit(transformer_forward, static_argnames=("h",))
    out = fwd(src, tgt, params, h=h)
    out = jax.block_until_ready(out)

    assert out.shape == (batch, tgt_len, vocab_size)
    out_f32 = out.astype(jnp.float32)
    assert bool(jnp.all(jnp.isfinite(out_f32)))
    # rows of log_softmax should sum (in prob space) to ~1 (bf16 output -> looser tolerance)
    assert bool(jnp.allclose(jnp.sum(jnp.exp(out_f32), axis=-1), 1.0, atol=3e-2))
    print("KERNEL_OK")
</pallas_src>

<mosaic_0001>
module attributes {stable_mosaic.version = 11 : i64} {
  func.func @_encoder_block_kernel(%arg0: i32, %arg1: i32, %arg2: memref<1x8x32xbf16, #tpu.memory_space<vmem>>, %arg3: memref<1x8x32xbf16, #tpu.memory_space<vmem>>, %arg4: memref<32x32xbf16, #tpu.memory_space<vmem>>, %arg5: memref<32x64xbf16, #tpu.memory_space<vmem>>, %arg6: memref<32x32xbf16, #tpu.memory_space<vmem>>, %arg7: memref<1x32xf32, #tpu.memory_space<vmem>>, %arg8: memref<1x32xf32, #tpu.memory_space<vmem>>, %arg9: memref<32x64xbf16, #tpu.memory_space<vmem>>, %arg10: memref<1x64xf32, #tpu.memory_space<vmem>>, %arg11: memref<64x32xbf16, #tpu.memory_space<vmem>>, %arg12: memref<1x32xf32, #tpu.memory_space<vmem>>, %arg13: memref<1x32xf32, #tpu.memory_space<vmem>>, %arg14: memref<1x32xf32, #tpu.memory_space<vmem>>, %arg15: memref<1x8x32xbf16, #tpu.memory_space<vmem>>, %arg16: memref<8x32xbf16, #tpu.memory_space<vmem>>) attributes {dimension_semantics = [#tpu.dimension_semantics<parallel>, #tpu.dimension_semantics<parallel>], iteration_bounds = array<i64: 2, 1>, scalar_prefetch = 0 : i64, scratch_operands = 1 : i64, tpu.core_type = #tpu.core_type<tc>, window_params = [{transform_indices = @transform_0, window_bounds = array<i64: 1, 8, 32>}, {transform_indices = @transform_1, window_bounds = array<i64: 1, 8, 32>}, {pipeline_mode = #tpu.pipeline_mode<synchronous>, transform_indices = @transform_2, window_bounds = array<i64: 32, 32>}, {pipeline_mode = #tpu.pipeline_mode<synchronous>, transform_indices = @transform_3, window_bounds = array<i64: 32, 64>}, {pipeline_mode = #tpu.pipeline_mode<synchronous>, transform_indices = @transform_4, window_bounds = array<i64: 32, 32>}, {pipeline_mode = #tpu.pipeline_mode<synchronous>, transform_indices = @transform_5, window_bounds = array<i64: 1, 32>}, {pipeline_mode = #tpu.pipeline_mode<synchronous>, transform_indices = @transform_6, window_bounds = array<i64: 1, 32>}, {pipeline_mode = #tpu.pipeline_mode<synchronous>, transform_indices = @transform_7, window_bounds = array<i64: 32, 64>}, {pipeline_mode = #tpu.pipeline_mode<synchronous>, transform_indices = @transform_8, window_bounds = array<i64: 1, 64>}, {pipeline_mode = #tpu.pipeline_mode<synchronous>, transform_indices = @transform_9, window_bounds = array<i64: 64, 32>}, {pipeline_mode = #tpu.pipeline_mode<synchronous>, transform_indices = @transform_10, window_bounds = array<i64: 1, 32>}, {pipeline_mode = #tpu.pipeline_mode<synchronous>, transform_indices = @transform_11, window_bounds = array<i64: 1, 32>}, {pipeline_mode = #tpu.pipeline_mode<synchronous>, transform_indices = @transform_12, window_bounds = array<i64: 1, 32>}, {transform_indices = @transform_13, window_bounds = array<i64: 1, 8, 32>}]} {
    %c0 = arith.constant 0 : index
    %c0_0 = arith.constant 0 : index
    %c0_1 = arith.constant 0 : index
    %0 = vector.load %arg2[%c0, %c0_0, %c0_1] : memref<1x8x32xbf16, #tpu.memory_space<vmem>>, vector<1x8x32xbf16>
    %1 = vector.shape_cast %0 : vector<1x8x32xbf16> to vector<8x32xbf16>
    %c0_2 = arith.constant 0 : index
    %c0_3 = arith.constant 0 : index
    %c0_4 = arith.constant 0 : index
    %2 = vector.load %arg3[%c0_2, %c0_3, %c0_4] : memref<1x8x32xbf16, #tpu.memory_space<vmem>>, vector<1x8x32xbf16>
    %3 = vector.shape_cast %2 : vector<1x8x32xbf16> to vector<8x32xbf16>
    %c0_5 = arith.constant 0 : index
    %c0_6 = arith.constant 0 : index
    %4 = vector.load %arg4[%c0_5, %c0_6] : memref<32x32xbf16, #tpu.memory_space<vmem>>, vector<32x32xbf16>
    %cst = arith.constant dense<0.000000e+00> : vector<8x32xf32>
    %5 = tpu.matmul %1, %4, %cst {dimension_numbers = #tpu.dot_dimension_numbers<[1], [0], [0], [1], [0, 0, 1, 1], [], []>} : vector<8x32xbf16>, vector<32x32xbf16>, vector<8x32xf32> -> vector<8x32xf32>
    %6 = arith.truncf %5 : vector<8x32xf32> to vector<8x32xbf16>
    %c0_7 = arith.constant 0 : index
    %c0_8 = arith.constant 0 : index
    %7 = vector.load %arg5[%c0_7, %c0_8] : memref<32x64xbf16, #tpu.memory_space<vmem>>, vector<32x64xbf16>
    %cst_9 = arith.constant dense<0.000000e+00> : vector<8x64xf32>
    %8 = tpu.matmul %3, %7, %cst_9 {dimension_numbers = #tpu.dot_dimension_numbers<[1], [0], [0], [1], [0, 0, 1, 1], [], []>} : vector<8x32xbf16>, vector<32x64xbf16>, vector<8x64xf32> -> vector<8x64xf32>
    %9 = arith.truncf %8 : vector<8x64xf32> to vector<8x64xbf16>
    %c0_10 = arith.constant 0 : index
    %c0_11 = arith.constant 0 : index
    %10 = vector.load %arg6[%c0_10, %c0_11] : memref<32x32xbf16, #tpu.memory_space<vmem>>, vector<32x32xbf16>
    %11 = vector.extract_strided_slice %6 {offsets = [0, 0], sizes = [8, 16], strides = [1, 1]} : vector<8x32xbf16> to vector<8x16xbf16>
    %12 = vector.extract_strided_slice %9 {offsets = [0, 0], sizes = [8, 16], strides = [1, 1]} : vector<8x64xbf16> to vector<8x16xbf16>
    %13 = vector.extract_strided_slice %9 {offsets = [0, 32], sizes = [8, 16], strides = [1, 1]} : vector<8x64xbf16> to vector<8x16xbf16>
    %cst_12 = arith.constant dense<0.000000e+00> : vector<8x8xf32>
    %14 = tpu.matmul %11, %12, %cst_12 {dimension_numbers = #tpu.dot_dimension_numbers<[1], [1], [0], [0], [0, 0, 1, 0], [], []>} : vector<8x16xbf16>, vector<8x16xbf16>, vector<8x8xf32> -> vector<8x8xf32>
    %cst_13 = arith.constant dense<0xFF800000> : vector<8xf32>
    %15 = vector.multi_reduction <maximumf>, %14, %cst_13 [1] : vector<8x8xf32> to vector<8xf32>
    %16 = vector.shape_cast %15 : vector<8xf32> to vector<8x1xf32>
    %17 = vector.broadcast %16 : vector<8x1xf32> to vector<8x8xf32>
    %18 = arith.subf %14, %17 : vector<8x8xf32>
    %19 = math.exp %18 : vector<8x8xf32>
    %cst_14 = arith.constant dense<0.000000e+00> : vector<8xf32>
    %20 = vector.multi_reduction <add>, %19, %cst_14 [1] : vector<8x8xf32> to vector<8xf32>
    %21 = vector.shape_cast %20 : vector<8xf32> to vector<8x1xf32>
    %22 = tpu.reciprocal %21 {approx = true} : vector<8x1xf32> -> vector<8x1xf32>
    %23 = vector.broadcast %22 : vector<8x1xf32> to vector<8x8xf32>
    %24 = arith.mulf %19, %23 : vector<8x8xf32>
    %25 = arith.truncf %24 : vector<8x8xf32> to vector<8x8xbf16>
    %cst_15 = arith.constant dense<0.000000e+00> : vector<8x16xf32>
    %26 = tpu.matmul %25, %13, %cst_15 {dimension_numbers = #tpu.dot_dimension_numbers<[1], [0], [0], [1], [0, 0, 1, 1], [], []>} : vector<8x8xbf16>, vector<8x16xbf16>, vector<8x16xf32> -> vector<8x16xf32>
    %27 = arith.truncf %26 : vector<8x16xf32> to vector<8x16xbf16>
    %c0_16 = arith.constant 0 : index
    %c0_17 = arith.constant 0 : index
    %28 = vector.load %arg16[%c0_16, %c0_17] : memref<8x32xbf16, #tpu.memory_space<vmem>>, vector<8x16xbf16>
    tpu.vector_store %arg16[%c0_16, %c0_17], %27 {strides = array<i32>} : memref<8x32xbf16, #tpu.memory_space<vmem>>, vector<8x16xbf16>,
    %29 = vector.extract_strided_slice %6 {offsets = [0, 16], sizes = [8, 16], strides = [1, 1]} : vector<8x32xbf16> to vector<8x16xbf16>
    %30 = vector.extract_strided_slice %9 {offsets = [0, 16], sizes = [8, 16], strides = [1, 1]} : vector<8x64xbf16> to vector<8x16xbf16>
    %31 = vector.extract_strided_slice %9 {offsets = [0, 48], sizes = [8, 16], strides = [1, 1]} : vector<8x64xbf16> to vector<8x16xbf16>
    %cst_18 = arith.constant dense<0.000000e+00> : vector<8x8xf32>
    %32 = tpu.matmul %29, %30, %cst_18 {dimension_numbers = #tpu.dot_dimension_numbers<[1], [1], [0], [0], [0, 0, 1, 0], [], []>} : vector<8x16xbf16>, vector<8x16xbf16>, vector<8x8xf32> -> vector<8x8xf32>
    %cst_19 = arith.constant dense<0xFF800000> : vector<8xf32>
    %33 = vector.multi_reduction <maximumf>, %32, %cst_19 [1] : vector<8x8xf32> to vector<8xf32>
    %34 = vector.shape_cast %33 : vector<8xf32> to vector<8x1xf32>
    %35 = vector.broadcast %34 : vector<8x1xf32> to vector<8x8xf32>
    %36 = arith.subf %32, %35 : vector<8x8xf32>
    %37 = math.exp %36 : vector<8x8xf32>
    %cst_20 = arith.constant dense<0.000000e+00> : vector<8xf32>
    %38 = vector.multi_reduction <add>, %37, %cst_20 [1] : vector<8x8xf32> to vector<8xf32>
    %39 = vector.shape_cast %38 : vector<8xf32> to vector<8x1xf32>
    %40 = tpu.reciprocal %39 {approx = true} : vector<8x1xf32> -> vector<8x1xf32>
    %41 = vector.broadcast %40 : vector<8x1xf32> to vector<8x8xf32>
    %42 = arith.mulf %37, %41 : vector<8x8xf32>
    %43 = arith.truncf %42 : vector<8x8xf32> to vector<8x8xbf16>
    %cst_21 = arith.constant dense<0.000000e+00> : vector<8x16xf32>
    %44 = tpu.matmul %43, %31, %cst_21 {dimension_numbers = #tpu.dot_dimension_numbers<[1], [0], [0], [1], [0, 0, 1, 1], [], []>} : vector<8x8xbf16>, vector<8x16xbf16>, vector<8x16xf32> -> vector<8x16xf32>
    %45 = arith.truncf %44 : vector<8x16xf32> to vector<8x16xbf16>
    %c0_22 = arith.constant 0 : index
    %c16 = arith.constant 16 : index
    %46 = vector.load %arg16[%c0_22, %c16] : memref<8x32xbf16, #tpu.memory_space<vmem>>, vector<8x16xbf16>
    tpu.vector_store %arg16[%c0_22, %c16], %45 {strides = array<i32>} : memref<8x32xbf16, #tpu.memory_space<vmem>>, vector<8x16xbf16>,
    %c0_23 = arith.constant 0 : index
    %c0_24 = arith.constant 0 : index
    %47 = vector.load %arg16[%c0_23, %c0_24] : memref<8x32xbf16, #tpu.memory_space<vmem>>, vector<8x32xbf16>
    %cst_25 = arith.constant dense<0.000000e+00> : vector<8x32xf32>
    %48 = tpu.matmul %47, %10, %cst_25 {dimension_numbers = #tpu.dot_dimension_numbers<[1], [0], [0], [1], [0, 0, 1, 1], [], []>} : vector<8x32xbf16>, vector<32x32xbf16>, vector<8x32xf32> -> vector<8x32xf32>
    %49 = arith.extf %1 : vector<8x32xbf16> to vector<8x32xf32>
    %50 = arith.addf %48, %49 : vector<8x32xf32>
    %c0_26 = arith.constant 0 : index
    %c0_27 = arith.constant 0 : index
    %51 = vector.load %arg7[%c0_26, %c0_27] : memref<1x32xf32, #tpu.memory_space<vmem>>, vector<1x32xf32>
    %c0_28 = arith.constant 0 : index
    %c0_29 = arith.constant 0 : index
    %52 = vector.load %arg8[%c0_28, %c0_29] : memref<1x32xf32, #tpu.memory_space<vmem>>, vector<1x32xf32>
    %cst_30 = arith.constant dense<0.000000e+00> : vector<8xf32>
    %53 = vector.multi_reduction <add>, %50, %cst_30 [1] : vector<8x32xf32> to vector<8xf32>
    %54 = vector.shape_cast %53 : vector<8xf32> to vector<8x1xf32>
    %cst_31 = arith.constant 3.200000e+01 : f32
    %55 = vector.broadcast %cst_31 : f32 to vector<8x1xf32>
    %56 = arith.divf %54, %55 : vector<8x1xf32>
    %57 = vector.broadcast %56 : vector<8x1xf32> to vector<8x32xf32>
    %58 = arith.subf %50, %57 : vector<8x32xf32>
    %59 = arith.mulf %58, %58 : vector<8x32xf32>
    %cst_32 = arith.constant dense<0.000000e+00> : vector<8xf32>
    %60 = vector.multi_reduction <add>, %59, %cst_32 [1] : vector<8x32xf32> to vector<8xf32>
    %61 = vector.shape_cast %60 : vector<8xf32> to vector<8x1xf32>
    %cst_33 = arith.constant 3.200000e+01 : f32
    %62 = vector.broadcast %cst_33 : f32 to vector<8x1xf32>
    %63 = arith.divf %61, %62 : vector<8x1xf32>
    %cst_34 = arith.constant 9.99999974E-6 : f32
    %64 = vector.broadcast %cst_34 : f32 to vector<8x1xf32>
    %65 = arith.addf %63, %64 : vector<8x1xf32>
    %66 = math.rsqrt %65 : vector<8x1xf32>
    %67 = vector.broadcast %66 : vector<8x1xf32> to vector<8x32xf32>
    %68 = arith.mulf %58, %67 : vector<8x32xf32>
    %69 = vector.broadcast %51 : vector<1x32xf32> to vector<8x32xf32>
    %70 = arith.mulf %68, %69 : vector<8x32xf32>
    %71 = vector.broadcast %52 : vector<1x32xf32> to vector<8x32xf32>
    %72 = arith.addf %70, %71 : vector<8x32xf32>
    %c0_35 = arith.constant 0 : index
    %c0_36 = arith.constant 0 : index
    %73 = vector.load %arg9[%c0_35, %c0_36] : memref<32x64xbf16, #tpu.memory_space<vmem>>, vector<32x64xbf16>
    %c0_37 = arith.constant 0 : index
    %c0_38 = arith.constant 0 : index
    %74 = vector.load %arg10[%c0_37, %c0_38] : memref<1x64xf32, #tpu.memory_space<vmem>>, vector<1x64xf32>
    %c0_39 = arith.constant 0 : index
    %c0_40 = arith.constant 0 : index
    %75 = vector.load %arg11[%c0_39, %c0_40] : memref<64x32xbf16, #tpu.memory_space<vmem>>, vector<64x32xbf16>
    %c0_41 = arith.constant 0 : index
    %c0_42 = arith.constant 0 : index
    %76 = vector.load %arg12[%c0_41, %c0_42] : memref<1x32xf32, #tpu.memory_space<vmem>>, vector<1x32xf32>
    %77 = arith.truncf %72 : vector<8x32xf32> to vector<8x32xbf16>
    %cst_43 = arith.constant dense<0.000000e+00> : vector<8x64xf32>
    %78 = tpu.matmul %77, %73, %cst_43 {dimension_numbers = #tpu.dot_dimension_numbers<[1], [0], [0], [1], [0, 0, 1, 1], [], []>} : vector<8x32xbf16>, vector<32x64xbf16>, vector<8x64xf32> -> vector<8x64xf32>
    %79 = vector.broadcast %74 : vector<1x64xf32> to vector<8x64xf32>
    %80 = arith.addf %78, %79 : vector<8x64xf32>
    %cst_44 = arith.constant 0.000000e+00 : f32
    %81 = vector.broadcast %cst_44 : f32 to vector<8x64xf32>
    %82 = arith.maximumf %80, %81 : vector<8x64xf32>
    %83 = arith.truncf %82 : vector<8x64xf32> to vector<8x64xbf16>
    %cst_45 = arith.constant dense<0.000000e+00> : vector<8x32xf32>
    %84 = tpu.matmul %83, %75, %cst_45 {dimension_numbers = #tpu.dot_dimension_numbers<[1], [0], [0], [1], [0, 0, 1, 1], [], []>} : vector<8x64xbf16>, vector<64x32xbf16>, vector<8x32xf32> -> vector<8x32xf32>
    %85 = vector.broadcast %76 : vector<1x32xf32> to vector<8x32xf32>
    %86 = arith.addf %84, %85 : vector<8x32xf32>
    %87 = arith.addf %86, %72 : vector<8x32xf32>
    %c0_46 = arith.constant 0 : index
    %c0_47 = arith.constant 0 : index
    %88 = vector.load %arg13[%c0_46, %c0_47] : memref<1x32xf32, #tpu.memory_space<vmem>>, vector<1x32xf32>
    %c0_48 = arith.constant 0 : index
    %c0_49 = arith.constant 0 : index
    %89 = vector.load %arg14[%c0_48, %c0_49] : memref<1x32xf32, #tpu.memory_space<vmem>>, vector<1x32xf32>
    %cst_50 = arith.constant dense<0.000000e+00> : vector<8xf32>
    %90 = vector.multi_reduction <add>, %87, %cst_50 [1] : vector<8x32xf32> to vector<8xf32>
    %91 = vector.shape_cast %90 : vector<8xf32> to vector<8x1xf32>
    %cst_51 = arith.constant 3.200000e+01 : f32
    %92 = vector.broadcast %cst_51 : f32 to vector<8x1xf32>
    %93 = arith.divf %91, %92 : vector<8x1xf32>
    %94 = vector.broadcast %93 : vector<8x1xf32> to vector<8x32xf32>
    %95 = arith.subf %87, %94 : vector<8x32xf32>
    %96 = arith.mulf %95, %95 : vector<8x32xf32>
    %cst_52 = arith.constant dense<0.000000e+00> : vector<8xf32>
    %97 = vector.multi_reduction <add>, %96, %cst_52 [1] : vector<8x32xf32> to vector<8xf32>
    %98 = vector.shape_cast %97 : vector<8xf32> to vector<8x1xf32>
    %cst_53 = arith.constant 3.200000e+01 : f32
    %99 = vector.broadcast %cst_53 : f32 to vector<8x1xf32>
    %100 = arith.divf %98, %99 : vector<8x1xf32>
    %cst_54 = arith.constant 9.99999974E-6 : f32
    %101 = vector.broadcast %cst_54 : f32 to vector<8x1xf32>
    %102 = arith.addf %100, %101 : vector<8x1xf32>
    %103 = math.rsqrt %102 : vector<8x1xf32>
    %104 = vector.broadcast %103 : vector<8x1xf32> to vector<8x32xf32>
    %105 = arith.mulf %95, %104 : vector<8x32xf32>
    %106 = vector.broadcast %88 : vector<1x32xf32> to vector<8x32xf32>
    %107 = arith.mulf %105, %106 : vector<8x32xf32>
    %108 = vector.broadcast %89 : vector<1x32xf32> to vector<8x32xf32>
    %109 = arith.addf %107, %108 : vector<8x32xf32>
    %110 = arith.truncf %109 : vector<8x32xf32> to vector<8x32xbf16>
    %c0_55 = arith.constant 0 : index
    %c0_56 = arith.constant 0 : index
    %c0_57 = arith.constant 0 : index
    %111 = vector.load %arg15[%c0_55, %c0_56, %c0_57] : memref<1x8x32xbf16, #tpu.memory_space<vmem>>, vector<1x8x32xbf16>
    %112 = vector.shape_cast %111 : vector<1x8x32xbf16> to vector<8x32xbf16>
    %113 = vector.shape_cast %110 : vector<8x32xbf16> to vector<1x8x32xbf16>
    tpu.vector_store %arg15[%c0_55, %c0_56, %c0_57], %113 {strides = array<i32>} : memref<1x8x32xbf16, #tpu.memory_space<vmem>>, vector<1x8x32xbf16>,
    return
  }
  func.func @transform_0(%arg0: i32, %arg1: i32) -> (i32, i32, i32) {
    %c0_i32 = arith.constant 0 : i32
    %c0_i32_0 = arith.constant 0 : i32
    return %arg0, %arg1, %c0_i32 : i32, i32, i32
  }
  func.func @transform_1(%arg0: i32, %arg1: i32) -> (i32, i32, i32) {
    %c0_i32 = arith.constant 0 : i32
    %c0_i32_0 = arith.constant 0 : i32
    %c0_i32_1 = arith.constant 0 : i32
    return %arg0, %c0_i32, %c0_i32_0 : i32, i32, i32
  }
  func.func @transform_2(%arg0: i32, %arg1: i32) -> (i32, i32) {
    %c0_i32 = arith.constant 0 : i32
    %c0_i32_0 = arith.constant 0 : i32
    %c0_i32_1 = arith.constant 0 : i32
    return %c0_i32, %c0_i32_0 : i32, i32
  }
  func.func @transform_3(%arg0: i32, %arg1: i32) -> (i32, i32) {
    %c0_i32 = arith.constant 0 : i32
    %c0_i32_0 = arith.constant 0 : i32
    %c0_i32_1 = arith.constant 0 : i32
    return %c0_i32, %c0_i32_0 : i32, i32
  }
  func.func @transform_4(%arg0: i32, %arg1: i32) -> (i32, i32) {
    %c0_i32 = arith.constant 0 : i32
    %c0_i32_0 = arith.constant 0 : i32
    %c0_i32_1 = arith.constant 0 : i32
    return %c0_i32, %c0_i32_0 : i32, i32
  }
  func.func @transform_5(%arg0: i32, %arg1: i32) -> (i32, i32) {
    %c0_i32 = arith.constant 0 : i32
    %c0_i32_0 = arith.constant 0 : i32
    %c0_i32_1 = arith.constant 0 : i32
    return %c0_i32, %c0_i32_0 : i32, i32
  }
  func.func @transform_6(%arg0: i32, %arg1: i32) -> (i32, i32) {
    %c0_i32 = arith.constant 0 : i32
    %c0_i32_0 = arith.constant 0 : i32
    %c0_i32_1 = arith.constant 0 : i32
    return %c0_i32, %c0_i32_0 : i32, i32
  }
  func.func @transform_7(%arg0: i32, %arg1: i32) -> (i32, i32) {
    %c0_i32 = arith.constant 0 : i32
    %c0_i32_0 = arith.constant 0 : i32
    %c0_i32_1 = arith.constant 0 : i32
    return %c0_i32, %c0_i32_0 : i32, i32
  }
  func.func @transform_8(%arg0: i32, %arg1: i32) -> (i32, i32) {
    %c0_i32 = arith.constant 0 : i32
    %c0_i32_0 = arith.constant 0 : i32
    %c0_i32_1 = arith.constant 0 : i32
    return %c0_i32, %c0_i32_0 : i32, i32
  }
  func.func @transform_9(%arg0: i32, %arg1: i32) -> (i32, i32) {
    %c0_i32 = arith.constant 0 : i32
    %c0_i32_0 = arith.constant 0 : i32
    %c0_i32_1 = arith.constant 0 : i32
    return %c0_i32, %c0_i32_0 : i32, i32
  }
  func.func @transform_10(%arg0: i32, %arg1: i32) -> (i32, i32) {
    %c0_i32 = arith.constant 0 : i32
    %c0_i32_0 = arith.constant 0 : i32
    %c0_i32_1 = arith.constant 0 : i32
    return %c0_i32, %c0_i32_0 : i32, i32
  }
  func.func @transform_11(%arg0: i32, %arg1: i32) -> (i32, i32) {
    %c0_i32 = arith.constant 0 : i32
    %c0_i32_0 = arith.constant 0 : i32
    %c0_i32_1 = arith.constant 0 : i32
    return %c0_i32, %c0_i32_0 : i32, i32
  }
  func.func @transform_12(%arg0: i32, %arg1: i32) -> (i32, i32) {
    %c0_i32 = arith.constant 0 : i32
    %c0_i32_0 = arith.constant 0 : i32
    %c0_i32_1 = arith.constant 0 : i32
    return %c0_i32, %c0_i32_0 : i32, i32
  }
  func.func @transform_13(%arg0: i32, %arg1: i32) -> (i32, i32, i32) {
    %c0_i32 = arith.constant 0 : i32
    %c0_i32_0 = arith.constant 0 : i32
    return %arg0, %arg1, %c0_i32 : i32, i32, i32
  }
}

module attributes {stable_mosaic.version = 11 : i64} {
  func.func @_logits_kernel(%arg0: i32, %arg1: i32, %arg2: i32, %arg3: memref<16x32xbf16, #tpu.memory_space<vmem>>, %arg4: memref<256x32xbf16, #tpu.memory_space<vmem>>, %arg5: memref<1x256xf32, #tpu.memory_space<vmem>>, %arg6: memref<16x256xbf16, #tpu.memory_space<vmem>>, %arg7: memref<16x1xf32, #tpu.memory_space<vmem>>, %arg8: memref<16x1xf32, #tpu.memory_space<vmem>>) attributes {dimension_semantics = [#tpu.dimension_semantics<parallel>, #tpu.dimension_semantics<arbitrary>, #tpu.dimension_semantics<arbitrary>], iteration_bounds = array<i64: 1, 2, 1>, scalar_prefetch = 0 : i64, scratch_operands = 2 : i64, tpu.core_type = #tpu.core_type<tc>, window_params = [{pipeline_mode = #tpu.pipeline_mode<synchronous>, transform_indices = @transform_0, window_bounds = array<i64: 16, 32>}, {transform_indices = @transform_1, window_bounds = array<i64: 256, 32>}, {transform_indices = @transform_2, window_bounds = array<i64: 1, 256>}, {transform_indices = @transform_3, window_bounds = array<i64: 16, 256>}]} {
    %c0_i32 = arith.constant 0 : i32
    %0 = arith.cmpi eq, %arg1, %c0_i32 : i32
    %c0_i32_0 = arith.constant 0 : i32
    %1 = arith.cmpi eq, %arg2, %c0_i32_0 : i32
    %2 = arith.andi %0, %1 : i1
    %3 = arith.extui %2 : i1 to i32
    %c0_i32_1 = arith.constant 0 : i32
    %4 = arith.cmpi ne, %3, %c0_i32_1 : i32
    scf.if %4 {
      %cst_10 = arith.constant 0xFF800000 : f32
      %17 = vector.broadcast %cst_10 : f32 to vector<16x1xf32>
      %c0_11 = arith.constant 0 : index
      %c0_12 = arith.constant 0 : index
      %18 = vector.load %arg7[%c0_11, %c0_12] : memref<16x1xf32, #tpu.memory_space<vmem>>, vector<16x1xf32>
      tpu.vector_store %arg7[%c0_11, %c0_12], %17 {strides = array<i32>} : memref<16x1xf32, #tpu.memory_space<vmem>>, vector<16x1xf32>,
      %cst_13 = arith.constant 0.000000e+00 : f32
      %19 = vector.broadcast %cst_13 : f32 to vector<16x1xf32>
      %c0_14 = arith.constant 0 : index
      %c0_15 = arith.constant 0 : index
      %20 = vector.load %arg8[%c0_14, %c0_15] : memref<16x1xf32, #tpu.memory_space<vmem>>, vector<16x1xf32>
      tpu.vector_store %arg8[%c0_14, %c0_15], %19 {strides = array<i32>} : memref<16x1xf32, #tpu.memory_space<vmem>>, vector<16x1xf32>,
      %cst_16 = arith.constant 0.000000e+00 : bf16
      %21 = vector.broadcast %cst_16 : bf16 to vector<16x256xbf16>
      %c0_17 = arith.constant 0 : index
      %c0_18 = arith.constant 0 : index
      %22 = vector.load %arg6[%c0_17, %c0_18] : memref<16x256xbf16, #tpu.memory_space<vmem>>, vector<16x256xbf16>
      tpu.vector_store %arg6[%c0_17, %c0_18], %21 {strides = array<i32>} : memref<16x256xbf16, #tpu.memory_space<vmem>>, vector<16x256xbf16>,
    } else {
    }
    %c0 = arith.constant 0 : index
    %c0_2 = arith.constant 0 : index
    %5 = vector.load %arg3[%c0, %c0_2] : memref<16x32xbf16, #tpu.memory_space<vmem>>, vector<16x32xbf16>
    %c0_3 = arith.constant 0 : index
    %c0_4 = arith.constant 0 : index
    %6 = vector.load %arg4[%c0_3, %c0_4] : memref<256x32xbf16, #tpu.memory_space<vmem>>, vector<256x32xbf16>
    %cst = arith.constant dense<0.000000e+00> : vector<16x256xf32>
    %7 = tpu.matmul %5, %6, %cst {dimension_numbers = #tpu.dot_dimension_numbers<[1], [1], [0], [0], [0, 0, 1, 0], [], []>} : vector<16x32xbf16>, vector<256x32xbf16>, vector<16x256xf32> -> vector<16x256xf32>
    %c0_5 = arith.constant 0 : index
    %c0_6 = arith.constant 0 : index
    %8 = vector.load %arg5[%c0_5, %c0_6] : memref<1x256xf32, #tpu.memory_space<vmem>>, vector<1x256xf32>
    %9 = vector.broadcast %8 : vector<1x256xf32> to vector<16x256xf32>
    %10 = arith.addf %7, %9 : vector<16x256xf32>
    %c0_i32_7 = arith.constant 0 : i32
    %11 = arith.cmpi eq, %arg1, %c0_i32_7 : i32
    %12 = arith.extui %11 : i1 to i32
    %c0_i32_8 = arith.constant 0 : i32
    %13 = arith.cmpi ne, %12, %c0_i32_8 : i32
    scf.if %13 {
      %c0_10 = arith.constant 0 : index
      %c0_11 = arith.constant 0 : index
      %17 = vector.load %arg7[%c0_10, %c0_11] : memref<16x1xf32, #tpu.memory_space<vmem>>, vector<16x1xf32>
      %cst_12 = arith.constant dense<0xFF800000> : vector<16xf32>
      %18 = vector.multi_reduction <maximumf>, %10, %cst_12 [1] : vector<16x256xf32> to vector<16xf32>
      %19 = vector.shape_cast %18 : vector<16xf32> to vector<16x1xf32>
      %20 = arith.maximumf %17, %19 : vector<16x1xf32>
      %c0_13 = arith.constant 0 : index
      %c0_14 = arith.constant 0 : index
      %21 = vector.load %arg8[%c0_13, %c0_14] : memref<16x1xf32, #tpu.memory_space<vmem>>, vector<16x1xf32>
      %22 = arith.subf %17, %20 : vector<16x1xf32>
      %23 = math.exp %22 : vector<16x1xf32>
      %24 = arith.mulf %21, %23 : vector<16x1xf32>
      %25 = vector.broadcast %20 : vector<16x1xf32> to vector<16x256xf32>
      %26 = arith.subf %10, %25 : vector<16x256xf32>
      %27 = math.exp %26 : vector<16x256xf32>
      %cst_15 = arith.constant dense<0.000000e+00> : vector<16xf32>
      %28 = vector.multi_reduction <add>, %27, %cst_15 [1] : vector<16x256xf32> to vector<16xf32>
      %29 = vector.shape_cast %28 : vector<16xf32> to vector<16x1xf32>
      %30 = arith.addf %24, %29 : vector<16x1xf32>
      %c0_16 = arith.constant 0 : index
      %c0_17 = arith.constant 0 : index
      %31 = vector.load %arg8[%c0_16, %c0_17] : memref<16x1xf32, #tpu.memory_space<vmem>>, vector<16x1xf32>
      tpu.vector_store %arg8[%c0_16, %c0_17], %30 {strides = array<i32>} : memref<16x1xf32, #tpu.memory_space<vmem>>, vector<16x1xf32>,
      %c0_18 = arith.constant 0 : index
      %c0_19 = arith.constant 0 : index
      %32 = vector.load %arg7[%c0_18, %c0_19] : memref<16x1xf32, #tpu.memory_space<vmem>>, vector<16x1xf32>
      tpu.vector_store %arg7[%c0_18, %c0_19], %20 {strides = array<i32>} : memref<16x1xf32, #tpu.memory_space<vmem>>, vector<16x1xf32>,
    } else {
    }
    %c1_i32 = arith.constant 1 : i32
    %14 = arith.cmpi eq, %arg1, %c1_i32 : i32
    %15 = arith.extui %14 : i1 to i32
    %c0_i32_9 = arith.constant 0 : i32
    %16 = arith.cmpi ne, %15, %c0_i32_9 : i32
    scf.if %16 {
      %c0_10 = arith.constant 0 : index
      %c0_11 = arith.constant 0 : index
      %17 = vector.load %arg7[%c0_10, %c0_11] : memref<16x1xf32, #tpu.memory_space<vmem>>, vector<16x1xf32>
      %c0_12 = arith.constant 0 : index
      %c0_13 = arith.constant 0 : index
      %18 = vector.load %arg8[%c0_12, %c0_13] : memref<16x1xf32, #tpu.memory_space<vmem>>, vector<16x1xf32>
      %19 = math.log %18 : vector<16x1xf32>
      %20 = arith.addf %17, %19 : vector<16x1xf32>
      %21 = vector.broadcast %20 : vector<16x1xf32> to vector<16x256xf32>
      %22 = arith.subf %10, %21 : vector<16x256xf32>
      %23 = arith.truncf %22 : vector<16x256xf32> to vector<16x256xbf16>
      %c0_14 = arith.constant 0 : index
      %c0_15 = arith.constant 0 : index
      %24 = vector.load %arg6[%c0_14, %c0_15] : memref<16x256xbf16, #tpu.memory_space<vmem>>, vector<16x256xbf16>
      tpu.vector_store %arg6[%c0_14, %c0_15], %23 {strides = array<i32>} : memref<16x256xbf16, #tpu.memory_space<vmem>>, vector<16x256xbf16>,
    } else {
    }
    return
  }
  func.func @transform_0(%arg0: i32, %arg1: i32, %arg2: i32) -> (i32, i32) {
    %c0_i32 = arith.constant 0 : i32
    %c0_i32_0 = arith.constant 0 : i32
    return %arg0, %c0_i32 : i32, i32
  }
  func.func @transform_1(%arg0: i32, %arg1: i32, %arg2: i32) -> (i32, i32) {
    %c0_i32 = arith.constant 0 : i32
    %c0_i32_0 = arith.constant 0 : i32
    return %arg2, %c0_i32 : i32, i32
  }
  func.func @transform_2(%arg0: i32, %arg1: i32, %arg2: i32) -> (i32, i32) {
    %c0_i32 = arith.constant 0 : i32
    %c0_i32_0 = arith.constant 0 : i32
    return %c0_i32, %arg2 : i32, i32
  }
  func.func @transform_3(%arg0: i32, %arg1: i32, %arg2: i32) -> (i32, i32) {
    %0 = arith.muli %arg2, %arg1 : i32
    %c0_i32 = arith.constant 0 : i32
    return %arg0, %0 : i32, i32
  }
}

module attributes {stable_mosaic.version = 11 : i64} {
  func.func @_decoder_block_kernel(%arg0: i32, %arg1: i32, %arg2: memref<1x8x32xbf16, #tpu.memory_space<vmem>>, %arg3: memref<1x8x32xbf16, #tpu.memory_space<vmem>>, %arg4: memref<1x8x32xbf16, #tpu.memory_space<vmem>>, %arg5: memref<32x32xbf16, #tpu.memory_space<vmem>>, %arg6: memref<32x64xbf16, #tpu.memory_space<vmem>>, %arg7: memref<32x32xbf16, #tpu.memory_space<vmem>>, %arg8: memref<1x32xf32, #tpu.memory_space<vmem>>, %arg9: memref<1x32xf32, #tpu.memory_space<vmem>>, %arg10: memref<32x32xbf16, #tpu.memory_space<vmem>>, %arg11: memref<32x64xbf16, #tpu.memory_space<vmem>>, %arg12: memref<32x32xbf16, #tpu.memory_space<vmem>>, %arg13: memref<1x32xf32, #tpu.memory_space<vmem>>, %arg14: memref<1x32xf32, #tpu.memory_space<vmem>>, %arg15: memref<32x64xbf16, #tpu.memory_space<vmem>>, %arg16: memref<1x64xf32, #tpu.memory_space<vmem>>, %arg17: memref<64x32xbf16, #tpu.memory_space<vmem>>, %arg18: memref<1x32xf32, #tpu.memory_space<vmem>>, %arg19: memref<1x32xf32, #tpu.memory_space<vmem>>, %arg20: memref<1x32xf32, #tpu.memory_space<vmem>>, %arg21: memref<1x8x32xbf16, #tpu.memory_space<vmem>>, %arg22: memref<8x32xbf16, #tpu.memory_space<vmem>>) attributes {dimension_semantics = [#tpu.dimension_semantics<parallel>, #tpu.dimension_semantics<parallel>], iteration_bounds = array<i64: 2, 1>, scalar_prefetch = 0 : i64, scratch_operands = 1 : i64, tpu.core_type = #tpu.core_type<tc>, window_params = [{transform_indices = @transform_0, window_bounds = array<i64: 1, 8, 32>}, {transform_indices = @transform_1, window_bounds = array<i64: 1, 8, 32>}, {transform_indices = @transform_2, window_bounds = array<i64: 1, 8, 32>}, {pipeline_mode = #tpu.pipeline_mode<synchronous>, transform_indices = @transform_3, window_bounds = array<i64: 32, 32>}, {pipeline_mode = #tpu.pipeline_mode<synchronous>, transform_indices = @transform_4, window_bounds = array<i64: 32, 64>}, {pipeline_mode = #tpu.pipeline_mode<synchronous>, transform_indices = @transform_5, window_bounds = array<i64: 32, 32>}, {pipeline_mode = #tpu.pipeline_mode<synchronous>, transform_indices = @transform_6, window_bounds = array<i64: 1, 32>}, {pipeline_mode = #tpu.pipeline_mode<synchronous>, transform_indices = @transform_7, window_bounds = array<i64: 1, 32>}, {pipeline_mode = #tpu.pipeline_mode<synchronous>, transform_indices = @transform_8, window_bounds = array<i64: 32, 32>}, {pipeline_mode = #tpu.pipeline_mode<synchronous>, transform_indices = @transform_9, window_bounds = array<i64: 32, 64>}, {pipeline_mode = #tpu.pipeline_mode<synchronous>, transform_indices = @transform_10, window_bounds = array<i64: 32, 32>}, {pipeline_mode = #tpu.pipeline_mode<synchronous>, transform_indices = @transform_11, window_bounds = array<i64: 1, 32>}, {pipeline_mode = #tpu.pipeline_mode<synchronous>, transform_indices = @transform_12, window_bounds = array<i64: 1, 32>}, {pipeline_mode = #tpu.pipeline_mode<synchronous>, transform_indices = @transform_13, window_bounds = array<i64: 32, 64>}, {pipeline_mode = #tpu.pipeline_mode<synchronous>, transform_indices = @transform_14, window_bounds = array<i64: 1, 64>}, {pipeline_mode = #tpu.pipeline_mode<synchronous>, transform_indices = @transform_15, window_bounds = array<i64: 64, 32>}, {pipeline_mode = #tpu.pipeline_mode<synchronous>, transform_indices = @transform_16, window_bounds = array<i64: 1, 32>}, {pipeline_mode = #tpu.pipeline_mode<synchronous>, transform_indices = @transform_17, window_bounds = array<i64: 1, 32>}, {pipeline_mode = #tpu.pipeline_mode<synchronous>, transform_indices = @transform_18, window_bounds = array<i64: 1, 32>}, {transform_indices = @transform_19, window_bounds = array<i64: 1, 8, 32>}]} {
    %c0 = arith.constant 0 : index
    %c0_0 = arith.constant 0 : index
    %c0_1 = arith.constant 0 : index
    %0 = vector.load %arg2[%c0, %c0_0, %c0_1] : memref<1x8x32xbf16, #tpu.memory_space<vmem>>, vector<1x8x32xbf16>
    %1 = vector.shape_cast %0 : vector<1x8x32xbf16> to vector<8x32xbf16>
    %c0_2 = arith.constant 0 : index
    %c0_3 = arith.constant 0 : index
    %c0_4 = arith.constant 0 : index
    %2 = vector.load %arg3[%c0_2, %c0_3, %c0_4] : memref<1x8x32xbf16, #tpu.memory_space<vmem>>, vector<1x8x32xbf16>
    %3 = vector.shape_cast %2 : vector<1x8x32xbf16> to vector<8x32xbf16>
    %c0_5 = arith.constant 0 : index
    %c0_6 = arith.constant 0 : index
    %c0_7 = arith.constant 0 : index
    %4 = vector.load %arg4[%c0_5, %c0_6, %c0_7] : memref<1x8x32xbf16, #tpu.memory_space<vmem>>, vector<1x8x32xbf16>
    %5 = vector.shape_cast %4 : vector<1x8x32xbf16> to vector<8x32xbf16>
    %c0_8 = arith.constant 0 : index
    %c0_9 = arith.constant 0 : index
    %6 = vector.load %arg5[%c0_8, %c0_9] : memref<32x32xbf16, #tpu.memory_space<vmem>>, vector<32x32xbf16>
    %cst = arith.constant dense<0.000000e+00> : vector<8x32xf32>
    %7 = tpu.matmul %1, %6, %cst {dimension_numbers = #tpu.dot_dimension_numbers<[1], [0], [0], [1], [0, 0, 1, 1], [], []>} : vector<8x32xbf16>, vector<32x32xbf16>, vector<8x32xf32> -> vector<8x32xf32>
    %8 = arith.truncf %7 : vector<8x32xf32> to vector<8x32xbf16>
    %c0_10 = arith.constant 0 : index
    %c0_11 = arith.constant 0 : index
    %9 = vector.load %arg6[%c0_10, %c0_11] : memref<32x64xbf16, #tpu.memory_space<vmem>>, vector<32x64xbf16>
    %cst_12 = arith.constant dense<0.000000e+00> : vector<8x64xf32>
    %10 = tpu.matmul %3, %9, %cst_12 {dimension_numbers = #tpu.dot_dimension_numbers<[1], [0], [0], [1], [0, 0, 1, 1], [], []>} : vector<8x32xbf16>, vector<32x64xbf16>, vector<8x64xf32> -> vector<8x64xf32>
    %11 = arith.truncf %10 : vector<8x64xf32> to vector<8x64xbf16>
    %c0_13 = arith.constant 0 : index
    %c0_14 = arith.constant 0 : index
    %12 = vector.load %arg7[%c0_13, %c0_14] : memref<32x32xbf16, #tpu.memory_space<vmem>>, vector<32x32xbf16>
    %13 = vector.extract_strided_slice %8 {offsets = [0, 0], sizes = [8, 16], strides = [1, 1]} : vector<8x32xbf16> to vector<8x16xbf16>
    %14 = vector.extract_strided_slice %11 {offsets = [0, 0], sizes = [8, 16], strides = [1, 1]} : vector<8x64xbf16> to vector<8x16xbf16>
    %15 = vector.extract_strided_slice %11 {offsets = [0, 32], sizes = [8, 16], strides = [1, 1]} : vector<8x64xbf16> to vector<8x16xbf16>
    %cst_15 = arith.constant dense<0.000000e+00> : vector<8x8xf32>
    %16 = tpu.matmul %13, %14, %cst_15 {dimension_numbers = #tpu.dot_dimension_numbers<[1], [1], [0], [0], [0, 0, 1, 0], [], []>} : vector<8x16xbf16>, vector<8x16xbf16>, vector<8x8xf32> -> vector<8x8xf32>
    %cst_16 = arith.constant dense<0xFF800000> : vector<8xf32>
    %17 = vector.multi_reduction <maximumf>, %16, %cst_16 [1] : vector<8x8xf32> to vector<8xf32>
    %18 = vector.shape_cast %17 : vector<8xf32> to vector<8x1xf32>
    %19 = vector.broadcast %18 : vector<8x1xf32> to vector<8x8xf32>
    %20 = arith.subf %16, %19 : vector<8x8xf32>
    %21 = math.exp %20 : vector<8x8xf32>
    %cst_17 = arith.constant dense<0.000000e+00> : vector<8xf32>
    %22 = vector.multi_reduction <add>, %21, %cst_17 [1] : vector<8x8xf32> to vector<8xf32>
    %23 = vector.shape_cast %22 : vector<8xf32> to vector<8x1xf32>
    %24 = tpu.reciprocal %23 {approx = true} : vector<8x1xf32> -> vector<8x1xf32>
    %25 = vector.broadcast %24 : vector<8x1xf32> to vector<8x8xf32>
    %26 = arith.mulf %21, %25 : vector<8x8xf32>
    %27 = arith.truncf %26 : vector<8x8xf32> to vector<8x8xbf16>
    %cst_18 = arith.constant dense<0.000000e+00> : vector<8x16xf32>
    %28 = tpu.matmul %27, %15, %cst_18 {dimension_numbers = #tpu.dot_dimension_numbers<[1], [0], [0], [1], [0, 0, 1, 1], [], []>} : vector<8x8xbf16>, vector<8x16xbf16>, vector<8x16xf32> -> vector<8x16xf32>
    %29 = arith.truncf %28 : vector<8x16xf32> to vector<8x16xbf16>
    %c0_19 = arith.constant 0 : index
    %c0_20 = arith.constant 0 : index
    %30 = vector.load %arg22[%c0_19, %c0_20] : memref<8x32xbf16, #tpu.memory_space<vmem>>, vector<8x16xbf16>
    tpu.vector_store %arg22[%c0_19, %c0_20], %29 {strides = array<i32>} : memref<8x32xbf16, #tpu.memory_space<vmem>>, vector<8x16xbf16>,
    %31 = vector.extract_strided_slice %8 {offsets = [0, 16], sizes = [8, 16], strides = [1, 1]} : vector<8x32xbf16> to vector<8x16xbf16>
    %32 = vector.extract_strided_slice %11 {offsets = [0, 16], sizes = [8, 16], strides = [1, 1]} : vector<8x64xbf16> to vector<8x16xbf16>
    %33 = vector.extract_strided_slice %11 {offsets = [0, 48], sizes = [8, 16], strides = [1, 1]} : vector<8x64xbf16> to vector<8x16xbf16>
    %cst_21 = arith.constant dense<0.000000e+00> : vector<8x8xf32>
    %34 = tpu.matmul %31, %32, %cst_21 {dimension_numbers = #tpu.dot_dimension_numbers<[1], [1], [0], [0], [0, 0, 1, 0], [], []>} : vector<8x16xbf16>, vector<8x16xbf16>, vector<8x8xf32> -> vector<8x8xf32>
    %cst_22 = arith.constant dense<0xFF800000> : vector<8xf32>
    %35 = vector.multi_reduction <maximumf>, %34, %cst_22 [1] : vector<8x8xf32> to vector<8xf32>
    %36 = vector.shape_cast %35 : vector<8xf32> to vector<8x1xf32>
    %37 = vector.broadcast %36 : vector<8x1xf32> to vector<8x8xf32>
    %38 = arith.subf %34, %37 : vector<8x8xf32>
    %39 = math.exp %38 : vector<8x8xf32>
    %cst_23 = arith.constant dense<0.000000e+00> : vector<8xf32>
    %40 = vector.multi_reduction <add>, %39, %cst_23 [1] : vector<8x8xf32> to vector<8xf32>
    %41 = vector.shape_cast %40 : vector<8xf32> to vector<8x1xf32>
    %42 = tpu.reciprocal %41 {approx = true} : vector<8x1xf32> -> vector<8x1xf32>
    %43 = vector.broadcast %42 : vector<8x1xf32> to vector<8x8xf32>
    %44 = arith.mulf %39, %43 : vector<8x8xf32>
    %45 = arith.truncf %44 : vector<8x8xf32> to vector<8x8xbf16>
    %cst_24 = arith.constant dense<0.000000e+00> : vector<8x16xf32>
    %46 = tpu.matmul %45, %33, %cst_24 {dimension_numbers = #tpu.dot_dimension_numbers<[1], [0], [0], [1], [0, 0, 1, 1], [], []>} : vector<8x8xbf16>, vector<8x16xbf16>, vector<8x16xf32> -> vector<8x16xf32>
    %47 = arith.truncf %46 : vector<8x16xf32> to vector<8x16xbf16>
    %c0_25 = arith.constant 0 : index
    %c16 = arith.constant 16 : index
    %48 = vector.load %arg22[%c0_25, %c16] : memref<8x32xbf16, #tpu.memory_space<vmem>>, vector<8x16xbf16>
    tpu.vector_store %arg22[%c0_25, %c16], %47 {strides = array<i32>} : memref<8x32xbf16, #tpu.memory_space<vmem>>, vector<8x16xbf16>,
    %c0_26 = arith.constant 0 : index
    %c0_27 = arith.constant 0 : index
    %49 = vector.load %arg22[%c0_26, %c0_27] : memref<8x32xbf16, #tpu.memory_space<vmem>>, vector<8x32xbf16>
    %cst_28 = arith.constant dense<0.000000e+00> : vector<8x32xf32>
    %50 = tpu.matmul %49, %12, %cst_28 {dimension_numbers = #tpu.dot_dimension_numbers<[1], [0], [0], [1], [0, 0, 1, 1], [], []>} : vector<8x32xbf16>, vector<32x32xbf16>, vector<8x32xf32> -> vector<8x32xf32>
    %51 = arith.extf %1 : vector<8x32xbf16> to vector<8x32xf32>
    %52 = arith.addf %50, %51 : vector<8x32xf32>
    %c0_29 = arith.constant 0 : index
    %c0_30 = arith.constant 0 : index
    %53 = vector.load %arg8[%c0_29, %c0_30] : memref<1x32xf32, #tpu.memory_space<vmem>>, vector<1x32xf32>
    %c0_31 = arith.constant 0 : index
    %c0_32 = arith.constant 0 : index
    %54 = vector.load %arg9[%c0_31, %c0_32] : memref<1x32xf32, #tpu.memory_space<vmem>>, vector<1x32xf32>
    %cst_33 = arith.constant dense<0.000000e+00> : vector<8xf32>
    %55 = vector.multi_reduction <add>, %52, %cst_33 [1] : vector<8x32xf32> to vector<8xf32>
    %56 = vector.shape_cast %55 : vector<8xf32> to vector<8x1xf32>
    %cst_34 = arith.constant 3.200000e+01 : f32
    %57 = vector.broadcast %cst_34 : f32 to vector<8x1xf32>
    %58 = arith.divf %56, %57 : vector<8x1xf32>
    %59 = vector.broadcast %58 : vector<8x1xf32> to vector<8x32xf32>
    %60 = arith.subf %52, %59 : vector<8x32xf32>
    %61 = arith.mulf %60, %60 : vector<8x32xf32>
    %cst_35 = arith.constant dense<0.000000e+00> : vector<8xf32>
    %62 = vector.multi_reduction <add>, %61, %cst_35 [1] : vector<8x32xf32> to vector<8xf32>
    %63 = vector.shape_cast %62 : vector<8xf32> to vector<8x1xf32>
    %cst_36 = arith.constant 3.200000e+01 : f32
    %64 = vector.broadcast %cst_36 : f32 to vector<8x1xf32>
    %65 = arith.divf %63, %64 : vector<8x1xf32>
    %cst_37 = arith.constant 9.99999974E-6 : f32
    %66 = vector.broadcast %cst_37 : f32 to vector<8x1xf32>
    %67 = arith.addf %65, %66 : vector<8x1xf32>
    %68 = math.rsqrt %67 : vector<8x1xf32>
    %69 = vector.broadcast %68 : vector<8x1xf32> to vector<8x32xf32>
    %70 = arith.mulf %60, %69 : vector<8x32xf32>
    %71 = vector.broadcast %53 : vector<1x32xf32> to vector<8x32xf32>
    %72 = arith.mulf %70, %71 : vector<8x32xf32>
    %73 = vector.broadcast %54 : vector<1x32xf32> to vector<8x32xf32>
    %74 = arith.addf %72, %73 : vector<8x32xf32>
    %75 = arith.truncf %74 : vector<8x32xf32> to vector<8x32xbf16>
    %c0_38 = arith.constant 0 : index
    %c0_39 = arith.constant 0 : index
    %76 = vector.load %arg10[%c0_38, %c0_39] : memref<32x32xbf16, #tpu.memory_space<vmem>>, vector<32x32xbf16>
    %cst_40 = arith.constant dense<0.000000e+00> : vector<8x32xf32>
    %77 = tpu.matmul %75, %76, %cst_40 {dimension_numbers = #tpu.dot_dimension_numbers<[1], [0], [0], [1], [0, 0, 1, 1], [], []>} : vector<8x32xbf16>, vector<32x32xbf16>, vector<8x32xf32> -> vector<8x32xf32>
    %78 = arith.truncf %77 : vector<8x32xf32> to vector<8x32xbf16>
    %c0_41 = arith.constant 0 : index
    %c0_42 = arith.constant 0 : index
    %79 = vector.load %arg11[%c0_41, %c0_42] : memref<32x64xbf16, #tpu.memory_space<vmem>>, vector<32x64xbf16>
    %cst_43 = arith.constant dense<0.000000e+00> : vector<8x64xf32>
    %80 = tpu.matmul %5, %79, %cst_43 {dimension_numbers = #tpu.dot_dimension_numbers<[1], [0], [0], [1], [0, 0, 1, 1], [], []>} : vector<8x32xbf16>, vector<32x64xbf16>, vector<8x64xf32> -> vector<8x64xf32>
    %81 = arith.truncf %80 : vector<8x64xf32> to vector<8x64xbf16>
    %c0_44 = arith.constant 0 : index
    %c0_45 = arith.constant 0 : index
    %82 = vector.load %arg12[%c0_44, %c0_45] : memref<32x32xbf16, #tpu.memory_space<vmem>>, vector<32x32xbf16>
    %83 = vector.extract_strided_slice %78 {offsets = [0, 0], sizes = [8, 16], strides = [1, 1]} : vector<8x32xbf16> to vector<8x16xbf16>
    %84 = vector.extract_strided_slice %81 {offsets = [0, 0], sizes = [8, 16], strides = [1, 1]} : vector<8x64xbf16> to vector<8x16xbf16>
    %85 = vector.extract_strided_slice %81 {offsets = [0, 32], sizes = [8, 16], strides = [1, 1]} : vector<8x64xbf16> to vector<8x16xbf16>
    %cst_46 = arith.constant dense<0.000000e+00> : vector<8x8xf32>
    %86 = tpu.matmul %83, %84, %cst_46 {dimension_numbers = #tpu.dot_dimension_numbers<[1], [1], [0], [0], [0, 0, 1, 0], [], []>} : vector<8x16xbf16>, vector<8x16xbf16>, vector<8x8xf32> -> vector<8x8xf32>
    %cst_47 = arith.constant dense<0xFF800000> : vector<8xf32>
    %87 = vector.multi_reduction <maximumf>, %86, %cst_47 [1] : vector<8x8xf32> to vector<8xf32>
    %88 = vector.shape_cast %87 : vector<8xf32> to vector<8x1xf32>
    %89 = vector.broadcast %88 : vector<8x1xf32> to vector<8x8xf32>
    %90 = arith.subf %86, %89 : vector<8x8xf32>
    %91 = math.exp %90 : vector<8x8xf32>
    %cst_48 = arith.constant dense<0.000000e+00> : vector<8xf32>
    %92 = vector.multi_reduction <add>, %91, %cst_48 [1] : vector<8x8xf32> to vector<8xf32>
    %93 = vector.shape_cast %92 : vector<8xf32> to vector<8x1xf32>
    %94 = tpu.reciprocal %93 {approx = true} : vector<8x1xf32> -> vector<8x1xf32>
    %95 = vector.broadcast %94 : vector<8x1xf32> to vector<8x8xf32>
    %96 = arith.mulf %91, %95 : vector<8x8xf32>
    %97 = arith.truncf %96 : vector<8x8xf32> to vector<8x8xbf16>
    %cst_49 = arith.constant dense<0.000000e+00> : vector<8x16xf32>
    %98 = tpu.matmul %97, %85, %cst_49 {dimension_numbers = #tpu.dot_dimension_numbers<[1], [0], [0], [1], [0, 0, 1, 1], [], []>} : vector<8x8xbf16>, vector<8x16xbf16>, vector<8x16xf32> -> vector<8x16xf32>
    %99 = arith.truncf %98 : vector<8x16xf32> to vector<8x16xbf16>
    %c0_50 = arith.constant 0 : index
    %c0_51 = arith.constant 0 : index
    %100 = vector.load %arg22[%c0_50, %c0_51] : memref<8x32xbf16, #tpu.memory_space<vmem>>, vector<8x16xbf16>
    tpu.vector_store %arg22[%c0_50, %c0_51], %99 {strides = array<i32>} : memref<8x32xbf16, #tpu.memory_space<vmem>>, vector<8x16xbf16>,
    %101 = vector.extract_strided_slice %78 {offsets = [0, 16], sizes = [8, 16], strides = [1, 1]} : vector<8x32xbf16> to vector<8x16xbf16>
    %102 = vector.extract_strided_slice %81 {offsets = [0, 16], sizes = [8, 16], strides = [1, 1]} : vector<8x64xbf16> to vector<8x16xbf16>
    %103 = vector.extract_strided_slice %81 {offsets = [0, 48], sizes = [8, 16], strides = [1, 1]} : vector<8x64xbf16> to vector<8x16xbf16>
    %cst_52 = arith.constant dense<0.000000e+00> : vector<8x8xf32>
    %104 = tpu.matmul %101, %102, %cst_52 {dimension_numbers = #tpu.dot_dimension_numbers<[1], [1], [0], [0], [0, 0, 1, 0], [], []>} : vector<8x16xbf16>, vector<8x16xbf16>, vector<8x8xf32> -> vector<8x8xf32>
    %cst_53 = arith.constant dense<0xFF800000> : vector<8xf32>
    %105 = vector.multi_reduction <maximumf>, %104, %cst_53 [1] : vector<8x8xf32> to vector<8xf32>
    %106 = vector.shape_cast %105 : vector<8xf32> to vector<8x1xf32>
    %107 = vector.broadcast %106 : vector<8x1xf32> to vector<8x8xf32>
    %108 = arith.subf %104, %107 : vector<8x8xf32>
    %109 = math.exp %108 : vector<8x8xf32>
    %cst_54 = arith.constant dense<0.000000e+00> : vector<8xf32>
    %110 = vector.multi_reduction <add>, %109, %cst_54 [1] : vector<8x8xf32> to vector<8xf32>
    %111 = vector.shape_cast %110 : vector<8xf32> to vector<8x1xf32>
    %112 = tpu.reciprocal %111 {approx = true} : vector<8x1xf32> -> vector<8x1xf32>
    %113 = vector.broadcast %112 : vector<8x1xf32> to vector<8x8xf32>
    %114 = arith.mulf %109, %113 : vector<8x8xf32>
    %115 = arith.truncf %114 : vector<8x8xf32> to vector<8x8xbf16>
    %cst_55 = arith.constant dense<0.000000e+00> : vector<8x16xf32>
    %116 = tpu.matmul %115, %103, %cst_55 {dimension_numbers = #tpu.dot_dimension_numbers<[1], [0], [0], [1], [0, 0, 1, 1], [], []>} : vector<8x8xbf16>, vector<8x16xbf16>, vector<8x16xf32> -> vector<8x16xf32>
    %117 = arith.truncf %116 : vector<8x16xf32> to vector<8x16xbf16>
    %c0_56 = arith.constant 0 : index
    %c16_57 = arith.constant 16 : index
    %118 = vector.load %arg22[%c0_56, %c16_57] : memref<8x32xbf16, #tpu.memory_space<vmem>>, vector<8x16xbf16>
    tpu.vector_store %arg22[%c0_56, %c16_57], %117 {strides = array<i32>} : memref<8x32xbf16, #tpu.memory_space<vmem>>, vector<8x16xbf16>,
    %c0_58 = arith.constant 0 : index
    %c0_59 = arith.constant 0 : index
    %119 = vector.load %arg22[%c0_58, %c0_59] : memref<8x32xbf16, #tpu.memory_space<vmem>>, vector<8x32xbf16>
    %cst_60 = arith.constant dense<0.000000e+00> : vector<8x32xf32>
    %120 = tpu.matmul %119, %82, %cst_60 {dimension_numbers = #tpu.dot_dimension_numbers<[1], [0], [0], [1], [0, 0, 1, 1], [], []>} : vector<8x32xbf16>, vector<32x32xbf16>, vector<8x32xf32> -> vector<8x32xf32>
    %121 = arith.addf %120, %74 : vector<8x32xf32>
    %c0_61 = arith.constant 0 : index
    %c0_62 = arith.constant 0 : index
    %122 = vector.load %arg13[%c0_61, %c0_62] : memref<1x32xf32, #tpu.memory_space<vmem>>, vector<1x32xf32>
    %c0_63 = arith.constant 0 : index
    %c0_64 = arith.constant 0 : index
    %123 = vector.load %arg14[%c0_63, %c0_64] : memref<1x32xf32, #tpu.memory_space<vmem>>, vector<1x32xf32>
    %cst_65 = arith.constant dense<0.000000e+00> : vector<8xf32>
    %124 = vector.multi_reduction <add>, %121, %cst_65 [1] : vector<8x32xf32> to vector<8xf32>
    %125 = vector.shape_cast %124 : vector<8xf32> to vector<8x1xf32>
    %cst_66 = arith.constant 3.200000e+01 : f32
    %126 = vector.broadcast %cst_66 : f32 to vector<8x1xf32>
    %127 = arith.divf %125, %126 : vector<8x1xf32>
    %128 = vector.broadcast %127 : vector<8x1xf32> to vector<8x32xf32>
    %129 = arith.subf %121, %128 : vector<8x32xf32>
    %130 = arith.mulf %129, %129 : vector<8x32xf32>
    %cst_67 = arith.constant dense<0.000000e+00> : vector<8xf32>
    %131 = vector.multi_reduction <add>, %130, %cst_67 [1] : vector<8x32xf32> to vector<8xf32>
    %132 = vector.shape_cast %131 : vector<8xf32> to vector<8x1xf32>
    %cst_68 = arith.constant 3.200000e+01 : f32
    %133 = vector.broadcast %cst_68 : f32 to vector<8x1xf32>
    %134 = arith.divf %132, %133 : vector<8x1xf32>
    %cst_69 = arith.constant 9.99999974E-6 : f32
    %135 = vector.broadcast %cst_69 : f32 to vector<8x1xf32>
    %136 = arith.addf %134, %135 : vector<8x1xf32>
    %137 = math.rsqrt %136 : vector<8x1xf32>
    %138 = vector.broadcast %137 : vector<8x1xf32> to vector<8x32xf32>
    %139 = arith.mulf %129, %138 : vector<8x32xf32>
    %140 = vector.broadcast %122 : vector<1x32xf32> to vector<8x32xf32>
    %141 = arith.mulf %139, %140 : vector<8x32xf32>
    %142 = vector.broadcast %123 : vector<1x32xf32> to vector<8x32xf32>
    %143 = arith.addf %141, %142 : vector<8x32xf32>
    %c0_70 = arith.constant 0 : index
    %c0_71 = arith.constant 0 : index
    %144 = vector.load %arg15[%c0_70, %c0_71] : memref<32x64xbf16, #tpu.memory_space<vmem>>, vector<32x64xbf16>
    %c0_72 = arith.constant 0 : index
    %c0_73 = arith.constant 0 : index
    %145 = vector.load %arg16[%c0_72, %c0_73] : memref<1x64xf32, #tpu.memory_space<vmem>>, vector<1x64xf32>
    %c0_74 = arith.constant 0 : index
    %c0_75 = arith.constant 0 : index
    %146 = vector.load %arg17[%c0_74, %c0_75] : memref<64x32xbf16, #tpu.memory_space<vmem>>, vector<64x32xbf16>
    %c0_76 = arith.constant 0 : index
    %c0_77 = arith.constant 0 : index
    %147 = vector.load %arg18[%c0_76, %c0_77] : memref<1x32xf32, #tpu.memory_space<vmem>>, vector<1x32xf32>
    %148 = arith.truncf %143 : vector<8x32xf32> to vector<8x32xbf16>
    %cst_78 = arith.constant dense<0.000000e+00> : vector<8x64xf32>
    %149 = tpu.matmul %148, %144, %cst_78 {dimension_numbers = #tpu.dot_dimension_numbers<[1], [0], [0], [1], [0, 0, 1, 1], [], []>} : vector<8x32xbf16>, vector<32x64xbf16>, vector<8x64xf32> -> vector<8x64xf32>
    %150 = vector.broadcast %145 : vector<1x64xf32> to vector<8x64xf32>
    %151 = arith.addf %149, %150 : vector<8x64xf32>
    %cst_79 = arith.constant 0.000000e+00 : f32
    %152 = vector.broadcast %cst_79 : f32 to vector<8x64xf32>
    %153 = arith.maximumf %151, %152 : vector<8x64xf32>
    %154 = arith.truncf %153 : vector<8x64xf32> to vector<8x64xbf16>
    %cst_80 = arith.constant dense<0.000000e+00> : vector<8x32xf32>
    %155 = tpu.matmul %154, %146, %cst_80 {dimension_numbers = #tpu.dot_dimension_numbers<[1], [0], [0], [1], [0, 0, 1, 1], [], []>} : vector<8x64xbf16>, vector<64x32xbf16>, vector<8x32xf32> -> vector<8x32xf32>
    %156 = vector.broadcast %147 : vector<1x32xf32> to vector<8x32xf32>
    %157 = arith.addf %155, %156 : vector<8x32xf32>
    %158 = arith.addf %157, %143 : vector<8x32xf32>
    %c0_81 = arith.constant 0 : index
    %c0_82 = arith.constant 0 : index
    %159 = vector.load %arg19[%c0_81, %c0_82] : memref<1x32xf32, #tpu.memory_space<vmem>>, vector<1x32xf32>
    %c0_83 = arith.constant 0 : index
    %c0_84 = arith.constant 0 : index
    %160 = vector.load %arg20[%c0_83, %c0_84] : memref<1x32xf32, #tpu.memory_space<vmem>>, vector<1x32xf32>
    %cst_85 = arith.constant dense<0.000000e+00> : vector<8xf32>
    %161 = vector.multi_reduction <add>, %158, %cst_85 [1] : vector<8x32xf32> to vector<8xf32>
    %162 = vector.shape_cast %161 : vector<8xf32> to vector<8x1xf32>
    %cst_86 = arith.constant 3.200000e+01 : f32
    %163 = vector.broadcast %cst_86 : f32 to vector<8x1xf32>
    %164 = arith.divf %162, %163 : vector<8x1xf32>
    %165 = vector.broadcast %164 : vector<8x1xf32> to vector<8x32xf32>
    %166 = arith.subf %158, %165 : vector<8x32xf32>
    %167 = arith.mulf %166, %166 : vector<8x32xf32>
    %cst_87 = arith.constant dense<0.000000e+00> : vector<8xf32>
    %168 = vector.multi_reduction <add>, %167, %cst_87 [1] : vector<8x32xf32> to vector<8xf32>
    %169 = vector.shape_cast %168 : vector<8xf32> to vector<8x1xf32>
    %cst_88 = arith.constant 3.200000e+01 : f32
    %170 = vector.broadcast %cst_88 : f32 to vector<8x1xf32>
    %171 = arith.divf %169, %170 : vector<8x1xf32>
    %cst_89 = arith.constant 9.99999974E-6 : f32
    %172 = vector.broadcast %cst_89 : f32 to vector<8x1xf32>
    %173 = arith.addf %171, %172 : vector<8x1xf32>
    %174 = math.rsqrt %173 : vector<8x1xf32>
    %175 = vector.broadcast %174 : vector<8x1xf32> to vector<8x32xf32>
    %176 = arith.mulf %166, %175 : vector<8x32xf32>
    %177 = vector.broadcast %159 : vector<1x32xf32> to vector<8x32xf32>
    %178 = arith.mulf %176, %177 : vector<8x32xf32>
    %179 = vector.broadcast %160 : vector<1x32xf32> to vector<8x32xf32>
    %180 = arith.addf %178, %179 : vector<8x32xf32>
    %181 = arith.truncf %180 : vector<8x32xf32> to vector<8x32xbf16>
    %c0_90 = arith.constant 0 : index
    %c0_91 = arith.constant 0 : index
    %c0_92 = arith.constant 0 : index
    %182 = vector.load %arg21[%c0_90, %c0_91, %c0_92] : memref<1x8x32xbf16, #tpu.memory_space<vmem>>, vector<1x8x32xbf16>
    %183 = vector.shape_cast %182 : vector<1x8x32xbf16> to vector<8x32xbf16>
    %184 = vector.shape_cast %181 : vector<8x32xbf16> to vector<1x8x32xbf16>
    tpu.vector_store %arg21[%c0_90, %c0_91, %c0_92], %184 {strides = array<i32>} : memref<1x8x32xbf16, #tpu.memory_space<vmem>>, vector<1x8x32xbf16>,
    return
  }
  func.func @transform_0(%arg0: i32, %arg1: i32) -> (i32, i32, i32) {
    %c0_i32 = arith.constant 0 : i32
    %c0_i32_0 = arith.constant 0 : i32
    return %arg0, %arg1, %c0_i32 : i32, i32, i32
  }
  func.func @transform_1(%arg0: i32, %arg1: i32) -> (i32, i32, i32) {
    %c0_i32 = arith.constant 0 : i32
    %c0_i32_0 = arith.constant 0 : i32
    %c0_i32_1 = arith.constant 0 : i32
    return %arg0, %c0_i32, %c0_i32_0 : i32, i32, i32
  }
  func.func @transform_2(%arg0: i32, %arg1: i32) -> (i32, i32, i32) {
    %c0_i32 = arith.constant 0 : i32
    %c0_i32_0 = arith.constant 0 : i32
    %c0_i32_1 = arith.constant 0 : i32
    return %arg0, %c0_i32, %c0_i32_0 : i32, i32, i32
  }
  func.func @transform_3(%arg0: i32, %arg1: i32) -> (i32, i32) {
    %c0_i32 = arith.constant 0 : i32
    %c0_i32_0 = arith.constant 0 : i32
    %c0_i32_1 = arith.constant 0 : i32
    return %c0_i32, %c0_i32_0 : i32, i32
  }
  func.func @transform_4(%arg0: i32, %arg1: i32) -> (i32, i32) {
    %c0_i32 = arith.constant 0 : i32
    %c0_i32_0 = arith.constant 0 : i32
    %c0_i32_1 = arith.constant 0 : i32
    return %c0_i32, %c0_i32_0 : i32, i32
  }
  func.func @transform_5(%arg0: i32, %arg1: i32) -> (i32, i32) {
    %c0_i32 = arith.constant 0 : i32
    %c0_i32_0 = arith.constant 0 : i32
    %c0_i32_1 = arith.constant 0 : i32
    return %c0_i32, %c0_i32_0 : i32, i32
  }
  func.func @transform_6(%arg0: i32, %arg1: i32) -> (i32, i32) {
    %c0_i32 = arith.constant 0 : i32
    %c0_i32_0 = arith.constant 0 : i32
    %c0_i32_1 = arith.constant 0 : i32
    return %c0_i32, %c0_i32_0 : i32, i32
  }
  func.func @transform_7(%arg0: i32, %arg1: i32) -> (i32, i32) {
    %c0_i32 = arith.constant 0 : i32
    %c0_i32_0 = arith.constant 0 : i32
    %c0_i32_1 = arith.constant 0 : i32
    return %c0_i32, %c0_i32_0 : i32, i32
  }
  func.func @transform_8(%arg0: i32, %arg1: i32) -> (i32, i32) {
    %c0_i32 = arith.constant 0 : i32
    %c0_i32_0 = arith.constant 0 : i32
    %c0_i32_1 = arith.constant 0 : i32
    return %c0_i32, %c0_i32_0 : i32, i32
  }
  func.func @transform_9(%arg0: i32, %arg1: i32) -> (i32, i32) {
    %c0_i32 = arith.constant 0 : i32
    %c0_i32_0 = arith.constant 0 : i32
    %c0_i32_1 = arith.constant 0 : i32
    return %c0_i32, %c0_i32_0 : i32, i32
  }
  func.func @transform_10(%arg0: i32, %arg1: i32) -> (i32, i32) {
    %c0_i32 = arith.constant 0 : i32
    %c0_i32_0 = arith.constant 0 : i32
    %c0_i32_1 = arith.constant 0 : i32
    return %c0_i32, %c0_i32_0 : i32, i32
  }
  func.func @transform_11(%arg0: i32, %arg1: i32) -> (i32, i32) {
    %c0_i32 = arith.constant 0 : i32
    %c0_i32_0 = arith.constant 0 : i32
    %c0_i32_1 = arith.constant 0 : i32
    return %c0_i32, %c0_i32_0 : i32, i32
  }
  func.func @transform_12(%arg0: i32, %arg1: i32) -> (i32, i32) {
    %c0_i32 = arith.constant 0 : i32
    %c0_i32_0 = arith.constant 0 : i32
    %c0_i32_1 = arith.constant 0 : i32
    return %c0_i32, %c0_i32_0 : i32, i32
  }
  func.func @transform_13(%arg0: i32, %arg1: i32) -> (i32, i32) {
    %c0_i32 = arith.constant 0 : i32
    %c0_i32_0 = arith.constant 0 : i32
    %c0_i32_1 = arith.constant 0 : i32
    return %c0_i32, %c0_i32_0 : i32, i32
  }
  func.func @transform_14(%arg0: i32, %arg1: i32) -> (i32, i32) {
    %c0_i32 = arith.constant 0 : i32
    %c0_i32_0 = arith.constant 0 : i32
    %c0_i32_1 = arith.constant 0 : i32
    return %c0_i32, %c0_i32_0 : i32, i32
  }
  func.func @transform_15(%arg0: i32, %arg1: i32) -> (i32, i32) {
    %c0_i32 = arith.constant 0 : i32
    %c0_i32_0 = arith.constant 0 : i32
    %c0_i32_1 = arith.constant 0 : i32
    return %c0_i32, %c0_i32_0 : i32, i32
  }
  func.func @transform_16(%arg0: i32, %arg1: i32) -> (i32, i32) {
    %c0_i32 = arith.constant 0 : i32
    %c0_i32_0 = arith.constant 0 : i32
    %c0_i32_1 = arith.constant 0 : i32
    return %c0_i32, %c0_i32_0 : i32, i32
  }
  func.func @transform_17(%arg0: i32, %arg1: i32) -> (i32, i32) {
    %c0_i32 = arith.constant 0 : i32
    %c0_i32_0 = arith.constant 0 : i32
    %c0_i32_1 = arith.constant 0 : i32
    return %c0_i32, %c0_i32_0 : i32, i32
  }
  func.func @transform_18(%arg0: i32, %arg1: i32) -> (i32, i32) {
    %c0_i32 = arith.constant 0 : i32
    %c0_i32_0 = arith.constant 0 : i32
    %c0_i32_1 = arith.constant 0 : i32
    return %c0_i32, %c0_i32_0 : i32, i32
  }
  func.func @transform_19(%arg0: i32, %arg1: i32) -> (i32, i32, i32) {
    %c0_i32 = arith.constant 0 : i32
    %c0_i32_0 = arith.constant 0 : i32
    return %arg0, %arg1, %c0_i32 : i32, i32, i32
  }
}

</mosaic_0001>

<bundles_post_ra>
// kernel: transformer_forward.9
= control target key start
LH: loop header
LB: loop body
LE: loop exit
PB: predicated region body
PF: predicated region fallthrough
CT: control target
= control target key end

     0   :  { %8 = vsyncpa [#allocation5], 0  ;;  %s1257_s0 = inlined_call_operand.hbm [shape: bf16[16,32], index: 0, kind: input, shape index: {}]   ;;  %s1258_s1 = inlined_call_operand.hbm [shape: bf16[256,32], index: 1, kind: input, shape index: {}]   ;;  %s1259_s2 = inlined_call_operand.hbm [shape: f32[1,256], index: 2, kind: input, shape index: {}]   ;;  %s1260_s3 = inlined_call_operand.hbm [shape: bf16[16,256], index: 3, kind: output, shape index: {}]  }
   0x1   :  { %9 = vsyncpa [#allocation8], 0 }
   0x2   :  { %10 = vsyncpa [#allocation6], 0 }
   0x3   :  { %12 = vsyncpa [#allocation6 + $0x1], 0  ;;  %s1060_s12 = smov 0   ;;  %s1062_s13 = smov 0  }
   0x4   :  { %s1064_s14 = smov 0  }
   0x5 LB: > { %s703_s15 = sadd.s32 4294967295, %s1025_s14   ;;  %s704_s16 = sadd.s32 4294967294, %s1025_s14   ;;  %s1025_s14 = sphi %s1064_s14, %s18_s14   ;;  %s1021_s13 = sphi %s1062_s13, %s1274_s13   ;;  %s1017_s12 = sphi %s1060_s12, %s1273_s12  }
   0x6   : > { %p705_p0 = scmp.ge.s32.totalorder %s1025_s14, 1  ;;  %p150_p1 = scmp.lt.s32.totalorder %s1025_s14, 3 }
   0x7   : > { %p1081_p2 = scmp.eq.s32.totalorder %s703_s15, 0  ;;  %s1027_s19 = smov [#allocation7]  }
   0x8   : > { %p1085_p3 = pnand %p705_p0, %p150_p1  ;;  %s181_s20 = sshll.u32 %s1027_s19, 4  ;;  %s182_s20 = int_to_ptr.vmem [resolvable:$true] %s181_s20 }
   0x9   : > { %s1264_s17 = scalar_select %p1081_p2, 1, 0 }
   0xa   : > { %s1265_s18 = scalar_select %p1085_p3, 1, 0 }
   0xb   : > { %p785_p4 = pneg %p1085_p3  ;;  %s33_s22 = sadd.s32 1, %s1021_s13 }
   0xc   : > { %p1098_p6 = scmp.ge.s32.totalorder %s33_s22, 2  ;;  %s881_s26 = scalar_lea.hbm %s1258_s1, 2048 }
   0xd   : > { %p1093_p5 = pnand %p1081_p2, %p785_p4  ;;  %p882_p7 = scmp.ne.s32.totalorder %s1258_s1, %s881_s26 }
   0xe   : > { %s1267_s23 = scalar_select %p1098_p6, 1, 0 }
   0xf   : > { %p1110_p8 = pneg %p1093_p5  ;;  %p888_p11 = scmp.lt.u32.totalorder %s881_s26, %s1258_s1 }
  0x11   : > { %p884_p9 = pnand %p1110_p8, %p882_p7 }
  0x13   : > { %p885_p10 = pneg %p884_p9 }
  0x15   : > { %p890_p12 = pnand %p888_p11, %p885_p10 }
  0x17   : > { %893 = shalt.err (!%p890_p12)
}
  0x18   : > { %s894_s5 = scalar_lea.vmem %s182_s20, 2048  ;;  %p902_p4 = scmp.lt.s32.totalorder %s182_s20, %s182_s20 }
  0x19   : > { %p895_p13 = scmp.ne.s32.totalorder %s182_s20, %s894_s5  ;;  %p903_p2 = scmp.lt.s32.totalorder %s894_s5, %s894_s5 }
  0x1b   : > { %p897_p0 = pnand %p895_p13, %p1110_p8  ;;  %p904_p3 = por %p903_p2, %p902_p4 }
  0x1d   : > { %p898_p1 = pneg %p897_p0 }
  0x1f   : > { %p905_p6 = pnand %p904_p3, %p898_p1 }
  0x21   : > { %908 = shalt.err (!%p905_p6)
}
  0x22   : > { %s1028_s6 = smov 64   ;;  %s1029_s7 = smov 4  }
  0x23   : > { %791 = dma.hbm_to_vmem [thread:$0]  (!%p1093_p5), %s1258_s1, 2048, %s182_s20, [#allocation8], %s1028_s6, %s1028_s6, %s1029_s7  }
  0x24   : > { %p1269_p7 = scmp.ne.s32.totalorder %s1267_s23, 0  ;;  %s1030_s10 = smov [#allocation4]  }
  0x25   : > { %s165_s11 = sshll.u32 %s1030_s10, 4  ;;  %s1031_s19 = smov [#allocation9]   ;;  %s166_s11 = int_to_ptr.vmem [resolvable:$true] %s165_s11 }
  0x26   : > { %s1276_s22 = smov (%p1269_p7, %s33_s22), 0  ;;  %s198_s24 = sshll.u32 %s1031_s19, 4  ;;  %s199_s24 = int_to_ptr.vmem [resolvable:$true] %s198_s24 }
  0x27   : > { %s909_s27 = scalar_lea.hbm %s1257_s0, 128 }
  0x28   : > { %p910_p2 = scmp.ne.s32.totalorder %s1257_s0, %s909_s27  ;;  %p916_p9 = scmp.lt.u32.totalorder %s909_s27, %s1257_s0 }
  0x2a   : > { %p912_p3 = pnand %p910_p2, %p1110_p8 }
  0x2c   : > { %p913_p6 = pneg %p912_p3 }
  0x2e   : > { %p918_p10 = pnand %p916_p9, %p913_p6 }
  0x30   : > { %921 = shalt.err (!%p918_p10)
}
  0x31   : > { %s922_s4 = scalar_lea.vmem %s166_s11, 128  ;;  %p930_p0 = scmp.lt.s32.totalorder %s166_s11, %s166_s11 }
  0x32   : > { %p923_p11 = scmp.ne.s32.totalorder %s166_s11, %s922_s4  ;;  %p931_p1 = scmp.lt.s32.totalorder %s922_s4, %s922_s4 }
  0x34   : > { %p925_p12 = pnand %p923_p11, %p1110_p8  ;;  %p932_p4 = por %p931_p1, %p930_p0 }
  0x36   : > { %p926_p13 = pneg %p925_p12 }
  0x38   : > { %p933_p7 = pnand %p932_p4, %p926_p13 }
  0x3a   : > { %936 = shalt.err (!%p933_p7)
}
  0x3b   : > { %788 = dma.hbm_to_vmem [thread:$0]  (!%p1093_p5), %s1257_s0, 128, %s166_s11, [#allocation5], %s1028_s6, %s1028_s6, %s1029_s7  }
  0x3c   : > { %s937_s19 = scalar_lea.hbm %s1259_s2, 32 }
  0x3d   : > { %p938_p2 = scmp.ne.s32.totalorder %s1259_s2, %s937_s19  ;;  %p944_p9 = scmp.lt.u32.totalorder %s937_s19, %s1259_s2 }
  0x3f   : > { %p940_p3 = pnand %p938_p2, %p1110_p8 }
  0x41   : > { %p941_p6 = pneg %p940_p3 }
  0x43   : > { %p946_p10 = pnand %p944_p9, %p941_p6 }
  0x45   : > { %949 = shalt.err (!%p946_p10)
}
  0x46   : > { %s950_s30 = scalar_lea.vmem %s199_s24, 32  ;;  %p958_p0 = scmp.lt.s32.totalorder %s199_s24, %s199_s24 }
  0x47   : > { %p951_p11 = scmp.ne.s32.totalorder %s199_s24, %s950_s30  ;;  %p959_p1 = scmp.lt.s32.totalorder %s950_s30, %s950_s30 }
  0x49   : > { %p953_p12 = pnand %p951_p11, %p1110_p8  ;;  %p960_p4 = por %p959_p1, %p958_p0 }
  0x4b   : > { %p954_p13 = pneg %p953_p12 }
  0x4d   : > { %p961_p7 = pnand %p960_p4, %p954_p13 }
  0x4f   : > { %964 = shalt.err (!%p961_p7)
}
  0x50   : > { %794 = dma.hbm_to_vmem [thread:$0]  (!%p1093_p5), %s1259_s2, 32, %s199_s24, [#allocation8]  }
  0x51   : > { %p1270_p2 = scmp.ne.s32.totalorder %s1265_s18, 0 }
  0x52   : > { %p1271_p3 = scmp.ne.s32.totalorder (!%p1270_p2), %s1264_s17, 0 }
  0x53   : > { %211 = sbr.rel (%p1270_p2) target bundleno = 1003 (0x3eb), region = 32 }
  0x5a   : > { %1004 = dma.done.wait (%p1271_p3), [#allocation5], 128  }
  0x5b   : > { %1006 = vsyncadd (%p1271_p3), [#allocation5], 4294967168 }
  0x5c   : > { %1008 = dma.done.wait (%p1271_p3), [#allocation8], 2080  }
  0x5d   : > { %1010 = vsyncadd (%p1271_p3), [#allocation8], 4294965216  ;;  %p245_p8 = scmp.eq.s32.totalorder %s1017_s12, 0 }
  0x5e   : > { %vm251_vm0 = vcmask (%p245_p8), 7168   ;;  %v1032_v0 = vmov (%p245_p8), -inf   ;;  %v1033_v1 = vmov (%p245_p8), 0.0   ;;  %v1034_v2 = vmov (%p245_p8), 0  }
  0x5f   : > { %250 = sbr.rel (!%p245_p8) target bundleno = 102 (0x66), region = 48  ;;  %252 = vst.msk [vmem:[#allocation2] sm:$0xff] (%p245_p8), %vm251_vm0, %v1032_v0  ;;  %253 = vst.msk [vmem:[#allocation2 + $0x8] sm:$0xff] (%p245_p8), %vm251_vm0, %v1032_v0 }
  0x60   : > { %254 = vst.msk [vmem:[#allocation3] sm:$0xff] (%p245_p8), %vm251_vm0, %v1033_v1  ;;  %255 = vst.msk [vmem:[#allocation3 + $0x8] sm:$0xff] (%p245_p8), %vm251_vm0, %v1033_v1 }
  0x61   : > { %256 = vst [vmem:[#allocation10] sm:$0xff] (%p245_p8), %v1034_v2  ;;  %257 = vst [vmem:[#allocation10 + $0x8] sm:$0xff] (%p245_p8), %v1034_v2 }
  0x66 PF: > { %v845_v3 = vld [vmem:[#allocation7 + $0x40] sm:$0xff]   ;;  %vm389_vm1 = vcmask 261120   ;;  %v847_v5 = vld [vmem:[#allocation7 + $0x48] sm:$0xff]   ;;  %v849_v9 = vld [vmem:[#allocation7 + $0x50] sm:$0xff]   ;;  %v294_v28 = vlaneseq  ;;  %p732_p5 = scmp.ne.s32.totalorder %s1017_s12, 0 }
  0x67   : > { %v846_v4 = vld [vmem:[#allocation7] sm:$0xff]   ;;  %761 = vmatprep.subr.msk.bf16.mxu0 %vm389_vm1, %v845_v3  ;;  %v848_v7 = vld [vmem:[#allocation7 + $0x8] sm:$0xff]   ;;  %v850_v10 = vld [vmem:[#allocation7 + $0x10] sm:$0xff]   ;;  %v1035_v45 = vmov (!%p732_p5), 0   ;;  %vm537_vm2 = vcmask (!%p732_p5), 7168  }
  0x68   : > { %v394_v6 = vsel %vm389_vm1, %v846_v4, 0  ;;  %v397_v8 = vsel %vm389_vm1, %v848_v7, 0  ;;  %v861_v11 = vld [vmem:[#allocation4] sm:$0xff]   ;;  %v400_v12 = vsel %vm389_vm1, %v850_v10, 0  ;;  %v853_v16 = vld [vmem:[#allocation7 + $0x60] sm:$0xff]   ;;  %v855_v19 = vld [vmem:[#allocation7 + $0x68] sm:$0xff]   ;;  %862 = vset.pattern.permute.xlu1 (!%p732_p5), %v1035_v45  ;;  %863 = vset.pattern.permute.xlu0 (!%p732_p5), %v1035_v45 }
  0x69   : > { %744 = vmatpush3.bf16.xpose.msra.mxu0 %v394_v6  ;;  %v851_v13 = vld [vmem:[#allocation7 + $0x58] sm:$0xff]   ;;  %759 = vmatprep.mubr.msk.bf16.mxu0 %vm389_vm1, %v861_v11  ;;  %v854_v17 = vld [vmem:[#allocation7 + $0x20] sm:$0xff]   ;;  %v856_v20 = vld [vmem:[#allocation7 + $0x28] sm:$0xff]   ;;  %v295_v29 = vshrl.u32 %v294_v28, 7 }
  0x6a   : > { %762 = vmatprep.subr.msk.bf16.mxu0 %vm389_vm1, %v847_v5  ;;  %v852_v14 = vld [vmem:[#allocation7 + $0x18] sm:$0xff]   ;;  %v406_v18 = vsel %vm389_vm1, %v854_v17, 0  ;;  %v409_v21 = vsel %vm389_vm1, %v856_v20, 0  ;;  %v857_v22 = vld [vmem:[#allocation7 + $0x70] sm:$0xff]   ;;  %v292_v31 = vld [vmem:[#allocation9] sm:$0x3] }
  0x6b   : > { %v403_v15 = vsel %vm389_vm1, %v852_v14, 0  ;;  %v858_v23 = vld [vmem:[#allocation7 + $0x30] sm:$0xff]   ;;  %v859_v25 = vld [vmem:[#allocation7 + $0x78] sm:$0xff]   ;;  %v296_v30 = vsub.s32 0, %v295_v29  ;;  %v300_v32 = vsub.s32 1, %v295_v29  ;;  %v488_v49 = vld [vmem:[#allocation2 + $0x8] sm:$0xff] (!%p732_p5) }
  0x6c   : > { %v412_v24 = vsel %vm389_vm1, %v858_v23, 0  ;;  %v860_v26 = vld [vmem:[#allocation7 + $0x38] sm:$0xff]  }
  0x6d   : > { %v415_v27 = vsel %vm389_vm1, %v860_v26, 0  ;;  %v297_v33 = vrot.slane %v292_v31, %v296_v30  ;;  %v301_v34 = vrot.slane %v292_v31, %v300_v32  ;;  %v487_v46 = vld [vmem:[#allocation2] sm:$0xff] (!%p732_p5) }
  0x71   : > { %746 = vmatpush3.bf16.xpose.msra.mxu0 %v397_v8 }
  0x72   : > { %763 = vmatprep.subr.msk.bf16.mxu0 %vm389_vm1, %v849_v9  ;;  %v497_v9 = vld [vmem:[#allocation3] sm:$0xff] (!%p732_p5) }
  0x79   : > { %748 = vmatpush3.bf16.xpose.msra.mxu0 %v400_v12 }
  0x7a   : > { %764 = vmatprep.subr.msk.bf16.mxu0 %vm389_vm1, %v851_v13  ;;  %v498_v13 = vld [vmem:[#allocation3 + $0x8] sm:$0xff] (!%p732_p5) }
  0x81   : > { %750 = vmatpush3.bf16.xpose.msra.mxu0 %v403_v15 }
  0x82   : > { %765 = vmatprep.subr.msk.bf16.mxu0 %vm389_vm1, %v853_v16 }
  0x89   : > { %752 = vmatpush3.bf16.xpose.msra.mxu0 %v406_v18 }
  0x8a   : > { %766 = vmatprep.subr.msk.bf16.mxu0 %vm389_vm1, %v855_v19 }
  0x91   : > { %754 = vmatpush3.bf16.xpose.msra.mxu0 %v409_v21 }
  0x92   : > { %767 = vmatprep.subr.msk.bf16.mxu0 %vm389_vm1, %v857_v22 }
  0x99   : > { %756 = vmatpush3.bf16.xpose.msra.mxu0 %v412_v24 }
  0x9a   : > { %768 = vmatprep.subr.msk.bf16.mxu0 %vm389_vm1, %v859_v25 }
  0xa1   : > { %758 = vmatpush3.bf16.xpose.msra.mxu0 %v415_v27 }
  0xa8   : > { %760 = vmatmul.mubr.msk.bf16.vlgmr.msra.gmra.mrb[0].mxu0 %vm389_vm1, %v861_v11 }
 0x179   : > { %486 = sbr.rel (%p732_p5) target bundleno = 824 (0x338), region = 52 }
 0x17b   : > { %v475_v35 = vpop.f32.mrb[0].mxu0 }
 0x17c   : > { %v1195_v36 = vadd.f32 %v475_v35, %v297_v33  ;;  %v477_v37 = vpop.f32.mrb[1].mxu0 }
 0x17d   : > { %v1197_v38 = vadd.f32 %v477_v37, %v301_v34  ;;  %v479_v39 = vpop.f32.mrb[2].mxu0 }
 0x17e   : > { %v1199_v40 = vadd.f32 %v479_v39, %v297_v33  ;;  %v481_v41 = vpop.f32.mrb[3].mxu0 }
 0x17f   : > { %v1201_v42 = vadd.f32 %v481_v41, %v301_v34  ;;  %v489_v43 = vmax.f32 (!%p732_p5), %v1195_v36, %v1197_v38 }
 0x181   : > { %490 = vmax.xlane.f32.xlu0 %v489_v43  ;;  %v492_v44 = vmax.f32 %v1199_v40, %v1201_v42 }
 0x185   : > { %493 = vmax.xlane.f32.xlu0 %v492_v44 }
 0x20e   : > { %v491_v47 = vpop.xlane.xlu0 %490 }
 0x20f   : > { %v495_v48 = vmax.f32 %v487_v46, %v491_v47 }
 0x211   : > { %v499_v50 = vsub.f32 %v487_v46, %v495_v48  ;;  %540 = vst.msk [vmem:[#allocation2] sm:$0xff] %vm537_vm2, %v495_v48  ;;  %509 = vperm.xlu1 %862, %v495_v48  }
 0x212   : > { %v494_v51 = vpop.xlane.xlu0 %493 }
 0x213   : > { %v496_v52 = vmax.f32 %v488_v49, %v494_v51  ;;  %v501_v6 = vmul.f32 1.442695, %v499_v50 }
 0x215   : > { %v500_v53 = vsub.f32 %v488_v49, %v496_v52  ;;  %541 = vst.msk [vmem:[#allocation2 + $0x8] sm:$0xff] %vm537_vm2, %v496_v52  ;;  %514 = vperm.xlu1 %862, %v496_v52  }
 0x217   : > { %v503_v7 = vmul.f32 1.442695, %v500_v53 }
 0x290   : > { %v510_v54 = vpop.permute.xlu1 %509 }
 0x291   : > { %v517_v55 = vsub.f32 %v1195_v36, %v510_v54  ;;  %v518_v56 = vsub.f32 %v1197_v38, %v510_v54 }
 0x293   : > { %v521_v57 = vmul.f32 1.442695, %v517_v55  ;;  %v523_v58 = vmul.f32 1.442695, %v518_v56 }
 0x294   : > { %v515_v59 = vpop.permute.xlu1 %514 }
 0x295   : > { %864 = vpow2.f32 %v521_v57  ;;  %v519_v60 = vsub.f32 %v1199_v40, %v515_v59  ;;  %v520_v61 = vsub.f32 %v1201_v42, %v515_v59 }
 0x296   : > { %866 = vpow2.f32 %v523_v58 }
 0x297   : > { %v525_v62 = vmul.f32 1.442695, %v519_v60  ;;  %v527_v63 = vmul.f32 1.442695, %v520_v61 }
 0x299   : > { %868 = vpow2.f32 %v525_v62 }
 0x29a   : > { %870 = vpow2.f32 %v527_v63 }
 0x29b   : > { %872 = vpow2.f32 %v501_v6 }
 0x29c   : > { %874 = vpow2.f32 %v503_v7 }
 0x29f   : > { %v865_v0 = vpop.eup %864 }
 0x2a0   : > { %v867_v1 = vpop.eup %866 }
 0x2a1   : > { %v529_v2 = vadd.f32 %v867_v1, %v865_v0 }
 0x2a3   : > { %v869_v3 = vpop.eup %868  ;;  %530 = vadd.xlane.f32.xlu0 %v529_v2 }
 0x2a4   : > { %v871_v4 = vpop.eup %870 }
 0x2a5   : > { %v532_v5 = vadd.f32 %v871_v4, %v869_v3  ;;  %v873_v8 = vpop.eup %872 }
 0x2a6   : > { %v505_v10 = vmul.f32 %v873_v8, %v497_v9  ;;  %v875_v11 = vpop.eup %874 }
 0x2a7   : > { %533 = vadd.xlane.f32.xlu1 %v532_v5  ;;  %v506_v15 = vmul.f32 %v875_v11, %v498_v13 }
 0x330   : > { %v531_v12 = vpop.xlane.xlu0 %530 }
 0x331   : > { %v535_v14 = vadd.f32 %v531_v12, %v505_v10 }
 0x333   : > { %538 = vst.msk [vmem:[#allocation3] sm:$0xff] %vm537_vm2, %v535_v14 }
 0x334   : > { %v534_v16 = vpop.xlane.xlu1 %533 }
 0x335   : > { %v536_v17 = vadd.f32 %v534_v16, %v506_v15 }
 0x337   : > { %539 = vst.msk [vmem:[#allocation3 + $0x8] sm:$0xff] %vm537_vm2, %v536_v17 }
 0x338 PF: > { %p733_p6 = scmp.ne.s32.totalorder %s1017_s12, 1 }
 0x339   : > { %v1036_v19 = vmov (!%p733_p6), 0   ;;  %v546_v22 = vld [vmem:[#allocation2] sm:$0xff] (!%p733_p6)  ;;  %v547_v25 = vld [vmem:[#allocation2 + $0x8] sm:$0xff] (!%p733_p6) }
 0x33a   : > { %545 = sbr.rel (%p733_p6) target bundleno = 979 (0x3d3), region = 56  ;;  %v548_v18 = vld [vmem:[#allocation3] sm:$0xff] (!%p733_p6)  ;;  %876 = vset.pattern.permute.xlu0 (!%p733_p6), %v1036_v19 }
 0x33b   : > { %877 = vlog2.f32 (!%p733_p6), %v548_v18 }
 0x33e   : > { %v549_v20 = vld [vmem:[#allocation3 + $0x8] sm:$0xff] (!%p733_p6) }
 0x33f   : > { %879 = vlog2.f32 (!%p733_p6), %v549_v20 }
 0x345   : > { %v878_v21 = vpop.eup %877 }
 0x346   : > { %v551_v24 = vmul.f32 0.6931472, %v878_v21 }
 0x348   : > { %v554_v27 = vadd.f32 %v551_v24, %v546_v22 }
 0x349   : > { %v880_v23 = vpop.eup %879 }
 0x34a   : > { %v553_v26 = vmul.f32 0.6931472, %v880_v23  ;;  %558 = vperm.xlu0 %876, %v554_v27  }
 0x34c   : > { %v555_v28 = vadd.f32 %v553_v26, %v547_v25 }
 0x34e   : > { %563 = vperm.xlu0 %876, %v555_v28  }
 0x3c9   : > { %v559_v29 = vpop.permute.xlu0 %558 }
 0x3ca   : > { %v566_v30 = vsub.f32 %v1195_v36, %v559_v29  ;;  %v567_v31 = vsub.f32 %v1197_v38, %v559_v29 }
 0x3cc   : > { %v741_v32 = vpack.c.bf16 %v567_v31, %v566_v30 }
 0x3cd   : > { %v564_v33 = vpop.permute.xlu0 %563 }
 0x3ce   : > { %582 = vst [vmem:[#allocation10] sm:$0xff] %v741_v32  ;;  %v568_v34 = vsub.f32 %v1199_v40, %v564_v33  ;;  %v569_v35 = vsub.f32 %v1201_v42, %v564_v33 }
 0x3d0   : > { %v742_v37 = vpack.c.bf16 %v569_v35, %v568_v34 }
 0x3d2   : > { %583 = vst [vmem:[#allocation10 + $0x8] sm:$0xff] %v742_v37 }
 0x3d3 PF: > { %p1223_p9 = scmp.eq.s32.totalorder %s703_s15, 1  ;;  %s1037_s17 = smov [#allocation10]  }
 0x3d4   : > { %s602_s18 = sshll.u32 %s1037_s17, 4  ;;  %s603_s18 = int_to_ptr.vmem [resolvable:$true] %s602_s18 }
 0x3d5   : > { %s965_s21 = scalar_lea.vmem %s603_s18, 256  ;;  %s971_s29 = scalar_lea.vmem %s603_s18, 512 }
 0x3d6   : > { %p966_p10 = scmp.ne.s32.totalorder %s603_s18, %s965_s21  ;;  %p972_p13 = scmp.lt.s32.totalorder %s603_s18, %s603_s18 }
 0x3d7   : > { %p973_p0 = scmp.lt.s32.totalorder %s971_s29, %s965_s21 }
 0x3d8   : > { %p967_p11 = pnand %p966_p10, %p1223_p9 }
 0x3d9   : > { %p974_p1 = por %p973_p0, %p972_p13 }
 0x3da   : > { %p968_p12 = pneg %p967_p11 }
 0x3dc   : > { %p975_p4 = pnand %p974_p1, %p968_p12 }
 0x3de   : > { %978 = shalt.err (!%p975_p4)
}
 0x3df   : > { %s979_s24 = scalar_lea.hbm %s1260_s3, 256 }
 0x3e0   : > { %p980_p7 = scmp.ne.s32.totalorder %s1260_s3, %s979_s24  ;;  %p985_p8 = scmp.lt.u32.totalorder %s979_s24, %s1260_s3 }
 0x3e2   : > { %p981_p2 = pnand %p980_p7, %p1223_p9 }
 0x3e4   : > { %p982_p3 = pneg %p981_p2 }
 0x3e6   : > { %p987_p5 = pnand %p985_p8, %p982_p3 }
 0x3e8   : > { %990 = shalt.err (!%p987_p5)
}
 0x3e9   : > { %s1038_s8 = smov 128   ;;  %s1039_s9 = smov 8  }
 0x3ea   : > { %782 = dma.vmem_to_hbm [thread:$0]  (%p1223_p9), %s603_s18, 256, %s1260_s3, [#allocation6], %s1038_s8, %s1038_s8, %s1039_s9  }
 0x3eb PF: > { %p806_p6 = scmp.ge.s32.totalorder %s1025_s14, 2  ;;  %p807_p10 = scmp.eq.s32.totalorder %s704_s16, 1 }
 0x3ed   : > { %p796_p11 = pnand %p807_p10, %p806_p6 }
 0x3ef   : > { %1012 = dma.done.wait (!%p796_p11), [#allocation6], 256  }
 0x3f0   : > { %1014 = vsyncadd (!%p796_p11), [#allocation6], 4294967040  ;;  %s18_s14 = sadd.s32 1, %s1025_s14   ;;  %s1273_s12 = smov %s1021_s13 }
 0x3f1   : > { %p15_p12 = scmp.ge.s32.totalorder %s18_s14, 4   ;;  %s1274_s13 = smov %s1276_s22 }
 0x3f3   :  { %17 = sbr.rel (!%p15_p12) target bundleno = 5 (0x5), region = 92 }
 0x3fa   :  { %623 = vsyncpa [#allocation5], 1 }
 0x3fb   :  { %625 = vsyncpa [#allocation5 + $0x1], 1 }
 0x3fc   :  { %626 = vsyncpa [#allocation8], 1 }
 0x3fd   :  { %627 = vsyncpa [#allocation6], 1 }
 0x3fe   :  { %629 = vsyncpa [#allocation6 + $0x1], 1 }

// kernel: transformer_forward.5
= control target key start
LH: loop header
LB: loop body
LE: loop exit
PB: predicated region body
PF: predicated region fallthrough
CT: control target
= control target key end

     0   :  { %s3003_s0 = inlined_call_operand.hbm [shape: bf16[2,8,32], index: 0, kind: input, shape index: {}, may-alias: {0,1}]   ;;  %s3004_s1 = inlined_call_operand.hbm [shape: bf16[2,8,32], index: 1, kind: input, shape index: {}, may-alias: {0,1}]   ;;  %s3005_s2 = inlined_call_operand.hbm [shape: bf16[32,32], index: 2, kind: input, shape index: {}]   ;;  %s3006_s3 = inlined_call_operand.hbm [shape: bf16[32,64], index: 3, kind: input, shape index: {}]   ;;  %s3007_s4 = inlined_call_operand.hbm [shape: bf16[32,32], index: 4, kind: input, shape index: {}]   ;;  %s3008_s5 = inlined_call_operand.hbm [shape: f32[1,32], index: 5, kind: input, shape index: {}]   ;;  %s3009_s6 = inlined_call_operand.hbm [shape: f32[1,32], index: 6, kind: input, shape index: {}]   ;;  %s3010_s7 = inlined_call_operand.hbm [shape: bf16[32,64], index: 7, kind: input, shape index: {}]   ;;  %s3011_s8 = inlined_call_operand.hbm [shape: f32[1,64], index: 8, kind: input, shape index: {}]   ;;  %s3012_s9 = inlined_call_operand.hbm [shape: bf16[64,32], index: 9, kind: input, shape index: {}]   ;;  %s3013_s10 = inlined_call_operand.hbm [shape: f32[1,32], index: 10, kind: input, shape index: {}]   ;;  %s3014_s11 = inlined_call_operand.hbm [shape: f32[1,32], index: 11, kind: input, shape index: {}]   ;;  %s3015_s12 = inlined_call_operand.hbm [shape: f32[1,32], index: 12, kind: input, shape index: {}]   ;;  %s3016_s13 = inlined_call_operand.hbm [shape: bf16[2,8,32], index: 13, kind: output, shape index: {}]  }
   0x1   :  { %3030 = sst [smem:[#allocation38_spill]] %s3003_s0 }
   0x2   :  { %3031 = sst [smem:[#allocation39_spill]] %s3004_s1 }
   0x3   :  { %3032 = sst [smem:[#allocation40_spill]] %s3005_s2 }
   0x4   :  { %3033 = sst [smem:[#allocation41_spill]] %s3006_s3 }
   0x5   :  { %3034 = sst [smem:[#allocation42_spill]] %s3007_s4 }
   0x6   :  { %3035 = sst [smem:[#allocation43_spill]] %s3008_s5 }
   0x7   :  { %3036 = sst [smem:[#allocation44_spill]] %s3009_s6 }
   0x8   :  { %3037 = sst [smem:[#allocation45_spill]] %s3010_s7 }
   0x9   :  { %3038 = sst [smem:[#allocation46_spill]] %s3011_s8 }
   0xa   :  { %3039 = sst [smem:[#allocation47_spill]] %s3016_s13 }
   0xb   :  { %18 = vsyncpa [#allocation4], 0 }
   0xc   :  { %20 = vsyncpa [#allocation4 + $0x1], 0 }
   0xd   :  { %21 = vsyncpa [#allocation7], 0 }
   0xe   :  { %23 = vsyncpa [#allocation7 + $0x1], 0 }
   0xf   :  { %24 = vsyncpa [#allocation10], 0 }
  0x10   :  { %25 = vsyncpa [#allocation13], 0 }
  0x11   :  { %26 = vsyncpa [#allocation16], 0 }
  0x12   :  { %27 = vsyncpa [#allocation19], 0 }
  0x13   :  { %28 = vsyncpa [#allocation22], 0 }
  0x14   :  { %29 = vsyncpa [#allocation5], 0 }
  0x15   :  { %31 = vsyncpa [#allocation5 + $0x1], 0  ;;  %s2454_s25 = smov 0   ;;  %s2456_s26 = smov 0  }
  0x16   :  { %s2458_s27 = smov 0   ;;  %s2460_s28 = smov 0  }
  0x17   :  { %s2462_s29 = smov 0   ;;  %s2464_s30 = smov 0  }
  0x18 LB: > { %3040 = sst [smem:[#allocation34_spill]] %s2340_s25  ;;  %s2485_s14 = sadd.s32 4294967295, %s2360_s30   ;;  %s2360_s30 = sphi %s2464_s30, %s37_s30   ;;  %s2356_s29 = sphi %s2462_s29, %s3091_s29   ;;  %s2352_s28 = sphi %s2460_s28, %s3090_s28   ;;  %s2348_s27 = sphi %s2458_s27, %s3089_s27   ;;  %s2344_s26 = sphi %s2456_s26, %s3088_s26   ;;  %s2340_s25 = sphi %s2454_s25, %s3087_s25  }
  0x19   : > { %3041 = sst [smem:[#allocation35_spill]] %s2352_s28  ;;  %p1514_p0 = scmp.ge.s32.totalorder %s2360_s30, 1 }
  0x1a   : > { %3042 = sst [smem:[#allocation36_spill]] %s2485_s14  ;;  %p3024_p1 = scmp.eq.s32.totalorder %s2485_s14, 0 }
  0x1b   : > { %p367_p2 = scmp.lt.s32.totalorder %s2360_s30, 3  ;;  %s2362_s16 = smov [#allocation8]  }
  0x1c   : > { %s379_s17 = sshll.u32 %s2362_s16, 4  ;;  %s2363_s19 = smov [#allocation9]   ;;  %s2494_s17 = int_to_ptr.vmem [resolvable:$true] %s379_s17 }
  0x1d   : > { %p2490_p3 = pnand %p1514_p0, %p367_p2  ;;  %s392_s20 = sshll.u32 %s2363_s19, 4  ;;  %s2505_s20 = int_to_ptr.vmem [resolvable:$true] %s392_s20 }
  0x1e   : > { %s2364_s21 = smov [#allocation12]   ;;  %s3046_s2 = sld [smem:[#allocation40_spill]] }
  0x1f   : > { %s3043_s15 = scalar_select %p2490_p3, 1, 0 }
  0x20   : > { %p1722_p4 = pneg %p2490_p3  ;;  %s2507_s22 = sshll.u32 %s2364_s21, 4  ;;  %s420_s22 = int_to_ptr.vmem [resolvable:$true] %s2507_s22 }
  0x21   : > { %3044 = sst [smem:[#allocation37_spill]] %s3043_s15 }
  0x22   : > { %p2501_p6 = pnand %p1722_p4, %p3024_p1 }
  0x24   : > { %s1882_s16 = scalar_lea.hbm %s3046_s2, 256  ;;  %p2517_p8 = pneg %p2501_p6 }
  0x25   : > { %p1883_p7 = scmp.ne.s32.totalorder %s3046_s2, %s1882_s16  ;;  %p1889_p11 = scmp.lt.u32.totalorder %s1882_s16, %s3046_s2 }
  0x27   : > { %p1885_p9 = pnand %p2517_p8, %p1883_p7 }
  0x29   : > { %p1886_p10 = pneg %p1885_p9 }
  0x2b   : > { %p1891_p12 = pnand %p1889_p11, %p1886_p10 }
  0x2d   : > { %1894 = shalt.err (!%p1891_p12)
}
  0x2e   : > { %s1895_s13 = scalar_lea.vmem %s2494_s17, 256  ;;  %p1903_p4 = scmp.lt.s32.totalorder %s2494_s17, %s2494_s17 }
  0x2f   : > { %p1896_p13 = scmp.ne.s32.totalorder %s2494_s17, %s1895_s13  ;;  %p1904_p5 = scmp.lt.s32.totalorder %s1895_s13, %s1895_s13 }
  0x31   : > { %p1898_p0 = pnand %p1896_p13, %p2517_p8  ;;  %p1905_p7 = por %p1904_p5, %p1903_p4 }
  0x33   : > { %p1899_p2 = pneg %p1898_p0 }
  0x35   : > { %p1906_p9 = pnand %p1905_p7, %p1899_p2 }
  0x37   : > { %1909 = shalt.err (!%p1906_p9)
}
  0x38   : > { %s3026_s28 = smov 64   ;;  %s2366_s23 = smov 4  }
  0x39   : > { %1725 = dma.hbm_to_vmem [thread:$0]  (!%p2501_p6), %s3046_s2, 256, %s2494_s17, [#allocation7], %s3026_s28, %s3026_s28, %s2366_s23  }
  0x3a   : > { %s3048_s3 = sld [smem:[#allocation41_spill]] }
  0x40   : > { %s1910_s13 = scalar_lea.hbm %s3048_s3, 256 }
  0x41   : > { %p1911_p5 = scmp.ne.s32.totalorder %s3048_s3, %s1910_s13  ;;  %p1917_p12 = scmp.lt.u32.totalorder %s1910_s13, %s3048_s3 }
  0x43   : > { %p1913_p10 = pnand %p1911_p5, %p2517_p8 }
  0x45   : > { %p1914_p11 = pneg %p1913_p10 }
  0x47   : > { %p1919_p13 = pnand %p1917_p12, %p1914_p11 }
  0x49   : > { %1922 = shalt.err (!%p1919_p13)
}
  0x4a   : > { %s1923_s17 = scalar_lea.vmem %s2505_s20, 256  ;;  %p1931_p7 = scmp.lt.s32.totalorder %s2505_s20, %s2505_s20 }
  0x4b   : > { %p1924_p0 = scmp.ne.s32.totalorder %s2505_s20, %s1923_s17  ;;  %p1932_p9 = scmp.lt.s32.totalorder %s1923_s17, %s1923_s17 }
  0x4d   : > { %p1926_p2 = pnand %p1924_p0, %p2517_p8  ;;  %p1933_p5 = por %p1932_p9, %p1931_p7 }
  0x4f   : > { %p1927_p4 = pneg %p1926_p2 }
  0x51   : > { %p1934_p10 = pnand %p1933_p5, %p1927_p4 }
  0x53   : > { %1937 = shalt.err (!%p1934_p10)
}
  0x54   : > { %1728 = dma.hbm_to_vmem [thread:$0]  (!%p2501_p6), %s3048_s3, 256, %s2505_s20, [#allocation10], %s3026_s28, %s3026_s28, %s2366_s23  }
  0x55   : > { %s3049_s5 = sld [smem:[#allocation43_spill]] }
  0x5b   : > { %s1938_s24 = scalar_lea.hbm %s3049_s5, 16 }
  0x5c   : > { %p1939_p11 = scmp.ne.s32.totalorder %s3049_s5, %s1938_s24  ;;  %p1945_p0 = scmp.lt.u32.totalorder %s1938_s24, %s3049_s5 }
  0x5e   : > { %p1941_p12 = pnand %p1939_p11, %p2517_p8 }
  0x60   : > { %p1942_p13 = pneg %p1941_p12 }
  0x62   : > { %p1947_p2 = pnand %p1945_p0, %p1942_p13 }
  0x64   : > { %1950 = shalt.err (!%p1947_p2)
}
  0x65   : > { %s1951_s17 = scalar_lea.vmem %s420_s22, 16  ;;  %s1958_s20 = scalar_lea.vmem %s420_s22, 32 }
  0x66   : > { %p1952_p4 = scmp.ne.s32.totalorder %s420_s22, %s1951_s17  ;;  %p1959_p5 = scmp.lt.s32.totalorder %s420_s22, %s420_s22 }
  0x67   : > { %p1960_p10 = scmp.lt.s32.totalorder %s1958_s20, %s1951_s17 }
  0x68   : > { %p1954_p7 = pnand %p1952_p4, %p2517_p8 }
  0x69   : > { %p1961_p1 = por %p1960_p10, %p1959_p5 }
  0x6a   : > { %p1955_p9 = pneg %p1954_p7 }
  0x6c   : > { %p1962_p3 = pnand %p1961_p1, %p1955_p9 }
  0x6e   : > { %1965 = shalt.err (!%p1962_p3)
}
  0x6f   : > { %1734 = dma.hbm_to_vmem [thread:$0]  (!%p2501_p6), %s3049_s5, 16, %s420_s22, [#allocation13]  }
  0x70   : > { %s2367_s25 = smov [#allocation15]   ;;  %s2368_s24 = smov [#allocation18]  }
  0x71   : > { %s440_s14 = sshll.u32 %s2367_s25, 4  ;;  %s464_s16 = sshll.u32 %s2368_s24, 4  ;;  %s441_s14 = int_to_ptr.vmem [resolvable:$true] %s440_s14  ;;  %s465_s16 = int_to_ptr.vmem [resolvable:$true] %s464_s16 }
  0x72   : > { %s3050_s7 = sld [smem:[#allocation45_spill]] }
  0x78   : > { %s1966_s13 = scalar_lea.hbm %s3050_s7, 256 }
  0x79   : > { %p1967_p1 = scmp.ne.s32.totalorder %s3050_s7, %s1966_s13  ;;  %p1973_p12 = scmp.lt.u32.totalorder %s1966_s13, %s3050_s7 }
  0x7b   : > { %p1969_p3 = pnand %p1967_p1, %p2517_p8 }
  0x7d   : > { %p1970_p11 = pneg %p1969_p3 }
  0x7f   : > { %p1975_p13 = pnand %p1973_p12, %p1970_p11 }
  0x81   : > { %1978 = shalt.err (!%p1975_p13)
}
  0x82   : > { %s1979_s22 = scalar_lea.vmem %s441_s14, 256  ;;  %p1987_p7 = scmp.lt.s32.totalorder %s441_s14, %s441_s14 }
  0x83   : > { %p1980_p0 = scmp.ne.s32.totalorder %s441_s14, %s1979_s22  ;;  %p1988_p9 = scmp.lt.s32.totalorder %s1979_s22, %s1979_s22 }
  0x85   : > { %p1982_p2 = pnand %p1980_p0, %p2517_p8  ;;  %p1989_p5 = por %p1988_p9, %p1987_p7 }
  0x87   : > { %p1983_p4 = pneg %p1982_p2 }
  0x89   : > { %p1990_p10 = pnand %p1989_p5, %p1983_p4 }
  0x8b   : > { %1993 = shalt.err (!%p1990_p10)
}
  0x8c   : > { %s3051_s1 = smov 64   ;;  %s1994_s21 = scalar_lea.hbm %s3012_s9, 512 }
  0x8d   : > { %1740 = dma.hbm_to_vmem [thread:$0]  (!%p2501_p6), %s3050_s7, 256, %s441_s14, [#allocation16], %s3051_s1, %s3051_s1, %s2366_s23  }
  0x8e   : > { %p1995_p1 = scmp.ne.s32.totalorder %s3012_s9, %s1994_s21  ;;  %p2001_p12 = scmp.lt.u32.totalorder %s1994_s21, %s3012_s9 }
  0x90   : > { %p1997_p3 = pnand %p1995_p1, %p2517_p8 }
  0x92   : > { %p1998_p11 = pneg %p1997_p3 }
  0x94   : > { %p2003_p13 = pnand %p2001_p12, %p1998_p11 }
  0x96   : > { %2006 = shalt.err (!%p2003_p13)
}
  0x97   : > { %s2007_s22 = scalar_lea.vmem %s465_s16, 512  ;;  %p2015_p7 = scmp.lt.s32.totalorder %s465_s16, %s465_s16 }
  0x98   : > { %p2008_p0 = scmp.ne.s32.totalorder %s465_s16, %s2007_s22  ;;  %p2016_p9 = scmp.lt.s32.totalorder %s2007_s22, %s2007_s22 }
  0x9a   : > { %p2010_p2 = pnand %p2008_p0, %p2517_p8  ;;  %p2017_p5 = por %p2016_p9, %p2015_p7 }
  0x9c   : > { %p2011_p4 = pneg %p2010_p2 }
  0x9e   : > { %p2018_p10 = pnand %p2017_p5, %p2011_p4 }
  0xa0   : > { %2021 = shalt.err (!%p2018_p10)
}
  0xa1   : > { %1746 = dma.hbm_to_vmem [thread:$0]  (!%p2501_p6), %s3012_s9, 512, %s465_s16, [#allocation19], %s3051_s1, %s3051_s1, %s2366_s23  }
  0xa2   : > { %s2369_s25 = smov [#allocation21]   ;;  %s2370_s19 = smov [#allocation11]  }
  0xa3   : > { %s489_s24 = sshll.u32 %s2369_s25, 4  ;;  %s405_s21 = sshll.u32 %s2370_s19, 4  ;;  %s490_s24 = int_to_ptr.vmem [resolvable:$true] %s489_s24  ;;  %s406_s21 = int_to_ptr.vmem [resolvable:$true] %s405_s21 }
  0xa4   : > { %s2022_s20 = scalar_lea.hbm %s3014_s11, 16 }
  0xa5   : > { %p2023_p1 = scmp.ne.s32.totalorder %s3014_s11, %s2022_s20  ;;  %p2029_p12 = scmp.lt.u32.totalorder %s2022_s20, %s3014_s11 }
  0xa7   : > { %p2025_p3 = pnand %p2023_p1, %p2517_p8 }
  0xa9   : > { %p2026_p11 = pneg %p2025_p3 }
  0xab   : > { %p2031_p13 = pnand %p2029_p12, %p2026_p11 }
  0xad   : > { %2034 = shalt.err (!%p2031_p13)
}
  0xae   : > { %s2035_s16 = scalar_lea.vmem %s490_s24, 16  ;;  %s2042_s28 = scalar_lea.vmem %s490_s24, 32 }
  0xaf   : > { %p2036_p0 = scmp.ne.s32.totalorder %s490_s24, %s2035_s16  ;;  %p2043_p7 = scmp.lt.s32.totalorder %s490_s24, %s490_s24 }
  0xb0   : > { %p2044_p9 = scmp.lt.s32.totalorder %s2042_s28, %s2035_s16 }
  0xb1   : > { %p2038_p2 = pnand %p2036_p0, %p2517_p8 }
  0xb2   : > { %p2045_p5 = por %p2044_p9, %p2043_p7 }
  0xb3   : > { %p2039_p4 = pneg %p2038_p2 }
  0xb5   : > { %p2046_p10 = pnand %p2045_p5, %p2039_p4 }
  0xb7   : > { %2049 = shalt.err (!%p2046_p10)
}
  0xb8   : > { %1752 = dma.hbm_to_vmem [thread:$0]  (!%p2501_p6), %s3014_s11, 16, %s490_s24, [#allocation22]  }
  0xb9   : > { %s3052_s4 = sld [smem:[#allocation42_spill]] }
  0xbf   : > { %s2050_s17 = scalar_lea.hbm %s3052_s4, 256 }
  0xc0   : > { %p2051_p1 = scmp.ne.s32.totalorder %s3052_s4, %s2050_s17  ;;  %p2057_p12 = scmp.lt.u32.totalorder %s2050_s17, %s3052_s4 }
  0xc2   : > { %p2053_p3 = pnand %p2051_p1, %p2517_p8 }
  0xc4   : > { %p2054_p11 = pneg %p2053_p3 }
  0xc6   : > { %p2059_p13 = pnand %p2057_p12, %p2054_p11 }
  0xc8   : > { %2062 = shalt.err (!%p2059_p13)
}
  0xc9   : > { %s2063_s16 = scalar_lea.vmem %s406_s21, 256  ;;  %p2071_p7 = scmp.lt.s32.totalorder %s406_s21, %s406_s21 }
  0xca   : > { %p2064_p0 = scmp.ne.s32.totalorder %s406_s21, %s2063_s16  ;;  %p2072_p9 = scmp.lt.s32.totalorder %s2063_s16, %s2063_s16 }
  0xcc   : > { %p2066_p2 = pnand %p2064_p0, %p2517_p8  ;;  %p2073_p5 = por %p2072_p9, %p2071_p7 }
  0xce   : > { %p2067_p4 = pneg %p2066_p2 }
  0xd0   : > { %p2074_p10 = pnand %p2073_p5, %p2067_p4 }
  0xd2   : > { %2077 = shalt.err (!%p2074_p10)
}
  0xd3   : > { %1731 = dma.hbm_to_vmem [thread:$0]  (!%p2501_p6), %s3052_s4, 256, %s406_s21, [#allocation10], %s3051_s1, %s3051_s1, %s2366_s23  }
  0xd4   : > { %s2371_s25 = smov [#allocation14]   ;;  %s2372_s2 = smov [#allocation17]  }
  0xd5   : > { %s430_s19 = sshll.u32 %s2371_s25, 4  ;;  %s454_s13 = sshll.u32 %s2372_s2, 4  ;;  %s431_s19 = int_to_ptr.vmem [resolvable:$true] %s430_s19  ;;  %s455_s13 = int_to_ptr.vmem [resolvable:$true] %s454_s13 }
  0xd6   : > { %s3053_s6 = sld [smem:[#allocation44_spill]] }
  0xdc   : > { %s2078_s0 = scalar_lea.hbm %s3053_s6, 16 }
  0xdd   : > { %p2079_p1 = scmp.ne.s32.totalorder %s3053_s6, %s2078_s0  ;;  %p2085_p12 = scmp.lt.u32.totalorder %s2078_s0, %s3053_s6 }
  0xdf   : > { %p2081_p3 = pnand %p2079_p1, %p2517_p8 }
  0xe1   : > { %p2082_p11 = pneg %p2081_p3 }
  0xe3   : > { %p2087_p13 = pnand %p2085_p12, %p2082_p11 }
  0xe5   : > { %2090 = shalt.err (!%p2087_p13)
}
  0xe6   : > { %s2091_s23 = scalar_lea.vmem %s431_s19, 16  ;;  %s2098_s1 = scalar_lea.vmem %s431_s19, 32 }
  0xe7   : > { %p2092_p0 = scmp.ne.s32.totalorder %s431_s19, %s2091_s23  ;;  %p2099_p7 = scmp.lt.s32.totalorder %s431_s19, %s431_s19 }
  0xe8   : > { %p2100_p9 = scmp.lt.s32.totalorder %s2098_s1, %s2091_s23 }
  0xe9   : > { %p2094_p2 = pnand %p2092_p0, %p2517_p8 }
  0xea   : > { %p2101_p5 = por %p2100_p9, %p2099_p7 }
  0xeb   : > { %p2095_p4 = pneg %p2094_p2 }
  0xed   : > { %p2102_p10 = pnand %p2101_p5, %p2095_p4 }
  0xef   : > { %2105 = shalt.err (!%p2102_p10)
}
  0xf0   : > { %1737 = dma.hbm_to_vmem [thread:$0]  (!%p2501_p6), %s3053_s6, 16, %s431_s19, [#allocation13]  }
  0xf1   : > { %s3054_s8 = sld [smem:[#allocation46_spill]] }
  0xf7   : > { %s2106_s17 = scalar_lea.hbm %s3054_s8, 16 }
  0xf8   : > { %p2107_p1 = scmp.ne.s32.totalorder %s3054_s8, %s2106_s17  ;;  %p2113_p12 = scmp.lt.u32.totalorder %s2106_s17, %s3054_s8 }
  0xfa   : > { %p2109_p3 = pnand %p2107_p1, %p2517_p8 }
  0xfc   : > { %p2110_p11 = pneg %p2109_p3 }
  0xfe   : > { %p2115_p13 = pnand %p2113_p12, %p2110_p11 }
 0x100   : > { %2118 = shalt.err (!%p2115_p13)
}
 0x101   : > { %s2119_s16 = scalar_lea.vmem %s455_s13, 16  ;;  %s2126_s19 = scalar_lea.vmem %s455_s13, 32 }
 0x102   : > { %p2120_p0 = scmp.ne.s32.totalorder %s455_s13, %s2119_s16  ;;  %p2127_p7 = scmp.lt.s32.totalorder %s455_s13, %s455_s13 }
 0x103   : > { %p2128_p9 = scmp.lt.s32.totalorder %s2126_s19, %s2119_s16 }
 0x104   : > { %p2122_p2 = pnand %p2120_p0, %p2517_p8 }
 0x105   : > { %p2129_p5 = por %p2128_p9, %p2127_p7 }
 0x106   : > { %p2123_p4 = pneg %p2122_p2 }
 0x108   : > { %p2130_p10 = pnand %p2129_p5, %p2123_p4 }
 0x10a   : > { %2133 = shalt.err (!%p2130_p10)
}
 0x10b   : > { %1743 = dma.hbm_to_vmem [thread:$0]  (!%p2501_p6), %s3054_s8, 16, %s455_s13, [#allocation16]  }
 0x10c   : > { %s2373_s1 = smov [#allocation20]   ;;  %s2374_s28 = smov [#allocation23]  }
 0x10d   : > { %s478_s21 = sshll.u32 %s2373_s1, 4  ;;  %s500_s25 = sshll.u32 %s2374_s28, 4  ;;  %s479_s21 = int_to_ptr.vmem [resolvable:$true] %s478_s21  ;;  %s501_s25 = int_to_ptr.vmem [resolvable:$true] %s500_s25 }
 0x10e   : > { %s2134_s20 = scalar_lea.hbm %s3013_s10, 16 }
 0x10f   : > { %p2135_p1 = scmp.ne.s32.totalorder %s3013_s10, %s2134_s20  ;;  %p2141_p12 = scmp.lt.u32.totalorder %s2134_s20, %s3013_s10 }
 0x111   : > { %p2137_p3 = pnand %p2135_p1, %p2517_p8 }
 0x113   : > { %p2138_p11 = pneg %p2137_p3 }
 0x115   : > { %p2143_p13 = pnand %p2141_p12, %p2138_p11 }
 0x117   : > { %2146 = shalt.err (!%p2143_p13)
}
 0x118   : > { %s2147_s13 = scalar_lea.vmem %s479_s21, 16  ;;  %s2154_s19 = scalar_lea.vmem %s479_s21, 32 }
 0x119   : > { %p2148_p0 = scmp.ne.s32.totalorder %s479_s21, %s2147_s13  ;;  %p2155_p7 = scmp.lt.s32.totalorder %s479_s21, %s479_s21 }
 0x11a   : > { %p2156_p9 = scmp.lt.s32.totalorder %s2154_s19, %s2147_s13 }
 0x11b   : > { %p2150_p2 = pnand %p2148_p0, %p2517_p8 }
 0x11c   : > { %p2157_p5 = por %p2156_p9, %p2155_p7 }
 0x11d   : > { %p2151_p4 = pneg %p2150_p2 }
 0x11f   : > { %p2158_p10 = pnand %p2157_p5, %p2151_p4 }
 0x121   : > { %2161 = shalt.err (!%p2158_p10)
}
 0x122   : > { %1749 = dma.hbm_to_vmem [thread:$0]  (!%p2501_p6), %s3013_s10, 16, %s479_s21, [#allocation19]  }
 0x123   : > { %s2162_s2 = scalar_lea.hbm %s3015_s12, 16 }
 0x124   : > { %p2163_p1 = scmp.ne.s32.totalorder %s3015_s12, %s2162_s2  ;;  %p2169_p12 = scmp.lt.u32.totalorder %s2162_s2, %s3015_s12 }
 0x126   : > { %p2165_p3 = pnand %p2163_p1, %p2517_p8 }
 0x128   : > { %p2166_p11 = pneg %p2165_p3 }
 0x12a   : > { %p2171_p13 = pnand %p2169_p12, %p2166_p11 }
 0x12c   : > { %2174 = shalt.err (!%p2171_p13)
}
 0x12d   : > { %s2175_s14 = scalar_lea.vmem %s501_s25, 16  ;;  %s2182_s21 = scalar_lea.vmem %s501_s25, 32 }
 0x12e   : > { %p2176_p0 = scmp.ne.s32.totalorder %s501_s25, %s2175_s14  ;;  %p2183_p7 = scmp.lt.s32.totalorder %s501_s25, %s501_s25 }
 0x12f   : > { %p2184_p9 = scmp.lt.s32.totalorder %s2182_s21, %s2175_s14 }
 0x130   : > { %p2178_p2 = pnand %p2176_p0, %p2517_p8 }
 0x131   : > { %p2185_p5 = por %p2184_p9, %p2183_p7 }
 0x132   : > { %p2179_p4 = pneg %p2178_p2 }
 0x134   : > { %p2186_p10 = pnand %p2185_p5, %p2179_p4 }
 0x136   : > { %2189 = shalt.err (!%p2186_p10)
}
 0x137   : > { %s3055_s15 = sld [smem:[#allocation34_spill]]  ;;  %s3056_s19 = sld [smem:[#allocation36_spill]] }
 0x138   : > { %1755 = dma.hbm_to_vmem [thread:$0]  (!%p2501_p6), %s3015_s12, 16, %s501_s25, [#allocation22]  }
 0x139   : > { %s1513_s24 = sadd.s32 4294967294, %s2360_s30   ;;  %s49_s23 = sadd.s32 1, %s2356_s29 }
 0x13a   : > { %s58_s18 = sadd.s32 1, %s2348_s27  ;;  %p51_p8 = scmp.ge.s32.totalorder %s49_s23, 2 }
 0x13b   : > { %p65_p1 = scmp.ne.s32.totalorder %s2348_s27, %s2344_s26  ;;  %p66_p3 = scmp.eq.s32.totalorder %s2360_s30, 0 }
 0x13c   : > { %s3093_s23 = smov (%p51_p8, %s49_s23), 0  ;;  %p360_p4 = scmp.eq.s32.totalorder %s1513_s24, 1 }
 0x13d   : > { %p71_p11 = scmp.ne.s32.totalorder %s2344_s26, %s3055_s15  ;;  %p2749_p12 = por %p66_p3, %p65_p1 }
 0x13e   : > { %p3058_p13 = scmp.eq.s32.totalorder %s3056_s19, 0  ;;  %s53_s28 = ssub.s32 %s2356_s29, %s3093_s23 }
 0x13f   : > { %p354_p0 = scmp.eq.s32.totalorder %s3056_s19, 1  ;;  %p56_p2 = scmp.eq.s32.totalorder %s53_s28, 0 }
 0x140   : > { %p2755_p6 = por %p3058_p13, %p71_p11  ;;  %p1778_p9 = scmp.lt.s32.totalorder %s2360_s30, 2 }
 0x141   : > { %p2762_p7 = por %p354_p0, %p65_p1  ;;  %p2770_p5 = por %p360_p4, %p71_p11 }
 0x142   : > { %s3059_s25 = scalar_select %p2755_p6, 1, 0 }
 0x143   : > { %s3060_s2 = scalar_select %p2762_p7, 1, 0 }
 0x144   : > { %s2768_s17 = scalar_select %p56_p2, %s2348_s27, %s58_s18  }
 0x145   : > { %s3061_s20 = scalar_select %p2770_p5, 1, 0 }
 0x146   : > { %s511_s0 = sand.u32 1, %s2348_s27   ;;  %s1528_s14 = sshll.u32 %s2356_s29, 6 }
 0x147   : > { %s2775_s22 = sshll.u32 %s511_s0, 2  ;;  %s3062_s13 = sld [smem:[#allocation38_spill]] }
 0x148   : > { %s515_s19 = scalar_lea.vmem [#allocation3], %s2775_s22  ;;  %p2788_p10 = pnand %p1778_p9, %p2749_p12 }
 0x149   : > { %s523_s24 = sshll.u32 %s515_s19, 4  ;;  %s3064_s4 = sld [smem:[#allocation39_spill]]  ;;  %s2784_s24 = int_to_ptr.vmem [resolvable:$true] %s523_s24 }
 0x14a   : > { %s530_s16 = sand.u32 1, %s2360_s30   ;;  %s512_s5 = scalar_lea.sflag [#allocation4], %s511_s0 }
 0x14b   : > { %p2192_p1 = pneg %p2788_p10 }
 0x14d   : > { %s2781_s15 = scalar_lea.hbm %s3062_s13, %s1528_s14  ;;  %s2195_s7 = scalar_lea.hbm %s3062_s13, 128 }
 0x14e   : > { %s2190_s6 = scalar_lea.hbm %s2781_s15, 64  ;;  %p2196_p12 = scmp.lt.u32.totalorder %s2781_s15, %s3062_s13 }
 0x14f   : > { %s2795_s21 = scalar_lea.hbm %s3064_s4, %s1528_s14  ;;  %p2191_p8 = scmp.ne.s32.totalorder %s2781_s15, %s2190_s6 }
 0x150   : > { %p2197_p13 = scmp.lt.u32.totalorder %s2195_s7, %s2190_s6  ;;  %p2199_p2 = scmp.lt.u32.totalorder %s2190_s6, %s2781_s15 }
 0x151   : > { %p2193_p3 = pnand %p2192_p1, %p2191_p8 }
 0x152   : > { %p2198_p0 = por %p2197_p13, %p2196_p12 }
 0x153   : > { %p2194_p11 = pneg %p2193_p3 }
 0x154   : > { %p2200_p4 = por %p2199_p2, %p2198_p0 }
 0x156   : > { %p2201_p9 = pnand %p2200_p4, %p2194_p11 }
 0x158   : > { %2204 = shalt.err (!%p2201_p9)
}
 0x159   : > { %s2205_s0 = scalar_lea.vmem %s2784_s24, 64  ;;  %s2375_s14 = smov [#allocation3]  }
 0x15a   : > { %p2206_p8 = scmp.ne.s32.totalorder %s2784_s24, %s2205_s0  ;;  %s2210_s28 = sshll.u32 %s2375_s14, 4  ;;  %s2211_s28 = int_to_ptr.vmem [resolvable:$false] %s2210_s28 }
 0x15b   : > { %s2212_s8 = scalar_lea.vmem %s2211_s28, 128  ;;  %p2213_p7 = scmp.lt.s32.totalorder %s2784_s24, %s2211_s28 }
 0x15c   : > { %p2208_p3 = pnand %p2206_p8, %p2192_p1  ;;  %p2214_p12 = scmp.lt.s32.totalorder %s2212_s8, %s2205_s0 }
 0x15e   : > { %p2209_p5 = pneg %p2208_p3  ;;  %p2215_p13 = por %p2214_p12, %p2213_p7 }
 0x160   : > { %p2216_p0 = pnand %p2215_p13, %p2209_p5 }
 0x162   : > { %2219 = shalt.err (!%p2216_p0)
}
 0x163   : > { %1759 = dma.hbm_to_vmem [thread:$0]  (!%p2788_p10), %s2781_s15, 64, %s2784_s24, %s512_s5  }
 0x164   : > { %s534_s6 = scalar_lea.vmem [#allocation6], %s2775_s22  ;;  %s531_s1 = scalar_lea.sflag [#allocation7], %s530_s16 }
 0x165   : > { %s541_s7 = sshll.u32 %s534_s6, 4  ;;  %s2220_s19 = scalar_lea.hbm %s2795_s21, 64  ;;  %s542_s7 = int_to_ptr.vmem [resolvable:$true] %s541_s7 }
 0x166   : > { %p2221_p7 = scmp.ne.s32.totalorder %s2795_s21, %s2220_s19  ;;  %s2225_s14 = scalar_lea.hbm %s3064_s4, 128 }
 0x167   : > { %p2226_p2 = scmp.lt.u32.totalorder %s2795_s21, %s3064_s4  ;;  %p2227_p4 = scmp.lt.u32.totalorder %s2225_s14, %s2220_s19 }
 0x168   : > { %p2223_p5 = pnand %p2221_p7, %p2192_p1  ;;  %p2229_p8 = scmp.lt.u32.totalorder %s2220_s19, %s2795_s21 }
 0x169   : > { %p2228_p9 = por %p2227_p4, %p2226_p2 }
 0x16a   : > { %p2224_p11 = pneg %p2223_p5 }
 0x16b   : > { %p2230_p3 = por %p2229_p8, %p2228_p9 }
 0x16d   : > { %p2231_p12 = pnand %p2230_p3, %p2224_p11 }
 0x16f   : > { %2234 = shalt.err (!%p2231_p12)
}
 0x170   : > { %s2235_s5 = scalar_lea.vmem %s542_s7, 64  ;;  %s2376_s22 = smov [#allocation6]  }
 0x171   : > { %p2236_p13 = scmp.ne.s32.totalorder %s542_s7, %s2235_s5  ;;  %s2240_s15 = sshll.u32 %s2376_s22, 4  ;;  %s2241_s15 = int_to_ptr.vmem [resolvable:$false] %s2240_s15 }
 0x172   : > { %s2242_s24 = scalar_lea.vmem %s2241_s15, 128  ;;  %p2243_p5 = scmp.lt.s32.totalorder %s542_s7, %s2241_s15 }
 0x173   : > { %p2238_p0 = pnand %p2236_p13, %p2192_p1  ;;  %p2244_p6 = scmp.lt.s32.totalorder %s2242_s24, %s2235_s5 }
 0x175   : > { %p2239_p7 = pneg %p2238_p0  ;;  %p2245_p2 = por %p2244_p6, %p2243_p5 }
 0x177   : > { %p2246_p4 = pnand %p2245_p2, %p2239_p7 }
 0x179   : > { %2249 = shalt.err (!%p2246_p4)
}
 0x17a   : > { %1762 = dma.hbm_to_vmem [thread:$0]  (!%p2788_p10), %s2795_s21, 64, %s542_s7, %s531_s1  }
 0x17b   : > { %s3065_s16 = sld [smem:[#allocation37_spill]] }
 0x181   : > { %p3066_p11 = scmp.ne.s32.totalorder %s3065_s16, 0 }
 0x182   : > { %s2848_s6 = sand.u32 (!%p3066_p11), 1, %s2344_s26   ;;  %p3067_p6 = scmp.ne.s32.totalorder (!%p3066_p11), %s3059_s25, 0 }
 0x183   : > { %550 = sbr.rel (%p3066_p11) target bundleno = 2935 (0xb77), region = 72  ;;  %s2851_s19 = sshll.u32 (!%p3066_p11), %s2848_s6, 2 }
 0x184   : > { %s553_s3 = scalar_lea.sflag (!%p3066_p11), [#allocation4], %s2848_s6  ;;  %s556_s0 = scalar_lea.vmem (!%p3066_p11), [#allocation3], %s2851_s19 }
 0x18a   : > { %2303 = dma.done.wait (%p3067_p6), %s553_s3, 64  }
 0x18b   : > { %2305 = vsyncadd (%p3067_p6), %s553_s3, 4294967232  ;;  %s3068_s18 = sld [smem:[#allocation36_spill]]  ;;  %s565_s1 = scalar_lea.vmem [#allocation6], %s2851_s19 }
 0x191   : > { %s561_s21 = sand.u32 1, %s3068_s18  }
 0x192   : > { %s562_s7 = scalar_lea.sflag [#allocation7], %s561_s21 }
 0x193   : > { %2307 = dma.done.wait (%p3067_p6), %s562_s7, 64  }
 0x194   : > { %2309 = vsyncadd (%p3067_p6), %s562_s7, 4294967232  ;;  %p3069_p10 = scmp.eq.s32.totalorder %s3068_s18, 0 }
 0x196   : > { %2311 = dma.done.wait (%p3069_p10), [#allocation7], 256   ;;  %p3070_p1 = pmov %p3069_p10 }
 0x198   : > { %2313 = vsyncadd (%p3070_p1), [#allocation7], 4294967040  ;;  %p3071_p9 = pmov %p3070_p1 }
 0x199   : > { %p3072_p8 = pmov %p3070_p1 }
 0x19a   : > { %2315 = dma.done.wait (%p3071_p9), [#allocation10], 512  }
 0x19b   : > { %2317 = vsyncadd (%p3072_p8), [#allocation10], 4294966784  ;;  %p3073_p3 = pmov %p3070_p1 }
 0x19c   : > { %p3074_p12 = pmov %p3070_p1 }
 0x19d   : > { %2319 = dma.done.wait (%p3073_p3), [#allocation13], 32  }
 0x19e   : > { %2321 = vsyncadd (%p3074_p12), [#allocation13], 4294967264  ;;  %p3075_p13 = pmov %p3070_p1 }
 0x19f   : > { %p3076_p0 = pmov %p3070_p1 }
 0x1a0   : > { %2323 = dma.done.wait (%p3075_p13), [#allocation16], 272  }
 0x1a1   : > { %2325 = vsyncadd (%p3076_p0), [#allocation16], 4294967024  ;;  %p3077_p7 = pmov %p3076_p0 }
 0x1a2   : > { %p3078_p5 = pmov %p3076_p0 }
 0x1a3   : > { %2327 = dma.done.wait (%p3077_p7), [#allocation19], 528  }
 0x1a4   : > { %2329 = vsyncadd (%p3078_p5), [#allocation19], 4294966768  ;;  %p3079_p2 = pmov %p3076_p0 }
 0x1a5   : > { %p3080_p4 = pmov %p3076_p0 }
 0x1a6   : > { %2331 = dma.done.wait (%p3079_p2), [#allocation22], 32  }
 0x1a7   : > { %2333 = vsyncadd (%p3080_p4), [#allocation22], 4294967264  ;;  %v2377_v0 = vmov 0.0   ;;  %vm2378_vm0 = vmmov 0   ;;  %v1858_v1 = vld [vmem:[#allocation8] sm:$0xff]   ;;  %v1859_v2 = vld [vmem:[#allocation8 + $0x8] sm:$0xff]  }
 0x1a8   : > { %1604 = vmatprep.subr.bf16.mxu1 %v2377_v0  ;;  %1608 = vmatprep.mubr.msk.bf16.mxu1 %vm2378_vm0, %v2377_v0  ;;  %v2896_v3 = vld [vmem:[%s556_s0] sm:$0xf]  ;;  %vm676_vm1 = vcmask 261120   ;;  %v1861_v5 = vld [vmem:[#allocation9 + $0x8] sm:$0xff]   ;;  %vm785_vm2 = vcmask 130048   ;;  %s2379_s25 = smov 112  }
 0x1a9   : > { %1620 = vmatprep.subr.bf16.mxu0 %v2377_v0  ;;  %1622 = vmatprep.mubr.msk.bf16.mxu0 %vm2378_vm0, %v2377_v0  ;;  %v1860_v4 = vld [vmem:[#allocation9] sm:$0xff]   ;;  %v659_v6 = vld [vmem:[%s565_s1] sm:$0xf]  ;;  %vm832_vm3 = vcmask 64512   ;;  %s2380_s14 = smov 96   ;;  %vm851_vm4 = vcmask 1043456  }
 0x1aa   : > { %1605 = vmatpush3.bf16.msra.mxu1 %v1858_v1  ;;  %s2381_s28 = smov 80   ;;  %vm896_vm5 = vcmask 125952   ;;  %v1862_v58 = vld [vmem:[#allocation11] sm:$0xff]   ;;  %v1863_v59 = vld [vmem:[#allocation11 + $0x8] sm:$0xff]   ;;  %s2382_s8 = smov 16   ;;  %vm1016_vm6 = vcmask 257152  }
 0x1ab   : > { %1606 = vmatprep.subr.bf16.mxu1 %v2377_v0  ;;  %vm1213_vm7 = vcmask 523264   ;;  %s3081_s5 = sld [smem:[#allocation35_spill]]  ;;  %s656_s15 = scalar_lea.vmem [#allocation24], %s2851_s19  ;;  %vm1288_vm8 = vcmask 257024  }
 0x1ac   : > { %s1305_s24 = sshll.u32 %s656_s15, 4  ;;  %s3082_s0 = sld [smem:[#allocation47_spill]]  ;;  %s2956_s24 = int_to_ptr.vmem [resolvable:$true] %s1305_s24 }
 0x1ad   : > { %s1291_s21 = scalar_lea.sflag [#allocation5], %s2848_s6  ;;  %s2250_s7 = scalar_lea.vmem %s2956_s24, 64 }
 0x1ae   : > { %1607 = vmatpush3.bf16.msra.mxu1 %v1859_v2  ;;  %p2251_p11 = scmp.ne.s32.totalorder %s2956_s24, %s2250_s7  ;;  %p3083_p6 = scmp.ne.s32.totalorder %s3060_s2, 0 }
 0x1af   : > { %1612 = vmatprep.subr.bf16.mxu1 %v2377_v0  ;;  %s2383_s19 = smov [#allocation24]  }
 0x1b0   : > { %p2252_p10 = pnand %p2251_p11, %p3083_p6  ;;  %s2254_s1 = sshll.u32 %s2383_s19, 4  ;;  %s2255_s1 = int_to_ptr.vmem [resolvable:$false] %s2254_s1 }
 0x1b1   : > { %1609 = vmatmul.mubr.msk.bf16.vlgmr.msra.gmra.mrb[0].mxu1 %vm676_vm1, %v2896_v3  ;;  %s1575_s22 = sshll.u32 %s3081_s5, 6  ;;  %p2257_p9 = scmp.lt.s32.totalorder %s2956_s24, %s2255_s1 }
 0x1b2   : > { %1613 = vmatpush3.bf16.msra.mxu1 %v1860_v4  ;;  %1616 = vmatprep.mubr.msk.bf16.mxu1 %vm2378_vm0, %v2377_v0  ;;  %s2954_s18 = scalar_lea.hbm %s3082_s0, %s1575_s22  ;;  %p2253_p1 = pneg %p2252_p10 }
 0x1b3   : > { %1614 = vmatprep.subr.bf16.mxu1 %v2377_v0 }
 0x1b6   : > { %1615 = vmatpush3.bf16.msra.mxu1 %v1861_v5  ;;  %v1019_v5 = vunpack.c.l.bf16 %v2896_v3  ;;  %v1865_v3 = vld [vmem:[#allocation15 + $0x8] sm:$0xff]  }
 0x1b7   : > { %1626 = vmatprep.subr.bf16.mxu1 %v2377_v0 }
 0x1b9   : > { %1617 = vmatmul.mubr.msk.bf16.vlgmr.msra.gmra.mrb[4].mxu1 %vm676_vm1, %v659_v6 }
 0x1ba   : > { %1628 = vmatprep.mubr.msk.bf16.mxu1 %vm2378_vm0, %v2377_v0 }
 0x284   : > { %v714_v7 = vpop.f32.mrb[0].mxu1 }
 0x285   : > { %v1610_v8 = vpop.f32.mrb[1].mxu1  ;;  %v720_v17 = vpack.c.bf16 %v714_v7, %v714_v7 }
 0x286   : > { %v717_v9 = vpop.f32.mrb[2].mxu1 }
 0x287   : > { %v1611_v10 = vpop.f32.mrb[3].mxu1 }
 0x28c   : > { %v774_v11 = vpop.f32.mrb[4].mxu1 }
 0x28d   : > { %v780_v12 = vpack.c.bf16 %v774_v11, %v774_v11  ;;  %v1618_v13 = vpop.f32.mrb[5].mxu1 }
 0x28e   : > { %v777_v14 = vpop.f32.mrb[6].mxu1 }
 0x28f   : > { %901 = vrot.lane.b32.xlu0 %v780_v12, %s2379_s25  ;;  %v1619_v15 = vpop.f32.mrb[7].mxu1  ;;  %v790_v16 = vsel %vm785_vm2, %v780_v12, 0 }
 0x290   : > { %1621 = vmatpush3.bf16.xpose.msra.mxu0 %v790_v16 }
 0x291   : > { %1632 = vmatprep.subr.bf16.mxu0 %v2377_v0 }
 0x293   : > { %899 = vrot.lane.b32.xlu0 %v720_v17, %s2379_s25  ;;  %s2256_s25 = scalar_lea.vmem %s2255_s1, 128 }
 0x294   : > { %p2258_p8 = scmp.lt.s32.totalorder %s2256_s25, %s2250_s7 }
 0x296   : > { %p2259_p3 = por %p2258_p8, %p2257_p9 }
 0x297   : > { %1623 = vmatmul.mubr.msk.bf16.vlgmr.msra.gmra.mrb[0].mxu0 %vm785_vm2, %v720_v17  ;;  %v1864_v17 = vld [vmem:[#allocation15] sm:$0xff]  }
 0x298   : > { %1634 = vmatprep.mubr.msk.bf16.mxu0 %vm2378_vm0, %v2377_v0  ;;  %p2260_p12 = pnand %p2259_p3, %p2253_p1 }
 0x301   : > { %v902_v18 = vpop.permute.xlu0 %901 }
 0x302   : > { %v907_v19 = vsel %vm785_vm2, %v902_v18, 0  ;;  %v1866_v18 = vld [vmem:[#allocation18] sm:$0xff]  }
 0x303   : > { %1633 = vmatpush3.bf16.xpose.msra.mxu0 %v907_v19  ;;  %v1867_v19 = vld [vmem:[#allocation18 + $0x8] sm:$0xff]  }
 0x304   : > { %1644 = vmatprep.subr.bf16.mxu0 %v2377_v0 }
 0x305   : > { %v900_v20 = vpop.permute.xlu0 %899 }
 0x30a   : > { %1635 = vmatmul.mubr.msk.bf16.vlgmr.msra.gmra.mrb[4].mxu0 %vm785_vm2, %v900_v20 }
 0x30b   : > { %1648 = vmatprep.mubr.msk.bf16.mxu0 %vm2378_vm0, %v2377_v0  ;;  %1645 = vmatpush3.bf16.msra.mxu0 %v1862_v58  ;;  %v1573_v58 = vld [vmem:[#allocation23] ss:$0 sm:$0xff] }
 0x30c   : > { %1646 = vmatprep.subr.bf16.mxu0 %v2377_v0 }
 0x30f   : > { %1647 = vmatpush3.bf16.msra.mxu0 %v1863_v59 }
 0x310   : > { %1660 = vmatprep.subr.bf16.mxu0 %v2377_v0 }
 0x36a   : > { %v826_v21 = vpop.f32.mrb[0].mxu0 }
 0x36b   : > { %v1624_v22 = vpop.f32.mrb[1].mxu0  ;;  %v833_v23 = vsel %vm832_vm3, %v826_v21, -inf }
 0x36c   : > { %834 = vmax.xlane.f32.xlu1 %v833_v23  ;;  %v829_v24 = vpop.f32.mrb[2].mxu0 }
 0x36d   : > { %v1625_v25 = vpop.f32.mrb[3].mxu0  ;;  %v1560_v24 = vld [vmem:[#allocation12] ss:$0 sm:$0xff] }
 0x3dd   : > { %v943_v26 = vpop.f32.mrb[4].mxu0 }
 0x3de   : > { %v1636_v27 = vpop.f32.mrb[5].mxu0  ;;  %v949_v28 = vsel %vm832_vm3, %v943_v26, -inf }
 0x3df   : > { %950 = vmax.xlane.f32.xlu1 %v949_v28  ;;  %v946_v29 = vpop.f32.mrb[6].mxu0 }
 0x3e0   : > { %v1637_v30 = vpop.f32.mrb[7].mxu0 }
 0x3e1   : > { %v1868_v30 = vld [vmem:[#allocation18 + $0x10] sm:$0xff]  }
 0x3f0   : > { %846 = vrot.lane.b32.xlu1 %v780_v12, %s2380_s14 }
 0x3f9   : > { %v835_v31 = vpop.xlane.xlu1 %834 }
 0x3fa   : > { %v836_v32 = vsub.f32 %v826_v21, %v835_v31  ;;  %v1869_v31 = vld [vmem:[#allocation18 + $0x18] sm:$0xff]  }
 0x3fc   : > { %v837_v33 = vmul.f32 1.442695, %v836_v32  ;;  %v1562_v32 = vld [vmem:[#allocation17] ss:$0 sm:$0xff] }
 0x3fe   : > { %1870 = vpow2.f32 %v837_v33 }
 0x408   : > { %v1871_v34 = vpop.eup %1870 }
 0x409   : > { %v839_v35 = vsel %vm832_vm3, %v1871_v34, 0.0 }
 0x40a   : > { %840 = vadd.xlane.f32.xlu0 %v839_v35 }
 0x46c   : > { %v951_v36 = vpop.xlane.xlu1 %950 }
 0x46d   : > { %v952_v37 = vsub.f32 %v943_v26, %v951_v36  ;;  %v1561_v26 = vld [vmem:[#allocation14] ss:$0 sm:$0xff] }
 0x46f   : > { %v953_v38 = vmul.f32 1.442695, %v952_v37 }
 0x470   : > { %v847_v39 = vpop.permute.xlu1 %846 }
 0x471   : > { %1872 = vpow2.f32 %v953_v38  ;;  %v853_v40 = vsel %vm851_vm4, %v847_v39, 0 }
 0x472   : > { %1627 = vmatpush3.bf16.msra.mxu1 %v853_v40  ;;  %v1566_v40 = vld [vmem:[#allocation20] ss:$0 sm:$0xff] }
 0x473   : > { %1638 = vmatprep.subr.bf16.mxu1 %v2377_v0 }
 0x47b   : > { %v1873_v41 = vpop.eup %1872 }
 0x47c   : > { %v955_v42 = vsel %vm832_vm3, %v1873_v41, 0.0 }
 0x47d   : > { %956 = vadd.xlane.f32.xlu1 %v955_v42 }
 0x48e   : > { %961 = vrot.lane.b32.xlu1 %v780_v12, %s2381_s28 }
 0x497   : > { %v841_v43 = vpop.xlane.xlu0 %840 }
 0x498   : > { %1874 = vrcp.f32 %v841_v43 }
 0x4a2   : > { %v1875_v44 = vpop.eup %1874 }
 0x4a3   : > { %v843_v45 = vmul.f32 %v1875_v44, %v1871_v34 }
 0x4a5   : > { %v844_v46 = vpack.c.bf16 %v843_v45, %v843_v45 }
 0x4a7   : > { %1629 = vmatmul.mubr.msk.bf16.vlgmr.msra.gmra.mrb[8].mxu1 %vm832_vm3, %v844_v46 }
 0x4a8   : > { %1640 = vmatprep.mubr.msk.bf16.mxu1 %vm2378_vm0, %v2377_v0 }
 0x50a   : > { %v957_v47 = vpop.xlane.xlu1 %956 }
 0x50b   : > { %1876 = vrcp.f32 %v957_v47 }
 0x50e   : > { %v962_v48 = vpop.permute.xlu1 %961 }
 0x50f   : > { %v967_v49 = vsel %vm851_vm4, %v962_v48, 0 }
 0x510   : > { %1639 = vmatpush3.bf16.msra.mxu1 %v967_v49 }
 0x511   : > { %1652 = vmatprep.subr.bf16.mxu1 %v2377_v0 }
 0x515   : > { %v1877_v50 = vpop.eup %1876 }
 0x516   : > { %v959_v51 = vmul.f32 %v1877_v50, %v1873_v41 }
 0x518   : > { %v960_v52 = vpack.c.bf16 %v959_v51, %v959_v51 }
 0x51a   : > { %1641 = vmatmul.mubr.msk.bf16.vlgmr.msra.gmra.mrb[12].mxu1 %vm832_vm3, %v960_v52 }
 0x51b   : > { %1656 = vmatprep.mubr.msk.bf16.mxu1 %vm2378_vm0, %v2377_v0  ;;  %1653 = vmatpush3.bf16.msra.mxu1 %v1864_v17 }
 0x51c   : > { %1654 = vmatprep.subr.bf16.mxu1 %v2377_v0 }
 0x51f   : > { %1655 = vmatpush3.bf16.msra.mxu1 %v1865_v3 }
 0x57a   : > { %v889_v53 = vpop.f32.mrb[8].mxu1 }
 0x57b   : > { %v895_v54 = vpack.c.bf16 %v889_v53, %v889_v53  ;;  %v1630_v55 = vpop.f32.mrb[9].mxu1 }
 0x57c   : > { %v892_v56 = vpop.f32.mrb[10].mxu1 }
 0x57d   : > { %897 = vst.msk [vmem:[#allocation2] sm:$0xf] %vm896_vm5, %v895_v54  ;;  %v1631_v57 = vpop.f32.mrb[11].mxu1  ;;  %v1572_v56 = vld [vmem:[#allocation21] ss:$0 sm:$0xff] }
 0x5ed   : > { %v1003_v60 = vpop.f32.mrb[12].mxu1 }
 0x5ee   : > { %v1578_v61 = vpack.c.bf16 %v1003_v60, %v1003_v60  ;;  %v1642_v62 = vpop.f32.mrb[13].mxu1 }
 0x5ef   : > { %v1006_v63 = vpop.f32.mrb[14].mxu1 }
 0x5f0   : > { %1013 = vrot.lane.b32.xlu1 %v1578_v61, %s2382_s8  ;;  %v1643_v1 = vpop.f32.mrb[15].mxu1 }
 0x662   : > { %v1014_v2 = vpop.permute.xlu1 %1013 }
 0x663   : > { %1017 = vst.msk [vmem:[#allocation2] sm:$0xf] %vm1016_vm6, %v1014_v2 }
 0x66a   : > { %v1018_v4 = vld [vmem:[#allocation2] sm:$0xf] }
 0x66b   : > { %1649 = vmatmul.mubr.msk.bf16.vlgmr.msra.gmra.mrb[8].mxu0 %vm676_vm1, %v1018_v4 }
 0x66c   : > { %1668 = vmatprep.mubr.msk.bf16.mxu0 %vm2378_vm0, %v2377_v0  ;;  %1661 = vmatpush3.bf16.msra.mxu0 %v1866_v18 }
 0x66d   : > { %1662 = vmatprep.subr.bf16.mxu0 %v2377_v0 }
 0x670   : > { %1663 = vmatpush3.bf16.msra.mxu0 %v1867_v19 }
 0x671   : > { %1664 = vmatprep.subr.bf16.mxu0 %v2377_v0 }
 0x674   : > { %1665 = vmatpush3.bf16.msra.mxu0 %v1868_v30 }
 0x675   : > { %1666 = vmatprep.subr.bf16.mxu0 %v2377_v0 }
 0x678   : > { %1667 = vmatpush3.bf16.msra.mxu0 %v1869_v31 }
 0x73e   : > { %v1069_v6 = vpop.f32.mrb[8].mxu0 }
 0x73f   : > { %v1070_v7 = vadd.f32 %v1069_v6, %v1019_v5  ;;  %v1650_v8 = vpop.f32.mrb[9].mxu0 }
 0x740   : > { %v1072_v9 = vpop.f32.mrb[10].mxu0 }
 0x741   : > { %v1651_v10 = vpop.f32.mrb[11].mxu0  ;;  %v1077_v11 = vsel %vm676_vm1, %v1070_v7, 0.0 }
 0x742   : > { %1078 = vadd.xlane.f32.xlu1 %v1077_v11 }
 0x7cf   : > { %v1079_v12 = vpop.xlane.xlu1 %1078 }
 0x7d0   : > { %v1081_v13 = vmul.f32 0.03125, %v1079_v12 }
 0x7d2   : > { %v1082_v14 = vsub.f32 %v1070_v7, %v1081_v13 }
 0x7d4   : > { %v1083_v15 = vmul.f32 %v1082_v14, %v1082_v14 }
 0x7d6   : > { %v1084_v16 = vsel %vm676_vm1, %v1083_v15, 0.0 }
 0x7d7   : > { %1085 = vadd.xlane.f32.xlu0 %v1084_v16 }
 0x864   : > { %v1086_v20 = vpop.xlane.xlu0 %1085 }
 0x865   : > { %v1087_v21 = vmul.f32 0.03125, %v1086_v20 }
 0x867   : > { %v1088_v22 = vadd.f32 1e-05, %v1087_v21 }
 0x869   : > { %1878 = vrsqrt.f32 %v1088_v22 }
 0x873   : > { %v1879_v23 = vpop.eup %1878 }
 0x874   : > { %v1090_v25 = vmul.f32 %v1879_v23, %v1082_v14 }
 0x876   : > { %v1097_v27 = vmul.f32 %v1560_v24, %v1090_v25 }
 0x878   : > { %v1104_v28 = vadd.f32 %v1561_v26, %v1097_v27 }
 0x87a   : > { %v1119_v29 = vpack.c.bf16 %v1104_v28, %v1104_v28 }
 0x87c   : > { %1657 = vmatmul.mubr.msk.bf16.vlgmr.msra.gmra.mrb[16].mxu1 %vm676_vm1, %v1119_v29 }
 0x94f   : > { %v1175_v33 = vpop.f32.mrb[16].mxu1 }
 0x950   : > { %v1176_v34 = vadd.f32 %v1562_v32, %v1175_v33  ;;  %v1658_v35 = vpop.f32.mrb[17].mxu1 }
 0x951   : > { %v1178_v36 = vpop.f32.mrb[18].mxu1 }
 0x952   : > { %v1181_v37 = vmax.f32 %v1176_v34, 0.0  ;;  %v1659_v38 = vpop.f32.mrb[19].mxu1 }
 0x954   : > { %v1182_v39 = vpack.c.bf16 %v1181_v37, %v1181_v37 }
 0x956   : > { %1669 = vmatmul.mubr.msk.bf16.vlgmr.msra.gmra.mrb[12].mxu0 %vm1213_vm7, %v1182_v39 }
 0xa29   : > { %v1251_v41 = vpop.f32.mrb[12].mxu0 }
 0xa2a   : > { %v1252_v42 = vadd.f32 %v1566_v40, %v1251_v41  ;;  %v1670_v43 = vpop.f32.mrb[13].mxu0 }
 0xa2b   : > { %v1254_v44 = vpop.f32.mrb[14].mxu0 }
 0xa2c   : > { %v1671_v45 = vpop.f32.mrb[15].mxu0  ;;  %v1257_v46 = vadd.f32 %v1252_v42, %v1104_v28 }
 0xa2e   : > { %v1260_v0 = vsel %vm676_vm1, %v1257_v46, 0.0 }
 0xa2f   : > { %1261 = vadd.xlane.f32.xlu0 %v1260_v0 }
 0xabc   : > { %v1262_v47 = vpop.xlane.xlu0 %1261 }
 0xabd   : > { %v1263_v48 = vmul.f32 0.03125, %v1262_v47 }
 0xabf   : > { %v1264_v49 = vsub.f32 %v1257_v46, %v1263_v48 }
 0xac1   : > { %v1265_v50 = vmul.f32 %v1264_v49, %v1264_v49 }
 0xac3   : > { %v1266_v51 = vsel %vm676_vm1, %v1265_v50, 0.0 }
 0xac4   : > { %1267 = vadd.xlane.f32.xlu0 %v1266_v51 }
 0xb51   : > { %v1268_v52 = vpop.xlane.xlu0 %1267 }
 0xb52   : > { %v1269_v53 = vmul.f32 0.03125, %v1268_v52 }
 0xb54   : > { %v1270_v54 = vadd.f32 1e-05, %v1269_v53 }
 0xb56   : > { %1880 = vrsqrt.f32 %v1270_v54 }
 0xb60   : > { %v1881_v55 = vpop.eup %1880 }
 0xb61   : > { %v1272_v57 = vmul.f32 %v1881_v55, %v1264_v49 }
 0xb63   : > { %v1279_v59 = vmul.f32 %v1572_v56, %v1272_v57 }
 0xb65   : > { %v1286_v60 = vadd.f32 %v1573_v58, %v1279_v59 }
 0xb67   : > { %v1287_v61 = vpack.c.bf16 %v1286_v60, %v1286_v60 }
 0xb69   : > { %1289 = vst.msk [vmem:[%s656_s15] sm:$0xf] %vm1288_vm8, %v1287_v61 }
 0xb6a   : > { %2263 = shalt.err (!%p2260_p12)
}
 0xb6b   : > { %s2264_s6 = scalar_lea.hbm %s2954_s18, 64  ;;  %s2268_s8 = scalar_lea.hbm %s3082_s0, 128 }
 0xb6c   : > { %p2265_p13 = scmp.ne.s32.totalorder %s2954_s18, %s2264_s6  ;;  %p2269_p5 = scmp.lt.u32.totalorder %s2954_s18, %s3082_s0 }
 0xb6d   : > { %p2270_p2 = scmp.lt.u32.totalorder %s2268_s8, %s2264_s6  ;;  %p2272_p11 = scmp.lt.u32.totalorder %s2264_s6, %s2954_s18 }
 0xb6e   : > { %p2266_p0 = pnand %p2265_p13, %p3083_p6 }
 0xb6f   : > { %p2271_p4 = por %p2270_p2, %p2269_p5 }
 0xb70   : > { %p2267_p7 = pneg %p2266_p0 }
 0xb71   : > { %p2273_p10 = por %p2272_p11, %p2271_p4 }
 0xb73   : > { %p2274_p1 = pnand %p2273_p10, %p2267_p7 }
 0xb75   : > { %2277 = shalt.err (!%p2274_p1)
}
 0xb76   : > { %1720 = dma.vmem_to_hbm [thread:$0]  (%p3083_p6), %s2956_s24, 64, %s2954_s18, %s1291_s21  }
 0xb77 PF: > { %s3084_s15 = sld [smem:[#allocation34_spill]]  ;;  %p3085_p9 = scmp.ne.s32.totalorder %s3061_s20, 0 }
 0xb78   : > { %p3086_p8 = scmp.ge.s32.totalorder %s2360_s30, 2 }
 0xb7a   : > { %p1764_p3 = pnand %p3086_p8, %p3085_p9 }
 0xb7d   : > { %s1317_s16 = sand.u32 1, %s3084_s15  }
 0xb7e   : > { %s1318_s3 = scalar_lea.sflag [#allocation5], %s1317_s16 }
 0xb7f   : > { %2335 = dma.done.wait (!%p1764_p3), %s1318_s3, 64  }
 0xb80   : > { %2337 = vsyncadd (!%p1764_p3), %s1318_s3, 4294967232  ;;  %s37_s30 = sadd.s32 1, %s2360_s30   ;;  %s3087_s25 = smov %s2344_s26 }
 0xb81   : > { %p34_p12 = scmp.ge.s32.totalorder %s37_s30, 4   ;;  %s3088_s26 = smov %s2348_s27 }
 0xb82   : > { %s3089_s27 = smov %s2768_s17  ;;  %s3090_s28 = smov %s2356_s29 }
 0xb83   : > { %s3091_s29 = smov %s3093_s23  ;;  %36 = sbr.rel (!%p34_p12) target bundleno = 24 (0x18), region = 174 }
 0xb8a   :  { %1323 = vsyncpa [#allocation4], 1 }
 0xb8b   :  { %1325 = vsyncpa [#allocation4 + $0x1], 1 }
 0xb8c   :  { %1326 = vsyncpa [#allocation7], 1 }
 0xb8d   :  { %1328 = vsyncpa [#allocation7 + $0x1], 1 }
 0xb8e   :  { %1329 = vsyncpa [#allocation10], 1 }
 0xb8f   :  { %1330 = vsyncpa [#allocation13], 1 }
 0xb90   :  { %1331 = vsyncpa [#allocation16], 1 }
 0xb91   :  { %1332 = vsyncpa [#allocation19], 1 }
 0xb92   :  { %1333 = vsyncpa [#allocation22], 1 }
 0xb93   :  { %1334 = vsyncpa [#allocation5], 1 }
 0xb94   :  { %1336 = vsyncpa [#allocation5 + $0x1], 1 }

// kernel: transformer_forward.7
= control target key start
LH: loop header
LB: loop body
LE: loop exit
PB: predicated region body
PF: predicated region fallthrough
CT: control target
= control target key end

     0   :  { %s4367_s0 = inlined_call_operand.hbm [shape: bf16[2,8,32], index: 0, kind: input, shape index: {}, may-alias: {0,1}]   ;;  %s4368_s1 = inlined_call_operand.hbm [shape: bf16[2,8,32], index: 1, kind: input, shape index: {}, may-alias: {0,1}]   ;;  %s4369_s2 = inlined_call_operand.hbm [shape: bf16[2,8,32], index: 2, kind: input, shape index: {}]   ;;  %s4370_s3 = inlined_call_operand.hbm [shape: bf16[32,32], index: 3, kind: input, shape index: {}]   ;;  %s4371_s4 = inlined_call_operand.hbm [shape: bf16[32,64], index: 4, kind: input, shape index: {}]   ;;  %s4372_s5 = inlined_call_operand.hbm [shape: bf16[32,32], index: 5, kind: input, shape index: {}]   ;;  %s4373_s6 = inlined_call_operand.hbm [shape: f32[1,32], index: 6, kind: input, shape index: {}]   ;;  %s4374_s7 = inlined_call_operand.hbm [shape: f32[1,32], index: 7, kind: input, shape index: {}]   ;;  %s4375_s8 = inlined_call_operand.hbm [shape: bf16[32,32], index: 8, kind: input, shape index: {}]   ;;  %s4376_s9 = inlined_call_operand.hbm [shape: bf16[32,64], index: 9, kind: input, shape index: {}]   ;;  %s4377_s10 = inlined_call_operand.hbm [shape: bf16[32,32], index: 10, kind: input, shape index: {}]   ;;  %s4378_s11 = inlined_call_operand.hbm [shape: f32[1,32], index: 11, kind: input, shape index: {}]   ;;  %s4379_s12 = inlined_call_operand.hbm [shape: f32[1,32], index: 12, kind: input, shape index: {}]   ;;  %s4380_s13 = inlined_call_operand.hbm [shape: bf16[32,64], index: 13, kind: input, shape index: {}]   ;;  %s4381_s14 = inlined_call_operand.hbm [shape: f32[1,64], index: 14, kind: input, shape index: {}]   ;;  %s4382_s15 = inlined_call_operand.hbm [shape: bf16[64,32], index: 15, kind: input, shape index: {}]   ;;  %s4383_s16 = inlined_call_operand.hbm [shape: f32[1,32], index: 16, kind: input, shape index: {}]   ;;  %s4384_s17 = inlined_call_operand.hbm [shape: f32[1,32], index: 17, kind: input, shape index: {}]   ;;  %s4385_s18 = inlined_call_operand.hbm [shape: f32[1,32], index: 18, kind: input, shape index: {}]   ;;  %s4386_s19 = inlined_call_operand.hbm [shape: bf16[2,8,32], index: 19, kind: output, shape index: {}]  }
   0x1   :  { %4426 = sst [smem:[#allocation51_spill]] %s4367_s0 }
   0x2   :  { %4427 = sst [smem:[#allocation52_spill]] %s4368_s1 }
   0x3   :  { %4428 = sst [smem:[#allocation53_spill]] %s4369_s2 }
   0x4   :  { %4429 = sst [smem:[#allocation54_spill]] %s4370_s3 }
   0x5   :  { %4430 = sst [smem:[#allocation55_spill]] %s4371_s4 }
   0x6   :  { %4431 = sst [smem:[#allocation56_spill]] %s4372_s5 }
   0x7   :  { %4432 = sst [smem:[#allocation57_spill]] %s4373_s6 }
   0x8   :  { %4433 = sst [smem:[#allocation58_spill]] %s4374_s7 }
   0x9   :  { %4434 = sst [smem:[#allocation59_spill]] %s4375_s8 }
   0xa   :  { %4435 = sst [smem:[#allocation60_spill]] %s4376_s9 }
   0xb   :  { %4436 = sst [smem:[#allocation61_spill]] %s4377_s10 }
   0xc   :  { %4437 = sst [smem:[#allocation62_spill]] %s4378_s11 }
   0xd   :  { %4438 = sst [smem:[#allocation63_spill]] %s4379_s12 }
   0xe   :  { %4439 = sst [smem:[#allocation64_spill]] %s4380_s13 }
   0xf   :  { %4440 = sst [smem:[#allocation65_spill]] %s4381_s14 }
  0x10   :  { %4441 = sst [smem:[#allocation66_spill]] %s4382_s15 }
  0x11   :  { %4442 = sst [smem:[#allocation67_spill]] %s4383_s16 }
  0x12   :  { %4443 = sst [smem:[#allocation68_spill]] %s4384_s17 }
  0x13   :  { %4444 = sst [smem:[#allocation69_spill]] %s4385_s18 }
  0x14   :  { %4445 = sst [smem:[#allocation70_spill]] %s4386_s19 }
  0x15   :  { %24 = vsyncpa [#allocation4], 0 }
  0x16   :  { %26 = vsyncpa [#allocation4 + $0x1], 0 }
  0x17   :  { %27 = vsyncpa [#allocation7], 0 }
  0x18   :  { %29 = vsyncpa [#allocation7 + $0x1], 0 }
  0x19   :  { %30 = vsyncpa [#allocation10], 0 }
  0x1a   :  { %31 = vsyncpa [#allocation13], 0 }
  0x1b   :  { %32 = vsyncpa [#allocation16], 0 }
  0x1c   :  { %33 = vsyncpa [#allocation19], 0 }
  0x1d   :  { %34 = vsyncpa [#allocation22], 0 }
  0x1e   :  { %35 = vsyncpa [#allocation25], 0 }
  0x1f   :  { %36 = vsyncpa [#allocation28], 0 }
  0x20   :  { %37 = vsyncpa [#allocation31], 0 }
  0x21   :  { %38 = vsyncpa [#allocation5], 0 }
  0x22   :  { %40 = vsyncpa [#allocation5 + $0x1], 0  ;;  %s3606_s0 = smov 0   ;;  %s3608_s30 = smov 0  }
  0x23   :  { %s3610_s20 = smov 0   ;;  %s3612_s21 = smov 0  }
  0x24   :  { %s3614_s1 = smov 0   ;;  %s3616_s22 = smov 0  }
  0x25 LB: > { %4446 = sst [smem:[#allocation45_spill]] %s3468_s21  ;;  %s3637_s2 = sadd.s32 4294967295, %s3476_s22   ;;  %s3476_s22 = sphi %s3616_s22, %s46_s22   ;;  %s3472_s1 = sphi %s3614_s1, %s4520_s1   ;;  %s3468_s21 = sphi %s3612_s21, %s4519_s21   ;;  %s3464_s20 = sphi %s3610_s20, %s4523_s20   ;;  %s3460_s30 = sphi %s3608_s30, %s4522_s30   ;;  %s3456_s0 = sphi %s3606_s0, %s4521_s0  }
  0x26   : > { %4447 = sst [smem:[#allocation46_spill]] %s3472_s1  ;;  %p2286_p0 = scmp.ge.s32.totalorder %s3476_s22, 1 }
  0x27   : > { %4448 = sst [smem:[#allocation47_spill]] %s3476_s22  ;;  %p4400_p1 = scmp.eq.s32.totalorder %s3637_s2, 0 }
  0x28   : > { %p507_p2 = scmp.lt.s32.totalorder %s3476_s22, 3  ;;  %s3478_s24 = smov [#allocation9]  }
  0x29   : > { %s519_s25 = sshll.u32 %s3478_s24, 4  ;;  %s3479_s26 = smov [#allocation12]   ;;  %s3646_s25 = int_to_ptr.vmem [resolvable:$true] %s519_s25 }
  0x2a   : > { %p3642_p3 = pnand %p2286_p0, %p507_p2  ;;  %s545_s27 = sshll.u32 %s3479_s26, 4  ;;  %s3657_s27 = int_to_ptr.vmem [resolvable:$true] %s545_s27 }
  0x2b   : > { %s3480_s28 = smov [#allocation15]   ;;  %s4452_s21 = sld [smem:[#allocation54_spill]] }
  0x2c   : > { %s4449_s23 = scalar_select %p3642_p3, 1, 0 }
  0x2d   : > { %p2611_p4 = pneg %p3642_p3  ;;  %s3659_s29 = sshll.u32 %s3480_s28, 4  ;;  %s571_s29 = int_to_ptr.vmem [resolvable:$true] %s3659_s29 }
  0x2e   : > { %4450 = sst [smem:[#allocation48_spill]] %s4449_s23 }
  0x2f   : > { %p3653_p6 = pnand %p2611_p4, %p4400_p1 }
  0x31   : > { %s4451_s3 = scalar_select %p3653_p6, 1, 0 }
  0x32   : > { %s4453_s18 = smov %s4452_s21  ;;  %s2820_s16 = scalar_lea.hbm %s4452_s21, 256 }
  0x33   : > { %p2821_p7 = scmp.ne.s32.totalorder %s4453_s18, %s2820_s16  ;;  %p3669_p8 = pneg %p3653_p6 }
  0x34   : > { %p2827_p11 = scmp.lt.u32.totalorder %s2820_s16, %s4453_s18 }
  0x35   : > { %s4454_s12 = scalar_select %p3669_p8, 1, 0 }
  0x36   : > { %p2823_p9 = pnand %p3669_p8, %p2821_p7 }
  0x38   : > { %p2824_p10 = pneg %p2823_p9 }
  0x3a   : > { %p2829_p12 = pnand %p2827_p11, %p2824_p10 }
  0x3c   : > { %2832 = shalt.err (!%p2829_p12)
}
  0x3d   : > { %s2833_s14 = scalar_lea.vmem %s3646_s25, 256  ;;  %p2841_p4 = scmp.lt.s32.totalorder %s3646_s25, %s3646_s25 }
  0x3e   : > { %p2834_p13 = scmp.ne.s32.totalorder %s3646_s25, %s2833_s14  ;;  %p2842_p5 = scmp.lt.s32.totalorder %s2833_s14, %s2833_s14 }
  0x40   : > { %p2836_p0 = pnand %p2834_p13, %p3669_p8  ;;  %p2843_p7 = por %p2842_p5, %p2841_p4 }
  0x42   : > { %p2837_p2 = pneg %p2836_p0 }
  0x44   : > { %p2844_p9 = pnand %p2843_p7, %p2837_p2 }
  0x46   : > { %2847 = shalt.err (!%p2844_p9)
}
  0x47   : > { %s4402_s19 = smov 64   ;;  %s4404_s16 = smov 4  }
  0x48   : > { %2614 = dma.hbm_to_vmem [thread:$0]  (!%p3653_p6), %s4453_s18, 256, %s3646_s25, [#allocation10], %s4402_s19, %s4402_s19, %s4404_s16  }
  0x49   : > { %s4455_s5 = sld [smem:[#allocation56_spill]] }
  0x4f   : > { %s2848_s28 = scalar_lea.hbm %s4455_s5, 256 }
  0x50   : > { %p2849_p5 = scmp.ne.s32.totalorder %s4455_s5, %s2848_s28  ;;  %p2855_p12 = scmp.lt.u32.totalorder %s2848_s28, %s4455_s5 }
  0x52   : > { %p2851_p10 = pnand %p2849_p5, %p3669_p8 }
  0x54   : > { %p2852_p11 = pneg %p2851_p10 }
  0x56   : > { %p2857_p13 = pnand %p2855_p12, %p2852_p11 }
  0x58   : > { %2860 = shalt.err (!%p2857_p13)
}
  0x59   : > { %s2861_s25 = scalar_lea.vmem %s3657_s27, 256  ;;  %p2869_p7 = scmp.lt.s32.totalorder %s3657_s27, %s3657_s27 }
  0x5a   : > { %p2862_p0 = scmp.ne.s32.totalorder %s3657_s27, %s2861_s25  ;;  %p2870_p9 = scmp.lt.s32.totalorder %s2861_s25, %s2861_s25 }
  0x5c   : > { %p2864_p2 = pnand %p2862_p0, %p3669_p8  ;;  %p2871_p5 = por %p2870_p9, %p2869_p7 }
  0x5e   : > { %p2865_p4 = pneg %p2864_p2 }
  0x60   : > { %p2872_p10 = pnand %p2871_p5, %p2865_p4 }
  0x62   : > { %2875 = shalt.err (!%p2872_p10)
}
  0x63   : > { %2620 = dma.hbm_to_vmem [thread:$0]  (!%p3653_p6), %s4455_s5, 256, %s3657_s27, [#allocation13], %s4402_s19, %s4402_s19, %s4404_s16  }
  0x64   : > { %s4456_s7 = sld [smem:[#allocation58_spill]] }
  0x6a   : > { %s2876_s23 = scalar_lea.hbm %s4456_s7, 16 }
  0x6b   : > { %p2877_p11 = scmp.ne.s32.totalorder %s4456_s7, %s2876_s23  ;;  %p2883_p0 = scmp.lt.u32.totalorder %s2876_s23, %s4456_s7 }
  0x6d   : > { %p2879_p12 = pnand %p2877_p11, %p3669_p8 }
  0x6f   : > { %p2880_p13 = pneg %p2879_p12 }
  0x71   : > { %p2885_p2 = pnand %p2883_p0, %p2880_p13 }
  0x73   : > { %2888 = shalt.err (!%p2885_p2)
}
  0x74   : > { %s2889_s25 = scalar_lea.vmem %s571_s29, 16  ;;  %s2896_s27 = scalar_lea.vmem %s571_s29, 32 }
  0x75   : > { %p2890_p4 = scmp.ne.s32.totalorder %s571_s29, %s2889_s25  ;;  %p2897_p5 = scmp.lt.s32.totalorder %s571_s29, %s571_s29 }
  0x76   : > { %p2898_p10 = scmp.lt.s32.totalorder %s2896_s27, %s2889_s25 }
  0x77   : > { %p2892_p7 = pnand %p2890_p4, %p3669_p8 }
  0x78   : > { %p2899_p1 = por %p2898_p10, %p2897_p5 }
  0x79   : > { %p2893_p9 = pneg %p2892_p7 }
  0x7b   : > { %p2900_p3 = pnand %p2899_p1, %p2893_p9 }
  0x7d   : > { %2903 = shalt.err (!%p2900_p3)
}
  0x7e   : > { %2626 = dma.hbm_to_vmem [thread:$0]  (!%p3653_p6), %s4456_s7, 16, %s571_s29, [#allocation16]  }
  0x7f   : > { %s3483_s10 = smov [#allocation18]   ;;  %s3484_s23 = smov [#allocation21]  }
  0x80   : > { %s593_s21 = sshll.u32 %s3483_s10, 4  ;;  %s620_s24 = sshll.u32 %s3484_s23, 4  ;;  %s594_s21 = int_to_ptr.vmem [resolvable:$true] %s593_s21  ;;  %s621_s24 = int_to_ptr.vmem [resolvable:$true] %s620_s24 }
  0x81   : > { %s4457_s9 = sld [smem:[#allocation60_spill]] }
  0x87   : > { %s2904_s14 = scalar_lea.hbm %s4457_s9, 256 }
  0x88   : > { %p2905_p1 = scmp.ne.s32.totalorder %s4457_s9, %s2904_s14  ;;  %p2911_p12 = scmp.lt.u32.totalorder %s2904_s14, %s4457_s9 }
  0x8a   : > { %p2907_p3 = pnand %p2905_p1, %p3669_p8 }
  0x8c   : > { %p2908_p11 = pneg %p2907_p3 }
  0x8e   : > { %p2913_p13 = pnand %p2911_p12, %p2908_p11 }
  0x90   : > { %2916 = shalt.err (!%p2913_p13)
}
  0x91   : > { %s2917_s29 = scalar_lea.vmem %s594_s21, 256  ;;  %p2925_p7 = scmp.lt.s32.totalorder %s594_s21, %s594_s21 }
  0x92   : > { %p2918_p0 = scmp.ne.s32.totalorder %s594_s21, %s2917_s29  ;;  %p2926_p9 = scmp.lt.s32.totalorder %s2917_s29, %s2917_s29 }
  0x94   : > { %p2920_p2 = pnand %p2918_p0, %p3669_p8  ;;  %p2927_p5 = por %p2926_p9, %p2925_p7 }
  0x96   : > { %p2921_p4 = pneg %p2920_p2 }
  0x98   : > { %p2928_p10 = pnand %p2927_p5, %p2921_p4 }
  0x9a   : > { %2931 = shalt.err (!%p2928_p10)
}
  0x9b   : > { %s4458_s8 = smov 64   ;;  %s4459_s11 = sld [smem:[#allocation62_spill]] }
  0x9c   : > { %2632 = dma.hbm_to_vmem [thread:$0]  (!%p3653_p6), %s4457_s9, 256, %s594_s21, [#allocation19], %s4458_s8, %s4458_s8, %s4404_s16  }
  0xa1   : > { %s2932_s28 = scalar_lea.hbm %s4459_s11, 16 }
  0xa2   : > { %p2933_p1 = scmp.ne.s32.totalorder %s4459_s11, %s2932_s28  ;;  %p2939_p12 = scmp.lt.u32.totalorder %s2932_s28, %s4459_s11 }
  0xa4   : > { %p2935_p3 = pnand %p2933_p1, %p3669_p8 }
  0xa6   : > { %p2936_p11 = pneg %p2935_p3 }
  0xa8   : > { %p2941_p13 = pnand %p2939_p12, %p2936_p11 }
  0xaa   : > { %2944 = shalt.err (!%p2941_p13)
}
  0xab   : > { %s2945_s29 = scalar_lea.vmem %s621_s24, 16  ;;  %s2952_s21 = scalar_lea.vmem %s621_s24, 32 }
  0xac   : > { %p2946_p0 = scmp.ne.s32.totalorder %s621_s24, %s2945_s29  ;;  %p2953_p7 = scmp.lt.s32.totalorder %s621_s24, %s621_s24 }
  0xad   : > { %p2954_p9 = scmp.lt.s32.totalorder %s2952_s21, %s2945_s29 }
  0xae   : > { %p2948_p2 = pnand %p2946_p0, %p3669_p8 }
  0xaf   : > { %p2955_p5 = por %p2954_p9, %p2953_p7 }
  0xb0   : > { %p2949_p4 = pneg %p2948_p2 }
  0xb2   : > { %p2956_p10 = pnand %p2955_p5, %p2949_p4 }
  0xb4   : > { %2959 = shalt.err (!%p2956_p10)
}
  0xb5   : > { %2638 = dma.hbm_to_vmem [thread:$0]  (!%p3653_p6), %s4459_s11, 16, %s621_s24, [#allocation22]  }
  0xb6   : > { %s3485_s23 = smov [#allocation24]   ;;  %s3486_s28 = smov [#allocation27]  }
  0xb7   : > { %s641_s26 = sshll.u32 %s3485_s23, 4  ;;  %s665_s14 = sshll.u32 %s3486_s28, 4  ;;  %s642_s26 = int_to_ptr.vmem [resolvable:$true] %s641_s26  ;;  %s666_s14 = int_to_ptr.vmem [resolvable:$true] %s665_s14 }
  0xb8   : > { %s4460_s13 = sld [smem:[#allocation64_spill]] }
  0xbe   : > { %s2960_s6 = scalar_lea.hbm %s4460_s13, 256 }
  0xbf   : > { %p2961_p1 = scmp.ne.s32.totalorder %s4460_s13, %s2960_s6  ;;  %p2967_p12 = scmp.lt.u32.totalorder %s2960_s6, %s4460_s13 }
  0xc1   : > { %p2963_p3 = pnand %p2961_p1, %p3669_p8 }
  0xc3   : > { %p2964_p11 = pneg %p2963_p3 }
  0xc5   : > { %p2969_p13 = pnand %p2967_p12, %p2964_p11 }
  0xc7   : > { %2972 = shalt.err (!%p2969_p13)
}
  0xc8   : > { %s2973_s24 = scalar_lea.vmem %s642_s26, 256  ;;  %p2981_p7 = scmp.lt.s32.totalorder %s642_s26, %s642_s26 }
  0xc9   : > { %p2974_p0 = scmp.ne.s32.totalorder %s642_s26, %s2973_s24  ;;  %p2982_p9 = scmp.lt.s32.totalorder %s2973_s24, %s2973_s24 }
  0xcb   : > { %p2976_p2 = pnand %p2974_p0, %p3669_p8  ;;  %p2983_p5 = por %p2982_p9, %p2981_p7 }
  0xcd   : > { %p2977_p4 = pneg %p2976_p2 }
  0xcf   : > { %p2984_p10 = pnand %p2983_p5, %p2977_p4 }
  0xd1   : > { %2987 = shalt.err (!%p2984_p10)
}
  0xd2   : > { %s4461_s10 = smov 4   ;;  %s4462_s15 = sld [smem:[#allocation66_spill]] }
  0xd3   : > { %2644 = dma.hbm_to_vmem [thread:$0]  (!%p3653_p6), %s4460_s13, 256, %s642_s26, [#allocation25], %s4458_s8, %s4458_s8, %s4461_s10  }
  0xd8   : > { %s2988_s27 = scalar_lea.hbm %s4462_s15, 512 }
  0xd9   : > { %p2989_p1 = scmp.ne.s32.totalorder %s4462_s15, %s2988_s27  ;;  %p2995_p12 = scmp.lt.u32.totalorder %s2988_s27, %s4462_s15 }
  0xdb   : > { %p2991_p3 = pnand %p2989_p1, %p3669_p8 }
  0xdd   : > { %p2992_p11 = pneg %p2991_p3 }
  0xdf   : > { %p2997_p13 = pnand %p2995_p12, %p2992_p11 }
  0xe1   : > { %3000 = shalt.err (!%p2997_p13)
}
  0xe2   : > { %s3001_s24 = scalar_lea.vmem %s666_s14, 512  ;;  %p3009_p7 = scmp.lt.s32.totalorder %s666_s14, %s666_s14 }
  0xe3   : > { %p3002_p0 = scmp.ne.s32.totalorder %s666_s14, %s3001_s24  ;;  %p3010_p9 = scmp.lt.s32.totalorder %s3001_s24, %s3001_s24 }
  0xe5   : > { %p3004_p2 = pnand %p3002_p0, %p3669_p8  ;;  %p3011_p5 = por %p3010_p9, %p3009_p7 }
  0xe7   : > { %p3005_p4 = pneg %p3004_p2 }
  0xe9   : > { %p3012_p10 = pnand %p3011_p5, %p3005_p4 }
  0xeb   : > { %3015 = shalt.err (!%p3012_p10)
}
  0xec   : > { %2650 = dma.hbm_to_vmem [thread:$0]  (!%p3653_p6), %s4462_s15, 512, %s666_s14, [#allocation28], %s4458_s8, %s4458_s8, %s4461_s10  }
  0xed   : > { %s3487_s23 = smov [#allocation30]   ;;  %s4463_s17 = sld [smem:[#allocation68_spill]] }
  0xee   : > { %s690_s28 = sshll.u32 %s3487_s23, 4  ;;  %s691_s28 = int_to_ptr.vmem [resolvable:$true] %s690_s28 }
  0xf3   : > { %s3016_s6 = scalar_lea.hbm %s4463_s17, 16 }
  0xf4   : > { %p3017_p1 = scmp.ne.s32.totalorder %s4463_s17, %s3016_s6  ;;  %p3023_p12 = scmp.lt.u32.totalorder %s3016_s6, %s4463_s17 }
  0xf6   : > { %p3019_p3 = pnand %p3017_p1, %p3669_p8 }
  0xf8   : > { %p3020_p11 = pneg %p3019_p3 }
  0xfa   : > { %p3025_p13 = pnand %p3023_p12, %p3020_p11 }
  0xfc   : > { %3028 = shalt.err (!%p3025_p13)
}
  0xfd   : > { %s3029_s14 = scalar_lea.vmem %s691_s28, 16  ;;  %s3036_s26 = scalar_lea.vmem %s691_s28, 32 }
  0xfe   : > { %p3030_p0 = scmp.ne.s32.totalorder %s691_s28, %s3029_s14  ;;  %p3037_p7 = scmp.lt.s32.totalorder %s691_s28, %s691_s28 }
  0xff   : > { %p3038_p9 = scmp.lt.s32.totalorder %s3036_s26, %s3029_s14 }
 0x100   : > { %p3032_p2 = pnand %p3030_p0, %p3669_p8 }
 0x101   : > { %p3039_p5 = por %p3038_p9, %p3037_p7 }
 0x102   : > { %p3033_p4 = pneg %p3032_p2 }
 0x104   : > { %p3040_p10 = pnand %p3039_p5, %p3033_p4 }
 0x106   : > { %3043 = shalt.err (!%p3040_p10)
}
 0x107   : > { %2656 = dma.hbm_to_vmem [thread:$0]  (!%p3653_p6), %s4463_s17, 16, %s691_s28, [#allocation31]  }
 0x108   : > { %s2285_s25 = sadd.s32 4294967294, %s3476_s22   ;;  %s58_s27 = sadd.s32 1, %s3472_s1 }
 0x109   : > { %p60_p1 = scmp.ge.s32.totalorder %s58_s27, 2  ;;  %s67_s6 = sadd.s32 1, %s3464_s20 }
 0x10a   : > { %p74_p3 = scmp.ne.s32.totalorder %s3464_s20, %s3460_s30  ;;  %p75_p11 = scmp.eq.s32.totalorder %s3476_s22, 0 }
 0x10b   : > { %s4525_s27 = smov (%p60_p1, %s58_s27), 0  ;;  %p80_p13 = scmp.ne.s32.totalorder %s3460_s30, %s3456_s0 }
 0x10c   : > { %4464 = sst [smem:[#allocation49_spill]] %s4525_s27  ;;  %p3845_p12 = por %p75_p11, %p74_p3 }
 0x10d   : > { %s62_s28 = ssub.s32 %s3472_s1, %s4525_s27  ;;  %p494_p0 = scmp.eq.s32.totalorder %s3637_s2, 1 }
 0x10e   : > { %p65_p2 = scmp.eq.s32.totalorder %s62_s28, 0  ;;  %p4466_p4 = scmp.eq.s32.totalorder %s3637_s2, 0 }
 0x10f   : > { %p3860_p9 = por %p494_p0, %p74_p3  ;;  %p500_p5 = scmp.eq.s32.totalorder %s2285_s25, 1 }
 0x110   : > { %p3856_p7 = por %p4466_p4, %p80_p13  ;;  %p2690_p1 = scmp.lt.s32.totalorder %s3476_s22, 2 }
 0x111   : > { %s4468_s19 = scalar_select %p3860_p9, 1, 0 }
 0x112   : > { %s4467_s21 = scalar_select %p3856_p7, 1, 0 }
 0x113   : > { %s3865_s24 = scalar_select %p65_p2, %s3464_s20, %s67_s6  }
 0x114   : > { %p3867_p10 = por %p500_p5, %p80_p13  ;;  %s4406_s26 = sand.u32 1, %s3464_s20  }
 0x115   : > { %4469 = sst [smem:[#allocation50_spill]] %s3865_s24  ;;  %s3874_s16 = sshll.u32 %s3472_s1, 6 }
 0x116   : > { %s4470_s14 = scalar_select %p3867_p10, 1, 0 }
 0x117   : > { %s3878_s23 = sshll.u32 %s4406_s26, 2  ;;  %p3882_p3 = pnand %p2690_p1, %p3845_p12 }
 0x118   : > { %s731_s25 = sand.u32 1, %s3476_s22   ;;  %s4472_s7 = sld [smem:[#allocation52_spill]] }
 0x119   : > { %s4471_s28 = scalar_select %p3882_p3, 1, 0 }
 0x11a   : > { %s735_s11 = scalar_lea.vmem [#allocation6], %s3878_s23  ;;  %s3896_s29 = scalar_lea.sflag [#allocation7], %s731_s25 }
 0x11b   : > { %s742_s26 = sshll.u32 %s735_s11, 4  ;;  %p3902_p12 = pneg %p3882_p3  ;;  %s3894_s26 = int_to_ptr.vmem [resolvable:$true] %s742_s26 }
 0x11d   : > { %s4473_s15 = scalar_select %p3902_p12, 1, 0 }
 0x11e   : > { %s3891_s9 = scalar_lea.hbm %s4472_s7, %s3874_s16  ;;  %s3049_s17 = scalar_lea.hbm %s4472_s7, 128 }
 0x11f   : > { %s3044_s13 = scalar_lea.hbm %s3891_s9, 64  ;;  %p3050_p2 = scmp.lt.u32.totalorder %s3891_s9, %s4472_s7 }
 0x120   : > { %p3045_p11 = scmp.ne.s32.totalorder %s3891_s9, %s3044_s13  ;;  %p3051_p4 = scmp.lt.u32.totalorder %s3049_s17, %s3044_s13 }
 0x121   : > { %p3053_p1 = scmp.lt.u32.totalorder %s3044_s13, %s3891_s9 }
 0x122   : > { %p3047_p13 = pnand %p3902_p12, %p3045_p11  ;;  %p3052_p5 = por %p3051_p4, %p3050_p2 }
 0x124   : > { %p3048_p0 = pneg %p3047_p13  ;;  %p3054_p10 = por %p3053_p1, %p3052_p5 }
 0x126   : > { %p3055_p9 = pnand %p3054_p10, %p3048_p0 }
 0x128   : > { %3058 = shalt.err (!%p3055_p9)
}
 0x129   : > { %s3059_s25 = scalar_lea.vmem %s3894_s26, 64  ;;  %s3488_s5 = smov [#allocation6]  }
 0x12a   : > { %p3060_p11 = scmp.ne.s32.totalorder %s3894_s26, %s3059_s25  ;;  %s3064_s6 = sshll.u32 %s3488_s5, 4  ;;  %s3065_s6 = int_to_ptr.vmem [resolvable:$false] %s3064_s6 }
 0x12b   : > { %s3066_s18 = scalar_lea.vmem %s3065_s6, 128  ;;  %p3067_p6 = scmp.lt.s32.totalorder %s3894_s26, %s3065_s6 }
 0x12c   : > { %p3062_p13 = pnand %p3060_p11, %p3902_p12  ;;  %p3068_p8 = scmp.lt.s32.totalorder %s3066_s18, %s3059_s25 }
 0x12e   : > { %p3063_p7 = pneg %p3062_p13  ;;  %p3069_p2 = por %p3068_p8, %p3067_p6 }
 0x130   : > { %p3070_p4 = pnand %p3069_p2, %p3063_p7 }
 0x132   : > { %3073 = shalt.err (!%p3070_p4)
}
 0x133   : > { %2666 = dma.hbm_to_vmem [thread:$0]  (!%p3882_p3), %s3891_s9, 64, %s3894_s26, %s3896_s29  }
 0x134   : > { %s3489_s13 = smov [#allocation11]   ;;  %s3490_s11 = smov [#allocation14]  }
 0x135   : > { %s532_s17 = sshll.u32 %s3489_s13, 4  ;;  %s559_s7 = sshll.u32 %s3490_s11, 4  ;;  %s533_s17 = int_to_ptr.vmem [resolvable:$true] %s532_s17  ;;  %s560_s7 = int_to_ptr.vmem [resolvable:$true] %s559_s7 }
 0x136   : > { %s4474_s4 = sld [smem:[#allocation55_spill]]  ;;  %p4475_p8 = scmp.ne.s32.totalorder %s4454_s12, 0 }
 0x13c   : > { %s3074_s6 = scalar_lea.hbm %s4474_s4, 256 }
 0x13d   : > { %p3075_p6 = scmp.ne.s32.totalorder %s4474_s4, %s3074_s6  ;;  %p3081_p10 = scmp.lt.u32.totalorder %s3074_s6, %s4474_s4 }
 0x13f   : > { %p3077_p7 = pnand %p3075_p6, %p4475_p8 }
 0x141   : > { %p3078_p9 = pneg %p3077_p7 }
 0x143   : > { %p3083_p0 = pnand %p3081_p10, %p3078_p9 }
 0x145   : > { %3086 = shalt.err (!%p3083_p0)
}
 0x146   : > { %s3087_s9 = scalar_lea.vmem %s533_s17, 256  ;;  %p3095_p13 = scmp.lt.s32.totalorder %s533_s17, %s533_s17 }
 0x147   : > { %p3088_p5 = scmp.ne.s32.totalorder %s533_s17, %s3087_s9  ;;  %p3096_p2 = scmp.lt.s32.totalorder %s3087_s9, %s3087_s9 }
 0x149   : > { %p3090_p1 = pnand %p3088_p5, %p4475_p8  ;;  %p3097_p4 = por %p3096_p2, %p3095_p13 }
 0x14b   : > { %p3091_p11 = pneg %p3090_p1 }
 0x14d   : > { %p3098_p3 = pnand %p3097_p4, %p3091_p11 }
 0x14f   : > { %3101 = shalt.err (!%p3098_p3)
}
 0x150   : > { %p4476_p6 = scmp.ne.s32.totalorder %s4451_s3, 0  ;;  %s4477_s13 = sld [smem:[#allocation57_spill]] }
 0x152   : > { %2617 = dma.hbm_to_vmem [thread:$0]  (!%p4476_p6), %s4474_s4, 256, %s533_s17, [#allocation10], %s4458_s8, %s4458_s8, %s4461_s10  }
 0x156   : > { %s3102_s11 = scalar_lea.hbm %s4477_s13, 16 }
 0x157   : > { %p3103_p7 = scmp.ne.s32.totalorder %s4477_s13, %s3102_s11  ;;  %p3109_p10 = scmp.lt.u32.totalorder %s3102_s11, %s4477_s13 }
 0x159   : > { %p3105_p3 = pnand %p3103_p7, %p4475_p8 }
 0x15b   : > { %p3106_p9 = pneg %p3105_p3 }
 0x15d   : > { %p3111_p0 = pnand %p3109_p10, %p3106_p9 }
 0x15f   : > { %3114 = shalt.err (!%p3111_p0)
}
 0x160   : > { %s3115_s9 = scalar_lea.vmem %s560_s7, 16  ;;  %s3122_s17 = scalar_lea.vmem %s560_s7, 32 }
 0x161   : > { %p3116_p5 = scmp.ne.s32.totalorder %s560_s7, %s3115_s9  ;;  %p3123_p13 = scmp.lt.s32.totalorder %s560_s7, %s560_s7 }
 0x162   : > { %p3124_p2 = scmp.lt.s32.totalorder %s3122_s17, %s3115_s9 }
 0x163   : > { %p3118_p1 = pnand %p3116_p5, %p4475_p8 }
 0x164   : > { %p3125_p4 = por %p3124_p2, %p3123_p13 }
 0x165   : > { %p3119_p11 = pneg %p3118_p1 }
 0x167   : > { %p3126_p12 = pnand %p3125_p4, %p3119_p11 }
 0x169   : > { %3129 = shalt.err (!%p3126_p12)
}
 0x16a   : > { %2623 = dma.hbm_to_vmem [thread:$0]  (!%p4476_p6), %s4477_s13, 16, %s560_s7, [#allocation13]  }
 0x16b   : > { %s3491_s24 = smov [#allocation17]   ;;  %s3492_s11 = smov [#allocation20]  }
 0x16c   : > { %s580_s26 = sshll.u32 %s3491_s24, 4  ;;  %s606_s5 = sshll.u32 %s3492_s11, 4  ;;  %s581_s26 = int_to_ptr.vmem [resolvable:$true] %s580_s26  ;;  %s607_s5 = int_to_ptr.vmem [resolvable:$true] %s606_s5 }
 0x16d   : > { %s4478_s18 = sld [smem:[#allocation59_spill]] }
 0x173   : > { %s3130_s4 = scalar_lea.hbm %s4478_s18, 256 }
 0x174   : > { %p3131_p12 = scmp.ne.s32.totalorder %s4478_s18, %s3130_s4  ;;  %p3137_p9 = scmp.lt.u32.totalorder %s3130_s4, %s4478_s18 }
 0x176   : > { %p3133_p7 = pnand %p3131_p12, %p4475_p8 }
 0x178   : > { %p3134_p3 = pneg %p3133_p7 }
 0x17a   : > { %p3139_p10 = pnand %p3137_p9, %p3134_p3 }
 0x17c   : > { %3142 = shalt.err (!%p3139_p10)
}
 0x17d   : > { %s3143_s7 = scalar_lea.vmem %s581_s26, 256  ;;  %p3151_p11 = scmp.lt.s32.totalorder %s581_s26, %s581_s26 }
 0x17e   : > { %p3144_p0 = scmp.ne.s32.totalorder %s581_s26, %s3143_s7  ;;  %p3152_p13 = scmp.lt.s32.totalorder %s3143_s7, %s3143_s7 }
 0x180   : > { %p3146_p5 = pnand %p3144_p0, %p4475_p8  ;;  %p3153_p2 = por %p3152_p13, %p3151_p11 }
 0x182   : > { %p3147_p1 = pneg %p3146_p5 }
 0x184   : > { %p3154_p4 = pnand %p3153_p2, %p3147_p1 }
 0x186   : > { %3157 = shalt.err (!%p3154_p4)
}
 0x187   : > { %2629 = dma.hbm_to_vmem [thread:$0]  (!%p4476_p6), %s4478_s18, 256, %s581_s26, [#allocation16], %s4458_s8, %s4458_s8, %s4461_s10  }
 0x188   : > { %s4479_s11 = sld [smem:[#allocation61_spill]] }
 0x18e   : > { %s3158_s6 = scalar_lea.hbm %s4479_s11, 256 }
 0x18f   : > { %p3159_p12 = scmp.ne.s32.totalorder %s4479_s11, %s3158_s6  ;;  %p3165_p9 = scmp.lt.u32.totalorder %s3158_s6, %s4479_s11 }
 0x191   : > { %p3161_p7 = pnand %p3159_p12, %p4475_p8 }
 0x193   : > { %p3162_p3 = pneg %p3161_p7 }
 0x195   : > { %p3167_p10 = pnand %p3165_p9, %p3162_p3 }
 0x197   : > { %3170 = shalt.err (!%p3167_p10)
}
 0x198   : > { %s3171_s7 = scalar_lea.vmem %s607_s5, 256  ;;  %p3179_p11 = scmp.lt.s32.totalorder %s607_s5, %s607_s5 }
 0x199   : > { %p3172_p0 = scmp.ne.s32.totalorder %s607_s5, %s3171_s7  ;;  %p3180_p13 = scmp.lt.s32.totalorder %s3171_s7, %s3171_s7 }
 0x19b   : > { %p3174_p5 = pnand %p3172_p0, %p4475_p8  ;;  %p3181_p2 = por %p3180_p13, %p3179_p11 }
 0x19d   : > { %p3175_p1 = pneg %p3174_p5 }
 0x19f   : > { %p3182_p4 = pnand %p3181_p2, %p3175_p1 }
 0x1a1   : > { %3185 = shalt.err (!%p3182_p4)
}
 0x1a2   : > { %2635 = dma.hbm_to_vmem [thread:$0]  (!%p4476_p6), %s4479_s11, 256, %s607_s5, [#allocation19], %s4458_s8, %s4458_s8, %s4461_s10  }
 0x1a3   : > { %s3493_s4 = smov [#allocation23]   ;;  %s3494_s24 = smov [#allocation26]  }
 0x1a4   : > { %s631_s27 = sshll.u32 %s3493_s4, 4  ;;  %s655_s6 = sshll.u32 %s3494_s24, 4  ;;  %s632_s27 = int_to_ptr.vmem [resolvable:$true] %s631_s27  ;;  %s656_s6 = int_to_ptr.vmem [resolvable:$true] %s655_s6 }
 0x1a5   : > { %s4480_s17 = sld [smem:[#allocation63_spill]] }
 0x1ab   : > { %s3186_s1 = scalar_lea.hbm %s4480_s17, 16 }
 0x1ac   : > { %p3187_p12 = scmp.ne.s32.totalorder %s4480_s17, %s3186_s1  ;;  %p3193_p9 = scmp.lt.u32.totalorder %s3186_s1, %s4480_s17 }
 0x1ae   : > { %p3189_p7 = pnand %p3187_p12, %p4475_p8 }
 0x1b0   : > { %p3190_p3 = pneg %p3189_p7 }
 0x1b2   : > { %p3195_p10 = pnand %p3193_p9, %p3190_p3 }
 0x1b4   : > { %3198 = shalt.err (!%p3195_p10)
}
 0x1b5   : > { %s3199_s8 = scalar_lea.vmem %s632_s27, 16  ;;  %s3206_s10 = scalar_lea.vmem %s632_s27, 32 }
 0x1b6   : > { %p3200_p0 = scmp.ne.s32.totalorder %s632_s27, %s3199_s8  ;;  %p3207_p11 = scmp.lt.s32.totalorder %s632_s27, %s632_s27 }
 0x1b7   : > { %p3208_p13 = scmp.lt.s32.totalorder %s3206_s10, %s3199_s8 }
 0x1b8   : > { %p3202_p5 = pnand %p3200_p0, %p4475_p8 }
 0x1b9   : > { %p3209_p2 = por %p3208_p13, %p3207_p11 }
 0x1ba   : > { %p3203_p1 = pneg %p3202_p5 }
 0x1bc   : > { %p3210_p4 = pnand %p3209_p2, %p3203_p1 }
 0x1be   : > { %3213 = shalt.err (!%p3210_p4)
}
 0x1bf   : > { %2641 = dma.hbm_to_vmem [thread:$0]  (!%p4476_p6), %s4480_s17, 16, %s632_s27, [#allocation22]  }
 0x1c0   : > { %s4481_s4 = sld [smem:[#allocation65_spill]] }
 0x1c6   : > { %s3214_s24 = scalar_lea.hbm %s4481_s4, 16 }
 0x1c7   : > { %p3215_p12 = scmp.ne.s32.totalorder %s4481_s4, %s3214_s24  ;;  %p3221_p9 = scmp.lt.u32.totalorder %s3214_s24, %s4481_s4 }
 0x1c9   : > { %p3217_p7 = pnand %p3215_p12, %p4475_p8 }
 0x1cb   : > { %p3218_p3 = pneg %p3217_p7 }
 0x1cd   : > { %p3223_p10 = pnand %p3221_p9, %p3218_p3 }
 0x1cf   : > { %3226 = shalt.err (!%p3223_p10)
}
 0x1d0   : > { %s3227_s26 = scalar_lea.vmem %s656_s6, 16  ;;  %s3234_s27 = scalar_lea.vmem %s656_s6, 32 }
 0x1d1   : > { %p3228_p0 = scmp.ne.s32.totalorder %s656_s6, %s3227_s26  ;;  %p3235_p11 = scmp.lt.s32.totalorder %s656_s6, %s656_s6 }
 0x1d2   : > { %p3236_p13 = scmp.lt.s32.totalorder %s3234_s27, %s3227_s26 }
 0x1d3   : > { %p3230_p5 = pnand %p3228_p0, %p4475_p8 }
 0x1d4   : > { %p3237_p2 = por %p3236_p13, %p3235_p11 }
 0x1d5   : > { %p3231_p1 = pneg %p3230_p5 }
 0x1d7   : > { %p3238_p4 = pnand %p3237_p2, %p3231_p1 }
 0x1d9   : > { %3241 = shalt.err (!%p3238_p4)
}
 0x1da   : > { %2647 = dma.hbm_to_vmem [thread:$0]  (!%p4476_p6), %s4481_s4, 16, %s656_s6, [#allocation25]  }
 0x1db   : > { %s3495_s13 = smov [#allocation29]   ;;  %s3496_s18 = smov [#allocation32]  }
 0x1dc   : > { %s679_s5 = sshll.u32 %s3495_s13, 4  ;;  %s701_s22 = sshll.u32 %s3496_s18, 4  ;;  %s680_s5 = int_to_ptr.vmem [resolvable:$true] %s679_s5  ;;  %s702_s22 = int_to_ptr.vmem [resolvable:$true] %s701_s22 }
 0x1dd   : > { %s4482_s9 = sld [smem:[#allocation67_spill]] }
 0x1e3   : > { %s3242_s1 = scalar_lea.hbm %s4482_s9, 16 }
 0x1e4   : > { %p3243_p12 = scmp.ne.s32.totalorder %s4482_s9, %s3242_s1  ;;  %p3249_p9 = scmp.lt.u32.totalorder %s3242_s1, %s4482_s9 }
 0x1e6   : > { %p3245_p7 = pnand %p3243_p12, %p4475_p8 }
 0x1e8   : > { %p3246_p3 = pneg %p3245_p7 }
 0x1ea   : > { %p3251_p10 = pnand %p3249_p9, %p3246_p3 }
 0x1ec   : > { %3254 = shalt.err (!%p3251_p10)
}
 0x1ed   : > { %s3255_s6 = scalar_lea.vmem %s680_s5, 16  ;;  %s3262_s10 = scalar_lea.vmem %s680_s5, 32 }
 0x1ee   : > { %p3256_p0 = scmp.ne.s32.totalorder %s680_s5, %s3255_s6  ;;  %p3263_p11 = scmp.lt.s32.totalorder %s680_s5, %s680_s5 }
 0x1ef   : > { %p3264_p13 = scmp.lt.s32.totalorder %s3262_s10, %s3255_s6 }
 0x1f0   : > { %p3258_p5 = pnand %p3256_p0, %p4475_p8 }
 0x1f1   : > { %p3265_p2 = por %p3264_p13, %p3263_p11 }
 0x1f2   : > { %p3259_p1 = pneg %p3258_p5 }
 0x1f4   : > { %p3266_p4 = pnand %p3265_p2, %p3259_p1 }
 0x1f6   : > { %3269 = shalt.err (!%p3266_p4)
}
 0x1f7   : > { %2653 = dma.hbm_to_vmem [thread:$0]  (!%p4476_p6), %s4482_s9, 16, %s680_s5, [#allocation28]  }
 0x1f8   : > { %s4483_s1 = sld [smem:[#allocation69_spill]] }
 0x1fe   : > { %s4484_s7 = smov %s4483_s1  ;;  %s3270_s26 = scalar_lea.hbm %s4483_s1, 16 }
 0x1ff   : > { %p3271_p12 = scmp.ne.s32.totalorder %s4484_s7, %s3270_s26  ;;  %p3277_p9 = scmp.lt.u32.totalorder %s3270_s26, %s4484_s7 }
 0x201   : > { %p3273_p7 = pnand %p3271_p12, %p4475_p8 }
 0x203   : > { %p3274_p3 = pneg %p3273_p7 }
 0x205   : > { %p3279_p10 = pnand %p3277_p9, %p3274_p3 }
 0x207   : > { %3282 = shalt.err (!%p3279_p10)
}
 0x208   : > { %s3283_s13 = scalar_lea.vmem %s702_s22, 16  ;;  %s3290_s5 = scalar_lea.vmem %s702_s22, 32 }
 0x209   : > { %p3284_p0 = scmp.ne.s32.totalorder %s702_s22, %s3283_s13  ;;  %p3291_p11 = scmp.lt.s32.totalorder %s702_s22, %s702_s22 }
 0x20a   : > { %p3292_p13 = scmp.lt.s32.totalorder %s3290_s5, %s3283_s13 }
 0x20b   : > { %p3286_p5 = pnand %p3284_p0, %p4475_p8 }
 0x20c   : > { %p3293_p2 = por %p3292_p13, %p3291_p11 }
 0x20d   : > { %p3287_p1 = pneg %p3286_p5 }
 0x20f   : > { %p3294_p4 = pnand %p3293_p2, %p3287_p1 }
 0x211   : > { %3297 = shalt.err (!%p3294_p4)
}
 0x212   : > { %2659 = dma.hbm_to_vmem [thread:$0]  (!%p4476_p6), %s4484_s7, 16, %s702_s22, [#allocation31]  }
 0x213   : > { %s4485_s1 = sld [smem:[#allocation51_spill]]  ;;  %s716_s8 = scalar_lea.vmem [#allocation3], %s3878_s23 }
 0x214   : > { %s724_s3 = sshll.u32 %s716_s8, 4  ;;  %s4487_s13 = sld [smem:[#allocation53_spill]]  ;;  %s4086_s3 = int_to_ptr.vmem [resolvable:$true] %s724_s3 }
 0x215   : > { %s4488_s18 = sand.u32 1, %s3464_s20   ;;  %p4489_p6 = scmp.ne.s32.totalorder %s4473_s15, 0 }
 0x216   : > { %s713_s22 = scalar_lea.sflag [#allocation4], %s4488_s18 }
 0x219   : > { %s4486_s26 = smov %s4485_s1  ;;  %s4083_s27 = scalar_lea.hbm %s4485_s1, %s3874_s16 }
 0x21a   : > { %s4092_s5 = scalar_lea.hbm %s4487_s13, %s3874_s16  ;;  %s3298_s24 = scalar_lea.hbm %s4083_s27, 64 }
 0x21b   : > { %p3299_p8 = scmp.ne.s32.totalorder %s4083_s27, %s3298_s24  ;;  %s3303_s1 = scalar_lea.hbm %s4486_s26, 128 }
 0x21c   : > { %p3304_p3 = scmp.lt.u32.totalorder %s4083_s27, %s4486_s26  ;;  %p3305_p9 = scmp.lt.u32.totalorder %s3303_s1, %s3298_s24 }
 0x21d   : > { %p3301_p12 = pnand %p3299_p8, %p4489_p6  ;;  %p3307_p0 = scmp.lt.u32.totalorder %s3298_s24, %s4083_s27 }
 0x21e   : > { %p3306_p10 = por %p3305_p9, %p3304_p3 }
 0x21f   : > { %p3302_p7 = pneg %p3301_p12 }
 0x220   : > { %p3308_p5 = por %p3307_p0, %p3306_p10 }
 0x222   : > { %p3309_p1 = pnand %p3308_p5, %p3302_p7 }
 0x224   : > { %3312 = shalt.err (!%p3309_p1)
}
 0x225   : > { %s3313_s16 = scalar_lea.vmem %s4086_s3, 64  ;;  %s3497_s6 = smov [#allocation3]  }
 0x226   : > { %p3314_p11 = scmp.ne.s32.totalorder %s4086_s3, %s3313_s16  ;;  %s3318_s10 = sshll.u32 %s3497_s6, 4  ;;  %s3319_s10 = int_to_ptr.vmem [resolvable:$false] %s3318_s10 }
 0x227   : > { %s3320_s4 = scalar_lea.vmem %s3319_s10, 128  ;;  %p3321_p4 = scmp.lt.s32.totalorder %s4086_s3, %s3319_s10 }
 0x228   : > { %p3316_p13 = pnand %p3314_p11, %p4489_p6  ;;  %p3322_p8 = scmp.lt.s32.totalorder %s3320_s4, %s3313_s16 }
 0x22a   : > { %p3317_p2 = pneg %p3316_p13  ;;  %p3323_p12 = por %p3322_p8, %p3321_p4 }
 0x22c   : > { %p3324_p3 = pnand %p3323_p12, %p3317_p2 }
 0x22e   : > { %3327 = shalt.err (!%p3324_p3)
}
 0x22f   : > { %p4490_p7 = scmp.ne.s32.totalorder %s4471_s28, 0  ;;  %s753_s18 = scalar_lea.vmem [#allocation8], %s3878_s23 }
 0x230   : > { %s760_s24 = sshll.u32 %s753_s18, 4  ;;  %s3328_s12 = scalar_lea.hbm %s4092_s5, 64  ;;  %s761_s24 = int_to_ptr.vmem [resolvable:$true] %s760_s24 }
 0x231   : > { %2663 = dma.hbm_to_vmem [thread:$0]  (!%p4490_p7), %s4083_s27, 64, %s4086_s3, %s713_s22  }
 0x232   : > { %p3329_p9 = scmp.ne.s32.totalorder %s4092_s5, %s3328_s12  ;;  %s3333_s8 = scalar_lea.hbm %s4487_s13, 128 }
 0x233   : > { %p3334_p5 = scmp.lt.u32.totalorder %s4092_s5, %s4487_s13  ;;  %p3335_p1 = scmp.lt.u32.totalorder %s3333_s8, %s3328_s12 }
 0x234   : > { %p3331_p10 = pnand %p3329_p9, %p4489_p6  ;;  %p3337_p13 = scmp.lt.u32.totalorder %s3328_s12, %s4092_s5 }
 0x235   : > { %p3336_p11 = por %p3335_p1, %p3334_p5 }
 0x236   : > { %p3332_p0 = pneg %p3331_p10 }
 0x237   : > { %p3338_p2 = por %p3337_p13, %p3336_p11 }
 0x239   : > { %p3339_p4 = pnand %p3338_p2, %p3332_p0 }
 0x23b   : > { %3342 = shalt.err (!%p3339_p4)
}
 0x23c   : > { %s3343_s23 = scalar_lea.vmem %s761_s24, 64  ;;  %s3498_s27 = smov [#allocation8]  }
 0x23d   : > { %p3344_p8 = scmp.ne.s32.totalorder %s761_s24, %s3343_s23  ;;  %s3348_s3 = sshll.u32 %s3498_s27, 4  ;;  %s3349_s3 = int_to_ptr.vmem [resolvable:$false] %s3348_s3 }
 0x23e   : > { %s3350_s22 = scalar_lea.vmem %s3349_s3, 128  ;;  %p3351_p9 = scmp.lt.s32.totalorder %s761_s24, %s3349_s3 }
 0x23f   : > { %p3346_p12 = pnand %p3344_p8, %p4489_p6  ;;  %p3352_p10 = scmp.lt.s32.totalorder %s3350_s22, %s3343_s23 }
 0x241   : > { %p3347_p3 = pneg %p3346_p12  ;;  %p3353_p7 = por %p3352_p10, %p3351_p9 }
 0x243   : > { %p3354_p1 = pnand %p3353_p7, %p3347_p3 }
 0x245   : > { %3357 = shalt.err (!%p3354_p1)
}
 0x246   : > { %p4491_p5 = scmp.ne.s32.totalorder %s4471_s28, 0  ;;  %s4492_s10 = sld [smem:[#allocation48_spill]] }
 0x248   : > { %2669 = dma.hbm_to_vmem [thread:$0]  (!%p4491_p5), %s4092_s5, 64, %s761_s24, %s3896_s29  }
 0x24c   : > { %p4493_p0 = scmp.ne.s32.totalorder %s4492_s10, 0 }
 0x24d   : > { %s4139_s15 = sand.u32 (!%p4493_p0), 1, %s3460_s30   ;;  %p4494_p6 = scmp.ne.s32.totalorder (!%p4493_p0), %s4467_s21, 0 }
 0x24e   : > { %769 = sbr.rel (%p4493_p0) target bundleno = 4854 (0x12f6), region = 96  ;;  %s4142_s4 = sshll.u32 (!%p4493_p0), %s4139_s15, 2 }
 0x24f   : > { %s772_s18 = scalar_lea.sflag (!%p4493_p0), [#allocation4], %s4139_s15  ;;  %s775_s12 = scalar_lea.vmem (!%p4493_p0), [#allocation3], %s4142_s4 }
 0x255   : > { %3411 = dma.done.wait (%p4494_p6), %s772_s18, 64  }
 0x256   : > { %3413 = vsyncadd (%p4494_p6), %s772_s18, 4294967232  ;;  %s780_s28 = sand.u32 1, %s3637_s2   ;;  %s784_s5 = scalar_lea.vmem [#allocation6], %s4142_s4 }
 0x257   : > { %s781_s29 = scalar_lea.sflag [#allocation7], %s780_s28 }
 0x258   : > { %3415 = dma.done.wait (%p4494_p6), %s781_s29, 128  }
 0x259   : > { %3417 = vsyncadd (%p4494_p6), %s781_s29, 4294967168  ;;  %s793_s24 = scalar_lea.vmem [#allocation8], %s4142_s4  ;;  %p4495_p7 = scmp.eq.s32.totalorder %s3637_s2, 0 }
 0x25b   : > { %3419 = dma.done.wait (%p4495_p7), [#allocation10], 512   ;;  %p4496_p11 = pmov %p4495_p7 }
 0x25c   : > { %p4497_p13 = pmov %p4495_p7 }
 0x25d   : > { %3421 = vsyncadd (%p4496_p11), [#allocation10], 4294966784 }
 0x25e   : > { %3423 = dma.done.wait (%p4497_p13), [#allocation13], 272   ;;  %p4498_p2 = pmov %p4495_p7 }
 0x260   : > { %3425 = vsyncadd (%p4498_p2), [#allocation13], 4294967024  ;;  %p4499_p4 = pmov %p4498_p2 }
 0x261   : > { %p4500_p8 = pmov %p4498_p2 }
 0x262   : > { %3427 = dma.done.wait (%p4499_p4), [#allocation16], 272  }
 0x263   : > { %3429 = vsyncadd (%p4500_p8), [#allocation16], 4294967024  ;;  %p4501_p12 = pmov %p4498_p2 }
 0x264   : > { %p4502_p3 = pmov %p4498_p2 }
 0x265   : > { %3431 = dma.done.wait (%p4501_p12), [#allocation19], 512  }
 0x266   : > { %3433 = vsyncadd (%p4502_p3), [#allocation19], 4294966784  ;;  %p4503_p9 = pmov %p4498_p2 }
 0x267   : > { %p4504_p10 = pmov %p4498_p2 }
 0x268   : > { %3435 = dma.done.wait (%p4503_p9), [#allocation22], 32  }
 0x269   : > { %3437 = vsyncadd (%p4504_p10), [#allocation22], 4294967264  ;;  %p4505_p1 = pmov %p4498_p2 }
 0x26b   : > { %3439 = dma.done.wait (%p4505_p1), [#allocation25], 272   ;;  %p4506_p5 = pmov %p4505_p1 }
 0x26c   : > { %p4507_p0 = pmov %p4505_p1 }
 0x26d   : > { %3441 = vsyncadd (%p4506_p5), [#allocation25], 4294967024 }
 0x26e   : > { %3443 = dma.done.wait (%p4507_p0), [#allocation28], 528   ;;  %p4508_p6 = pmov %p4507_p0 }
 0x26f   : > { %p4509_p7 = pmov %p4507_p0 }
 0x270   : > { %3445 = vsyncadd (%p4508_p6), [#allocation28], 4294966768 }
 0x271   : > { %3447 = dma.done.wait (%p4509_p7), [#allocation31], 32   ;;  %p4510_p11 = pmov %p4507_p0 }
 0x272   : > { %v3499_v0 = vmov 0.0   ;;  %vm3500_vm0 = vmmov 0   ;;  %v2780_v1 = vld [vmem:[#allocation11] sm:$0xff]   ;;  %v2781_v2 = vld [vmem:[#allocation11 + $0x8] sm:$0xff]   ;;  %v2782_v3 = vld [vmem:[#allocation9] sm:$0xff]   ;;  %vm942_vm1 = vcmask 261120  }
 0x273   : > { %3449 = vsyncadd (%p4510_p11), [#allocation31], 4294967264  ;;  %2431 = vmatprep.subr.bf16.mxu1 %v3499_v0  ;;  %2423 = vmatprep.subr.bf16.mxu0 %v3499_v0  ;;  %v924_v4 = vld [vmem:[%s784_s5] sm:$0xf]  ;;  %v2783_v5 = vld [vmem:[#allocation9 + $0x8] sm:$0xff]   ;;  %vm1051_vm2 = vcmask 130048  }
 0x274   : > { %2435 = vmatprep.mubr.msk.bf16.mxu1 %vm3500_vm0, %v3499_v0  ;;  %2427 = vmatprep.mubr.msk.bf16.mxu0 %vm3500_vm0, %v3499_v0  ;;  %v4201_v6 = vld [vmem:[%s775_s12] sm:$0xf]  ;;  %s3501_s2 = smov 112   ;;  %vm1098_vm3 = vcmask 64512   ;;  %s3502_s21 = smov 96   ;;  %vm1117_vm4 = vcmask 1043456  }
 0x275   : > { %2432 = vmatpush3.bf16.msra.mxu1 %v2780_v1  ;;  %2424 = vmatpush3.bf16.msra.mxu0 %v2782_v3  ;;  %s3503_s25 = smov 80   ;;  %vm1162_vm5 = vcmask 125952   ;;  %v2784_v58 = vld [vmem:[#allocation12] sm:$0xff]   ;;  %v2785_v59 = vld [vmem:[#allocation12 + $0x8] sm:$0xff]   ;;  %s3504_s1 = smov 16   ;;  %vm1282_vm6 = vcmask 257152  }
 0x276   : > { %2433 = vmatprep.subr.bf16.mxu1 %v3499_v0  ;;  %2425 = vmatprep.subr.bf16.mxu0 %v3499_v0  ;;  %vm1917_vm7 = vcmask 523264   ;;  %s4511_s8 = sld [smem:[#allocation45_spill]]  ;;  %s921_s6 = scalar_lea.vmem [#allocation33], %s4142_s4  ;;  %vm1992_vm8 = vcmask 257024  }
 0x277   : > { %s2009_s23 = sshll.u32 %s921_s6, 4  ;;  %s4512_s22 = sld [smem:[#allocation70_spill]]  ;;  %s4320_s23 = int_to_ptr.vmem [resolvable:$true] %s2009_s23 }
 0x278   : > { %s1995_s12 = scalar_lea.sflag [#allocation5], %s4139_s15  ;;  %s3358_s28 = scalar_lea.vmem %s4320_s23, 64 }
 0x279   : > { %2434 = vmatpush3.bf16.msra.mxu1 %v2781_v2  ;;  %2426 = vmatpush3.bf16.msra.mxu0 %v2783_v5  ;;  %p3359_p13 = scmp.ne.s32.totalorder %s4320_s23, %s3358_s28  ;;  %p4514_p2 = scmp.ne.s32.totalorder %s4468_s19, 0 }
 0x27a   : > { %2445 = vmatprep.subr.bf16.mxu1 %v3499_v0  ;;  %2439 = vmatprep.subr.bf16.mxu0 %v3499_v0  ;;  %s3505_s4 = smov [#allocation33]  }
 0x27b   : > { %p3360_p4 = pnand %p3359_p13, %p4514_p2  ;;  %s3362_s29 = sshll.u32 %s3505_s4, 4  ;;  %s3363_s29 = int_to_ptr.vmem [resolvable:$false] %s3362_s29 }
 0x27c   : > { %2436 = vmatmul.mubr.msk.bf16.vlgmr.msra.gmra.mrb[0].mxu1 %vm942_vm1, %v924_v4  ;;  %2428 = vmatmul.mubr.msk.bf16.vlgmr.msra.gmra.mrb[0].mxu0 %vm942_vm1, %v4201_v6  ;;  %v1285_v4 = vunpack.c.l.bf16 %v4201_v6  ;;  %v2787_v6 = vld [vmem:[#allocation18 + $0x8] sm:$0xff]   ;;  %s2376_s16 = sshll.u32 %s4511_s8, 6  ;;  %s3364_s5 = scalar_lea.vmem %s3363_s29, 128 }
 0x27d   : > { %2447 = vmatprep.mubr.msk.bf16.mxu1 %vm3500_vm0, %v3499_v0  ;;  %2441 = vmatprep.mubr.msk.bf16.mxu0 %vm3500_vm0, %v3499_v0  ;;  %s4513_s10 = smov %s4512_s22  ;;  %s4318_s18 = scalar_lea.hbm %s4512_s22, %s2376_s16 }
 0x27e   : > { %p3361_p8 = pneg %p3360_p4  ;;  %p3365_p12 = scmp.lt.s32.totalorder %s4320_s23, %s3363_s29 }
 0x27f   : > { %p3366_p3 = scmp.lt.s32.totalorder %s3364_s5, %s3358_s28 }
 0x281   : > { %p3367_p9 = por %p3366_p3, %p3365_p12 }
 0x283   : > { %p3368_p10 = pnand %p3367_p9, %p3361_p8 }
 0x34f   : > { %v1040_v7 = vpop.f32.mrb[0].mxu1  ;;  %v980_v11 = vpop.f32.mrb[0].mxu0 }
 0x350   : > { %v1046_v8 = vpack.c.bf16 %v1040_v7, %v1040_v7  ;;  %v2437_v9 = vpop.f32.mrb[1].mxu1  ;;  %v986_v14 = vpack.c.bf16 %v980_v11, %v980_v11  ;;  %v2429_v15 = vpop.f32.mrb[1].mxu0 }
 0x351   : > { %v1043_v10 = vpop.f32.mrb[2].mxu1  ;;  %v983_v16 = vpop.f32.mrb[2].mxu0 }
 0x352   : > { %1167 = vrot.lane.b32.xlu0 %v1046_v8, %s3501_s2  ;;  %v2438_v12 = vpop.f32.mrb[3].mxu1  ;;  %v1056_v13 = vsel %vm1051_vm2, %v1046_v8, 0  ;;  %v2430_v17 = vpop.f32.mrb[3].mxu0 }
 0x353   : > { %2440 = vmatpush3.bf16.xpose.msra.mxu0 %v1056_v13  ;;  %v2786_v17 = vld [vmem:[#allocation18] sm:$0xff]  }
 0x354   : > { %2451 = vmatprep.subr.bf16.mxu0 %v3499_v0 }
 0x356   : > { %1165 = vrot.lane.b32.xlu0 %v986_v14, %s3501_s2 }
 0x35a   : > { %2442 = vmatmul.mubr.msk.bf16.vlgmr.msra.gmra.mrb[4].mxu0 %vm1051_vm2, %v986_v14 }
 0x35b   : > { %2453 = vmatprep.mubr.msk.bf16.mxu0 %vm3500_vm0, %v3499_v0 }
 0x3c4   : > { %v1168_v18 = vpop.permute.xlu0 %1167 }
 0x3c5   : > { %v1173_v19 = vsel %vm1051_vm2, %v1168_v18, 0  ;;  %v925_v18 = vld [vmem:[%s793_s24] sm:$0xf] }
 0x3c6   : > { %2452 = vmatpush3.bf16.xpose.msra.mxu0 %v1173_v19  ;;  %v2788_v19 = vld [vmem:[#allocation17] sm:$0xff]  }
 0x3c7   : > { %2463 = vmatprep.subr.bf16.mxu0 %v3499_v0 }
 0x3c8   : > { %v1166_v20 = vpop.permute.xlu0 %1165 }
 0x3cd   : > { %2454 = vmatmul.mubr.msk.bf16.vlgmr.msra.gmra.mrb[8].mxu0 %vm1051_vm2, %v1166_v20  ;;  %v2789_v20 = vld [vmem:[#allocation17 + $0x8] sm:$0xff]  }
 0x3ce   : > { %2467 = vmatprep.mubr.msk.bf16.mxu0 %vm3500_vm0, %v3499_v0  ;;  %2464 = vmatpush3.bf16.msra.mxu0 %v2784_v58 }
 0x3cf   : > { %2465 = vmatprep.subr.bf16.mxu0 %v3499_v0 }
 0x3d2   : > { %2466 = vmatpush3.bf16.msra.mxu0 %v2785_v59 }
 0x3d3   : > { %2479 = vmatprep.subr.bf16.mxu0 %v3499_v0 }
 0x42d   : > { %v1092_v21 = vpop.f32.mrb[4].mxu0 }
 0x42e   : > { %v2443_v22 = vpop.f32.mrb[5].mxu0  ;;  %v1099_v23 = vsel %vm1098_vm3, %v1092_v21, -inf }
 0x42f   : > { %1100 = vmax.xlane.f32.xlu1 %v1099_v23  ;;  %v1095_v24 = vpop.f32.mrb[6].mxu0 }
 0x430   : > { %v2444_v25 = vpop.f32.mrb[7].mxu0 }
 0x431   : > { %v2345_v25 = vld [vmem:[#allocation14] ss:$0 sm:$0xff] }
 0x4a0   : > { %v1209_v26 = vpop.f32.mrb[8].mxu0 }
 0x4a1   : > { %v2455_v27 = vpop.f32.mrb[9].mxu0  ;;  %v1215_v28 = vsel %vm1098_vm3, %v1209_v26, -inf }
 0x4a2   : > { %1216 = vmax.xlane.f32.xlu1 %v1215_v28  ;;  %v1212_v29 = vpop.f32.mrb[10].mxu0  ;;  %v2346_v27 = vld [vmem:[#allocation15] ss:$0 sm:$0xff] }
 0x4a3   : > { %v2456_v30 = vpop.f32.mrb[11].mxu0 }
 0x4b3   : > { %1112 = vrot.lane.b32.xlu1 %v1046_v8, %s3502_s21 }
 0x4bc   : > { %v1101_v31 = vpop.xlane.xlu1 %1100 }
 0x4bd   : > { %v1102_v32 = vsub.f32 %v1092_v21, %v1101_v31 }
 0x4bf   : > { %v1103_v33 = vmul.f32 1.442695, %v1102_v32 }
 0x4c1   : > { %2798 = vpow2.f32 %v1103_v33 }
 0x4cb   : > { %v2799_v34 = vpop.eup %2798 }
 0x4cc   : > { %v1105_v35 = vsel %vm1098_vm3, %v2799_v34, 0.0 }
 0x4cd   : > { %1106 = vadd.xlane.f32.xlu0 %v1105_v35 }
 0x52f   : > { %v1217_v36 = vpop.xlane.xlu1 %1216 }
 0x530   : > { %v1218_v37 = vsub.f32 %v1209_v26, %v1217_v36 }
 0x532   : > { %v1219_v38 = vmul.f32 1.442695, %v1218_v37 }
 0x533   : > { %v1113_v39 = vpop.permute.xlu1 %1112 }
 0x534   : > { %2800 = vpow2.f32 %v1219_v38  ;;  %v1119_v40 = vsel %vm1117_vm4, %v1113_v39, 0 }
 0x535   : > { %2446 = vmatpush3.bf16.msra.mxu1 %v1119_v40 }
 0x536   : > { %2457 = vmatprep.subr.bf16.mxu1 %v3499_v0 }
 0x53e   : > { %v2801_v41 = vpop.eup %2800 }
 0x53f   : > { %v1221_v42 = vsel %vm1098_vm3, %v2801_v41, 0.0 }
 0x540   : > { %1222 = vadd.xlane.f32.xlu1 %v1221_v42 }
 0x551   : > { %1227 = vrot.lane.b32.xlu1 %v1046_v8, %s3503_s25 }
 0x55a   : > { %v1107_v43 = vpop.xlane.xlu0 %1106 }
 0x55b   : > { %2802 = vrcp.f32 %v1107_v43 }
 0x565   : > { %v2803_v44 = vpop.eup %2802 }
 0x566   : > { %v1109_v45 = vmul.f32 %v2803_v44, %v2799_v34 }
 0x568   : > { %v1110_v46 = vpack.c.bf16 %v1109_v45, %v1109_v45 }
 0x56a   : > { %2448 = vmatmul.mubr.msk.bf16.vlgmr.msra.gmra.mrb[4].mxu1 %vm1098_vm3, %v1110_v46 }
 0x56b   : > { %2459 = vmatprep.mubr.msk.bf16.mxu1 %vm3500_vm0, %v3499_v0 }
 0x5cd   : > { %v1223_v47 = vpop.xlane.xlu1 %1222 }
 0x5ce   : > { %2804 = vrcp.f32 %v1223_v47 }
 0x5d1   : > { %v1228_v48 = vpop.permute.xlu1 %1227 }
 0x5d2   : > { %v1233_v49 = vsel %vm1117_vm4, %v1228_v48, 0 }
 0x5d3   : > { %2458 = vmatpush3.bf16.msra.mxu1 %v1233_v49 }
 0x5d4   : > { %2471 = vmatprep.subr.bf16.mxu1 %v3499_v0 }
 0x5d8   : > { %v2805_v50 = vpop.eup %2804 }
 0x5d9   : > { %v1225_v51 = vmul.f32 %v2805_v50, %v2801_v41 }
 0x5db   : > { %v1226_v52 = vpack.c.bf16 %v1225_v51, %v1225_v51 }
 0x5dd   : > { %2460 = vmatmul.mubr.msk.bf16.vlgmr.msra.gmra.mrb[8].mxu1 %vm1098_vm3, %v1226_v52 }
 0x5de   : > { %2475 = vmatprep.mubr.msk.bf16.mxu1 %vm3500_vm0, %v3499_v0  ;;  %2472 = vmatpush3.bf16.msra.mxu1 %v2788_v19 }
 0x5df   : > { %2473 = vmatprep.subr.bf16.mxu1 %v3499_v0 }
 0x5e2   : > { %2474 = vmatpush3.bf16.msra.mxu1 %v2789_v20 }
 0x5e3   : > { %2487 = vmatprep.subr.bf16.mxu1 %v3499_v0 }
 0x63d   : > { %v1155_v53 = vpop.f32.mrb[4].mxu1 }
 0x63e   : > { %v1161_v54 = vpack.c.bf16 %v1155_v53, %v1155_v53  ;;  %v2449_v55 = vpop.f32.mrb[5].mxu1 }
 0x63f   : > { %v1158_v56 = vpop.f32.mrb[6].mxu1 }
 0x640   : > { %1163 = vst.msk [vmem:[#allocation2] sm:$0xf] %vm1162_vm5, %v1161_v54  ;;  %v2450_v57 = vpop.f32.mrb[7].mxu1 }
 0x6b0   : > { %v1269_v60 = vpop.f32.mrb[8].mxu1 }
 0x6b1   : > { %v2379_v61 = vpack.c.bf16 %v1269_v60, %v1269_v60  ;;  %v2461_v62 = vpop.f32.mrb[9].mxu1 }
 0x6b2   : > { %v1272_v63 = vpop.f32.mrb[10].mxu1 }
 0x6b3   : > { %1279 = vrot.lane.b32.xlu1 %v2379_v61, %s3504_s1  ;;  %v2462_v1 = vpop.f32.mrb[11].mxu1 }
 0x725   : > { %v1280_v2 = vpop.permute.xlu1 %1279 }
 0x726   : > { %1283 = vst.msk [vmem:[#allocation2] sm:$0xf] %vm1282_vm6, %v1280_v2 }
 0x72d   : > { %v1284_v3 = vld [vmem:[#allocation2] sm:$0xf] }
 0x72e   : > { %2468 = vmatmul.mubr.msk.bf16.vlgmr.msra.gmra.mrb[12].mxu0 %vm942_vm1, %v1284_v3 }
 0x72f   : > { %2483 = vmatprep.mubr.msk.bf16.mxu0 %vm3500_vm0, %v3499_v0  ;;  %2480 = vmatpush3.bf16.msra.mxu0 %v2786_v17 }
 0x730   : > { %2481 = vmatprep.subr.bf16.mxu0 %v3499_v0 }
 0x733   : > { %2482 = vmatpush3.bf16.msra.mxu0 %v2787_v6 }
 0x734   : > { %2493 = vmatprep.subr.bf16.mxu0 %v3499_v0 }
 0x736   : > { %2484 = vmatmul.mubr.msk.bf16.vlgmr.msra.gmra.mrb[16].mxu0 %vm942_vm1, %v925_v18 }
 0x737   : > { %2495 = vmatprep.mubr.msk.bf16.mxu0 %vm3500_vm0, %v3499_v0 }
 0x801   : > { %v1335_v5 = vpop.f32.mrb[12].mxu0 }
 0x802   : > { %v1336_v7 = vadd.f32 %v1335_v5, %v1285_v4  ;;  %v2469_v8 = vpop.f32.mrb[13].mxu0 }
 0x803   : > { %v1338_v9 = vpop.f32.mrb[14].mxu0 }
 0x804   : > { %v2470_v10 = vpop.f32.mrb[15].mxu0  ;;  %v1343_v11 = vsel %vm942_vm1, %v1336_v7, 0.0 }
 0x805   : > { %1344 = vadd.xlane.f32.xlu1 %v1343_v11 }
 0x809   : > { %v1485_v31 = vpop.f32.mrb[16].mxu0 }
 0x80a   : > { %v1491_v32 = vpack.c.bf16 %v1485_v31, %v1485_v31  ;;  %v2485_v33 = vpop.f32.mrb[17].mxu0 }
 0x80b   : > { %v1488_v34 = vpop.f32.mrb[18].mxu0 }
 0x80c   : > { %v2486_v35 = vpop.f32.mrb[19].mxu0  ;;  %v1500_v36 = vsel %vm1051_vm2, %v1491_v32, 0 }
 0x892   : > { %v1345_v12 = vpop.xlane.xlu1 %1344 }
 0x893   : > { %v1347_v13 = vmul.f32 0.03125, %v1345_v12 }
 0x895   : > { %v1348_v14 = vsub.f32 %v1336_v7, %v1347_v13 }
 0x897   : > { %v1349_v15 = vmul.f32 %v1348_v14, %v1348_v14 }
 0x899   : > { %v1350_v16 = vsel %vm942_vm1, %v1349_v15, 0.0  ;;  %v2790_v15 = vld [vmem:[#allocation20] sm:$0xff]  }
 0x89a   : > { %1351 = vadd.xlane.f32.xlu0 %v1350_v16  ;;  %v2791_v16 = vld [vmem:[#allocation20 + $0x8] sm:$0xff]  }
 0x8b0   : > { %1608 = vrot.lane.b32.xlu0 %v1491_v32, %s3501_s2 }
 0x927   : > { %v1352_v21 = vpop.xlane.xlu0 %1351 }
 0x928   : > { %v1353_v22 = vmul.f32 0.03125, %v1352_v21 }
 0x92a   : > { %v1354_v23 = vadd.f32 1e-05, %v1353_v22 }
 0x92b   : > { %v1609_v37 = vpop.permute.xlu0 %1608 }
 0x92c   : > { %2806 = vrsqrt.f32 %v1354_v23  ;;  %v1614_v41 = vsel %vm1051_vm2, %v1609_v37, 0 }
 0x936   : > { %v2807_v24 = vpop.eup %2806 }
 0x937   : > { %v1356_v26 = vmul.f32 %v2807_v24, %v1348_v14 }
 0x939   : > { %v1363_v28 = vmul.f32 %v2345_v25, %v1356_v26 }
 0x93b   : > { %v4260_v29 = vadd.f32 %v2346_v27, %v1363_v28 }
 0x93d   : > { %v1371_v30 = vpack.c.bf16 %v4260_v29, %v4260_v29 }
 0x93f   : > { %2476 = vmatmul.mubr.msk.bf16.vlgmr.msra.gmra.mrb[12].mxu1 %vm942_vm1, %v1371_v30 }
 0x940   : > { %2489 = vmatprep.mubr.msk.bf16.mxu1 %vm3500_vm0, %v3499_v0  ;;  %2488 = vmatpush3.bf16.xpose.msra.mxu1 %v1500_v36 }
 0x941   : > { %2499 = vmatprep.subr.bf16.mxu1 %v3499_v0 }
 0xa12   : > { %v1425_v38 = vpop.f32.mrb[12].mxu1 }
 0xa13   : > { %v1431_v39 = vpack.c.bf16 %v1425_v38, %v1425_v38  ;;  %v2477_v40 = vpop.f32.mrb[13].mxu1 }
 0xa14   : > { %v1428_v42 = vpop.f32.mrb[14].mxu1  ;;  %v2792_v40 = vld [vmem:[#allocation24] sm:$0xff]  }
 0xa15   : > { %v2478_v43 = vpop.f32.mrb[15].mxu1  ;;  %1606 = vrot.lane.b32.xlu0 %v1431_v39, %s3501_s2  ;;  %2490 = vmatmul.mubr.msk.bf16.vlgmr.msra.gmra.mrb[16].mxu1 %vm1051_vm2, %v1431_v39  ;;  %v2795_v42 = vld [vmem:[#allocation27 + $0x8] sm:$0xff]  }
 0xa16   : > { %2500 = vmatpush3.bf16.xpose.msra.mxu1 %v1614_v41  ;;  %2501 = vmatprep.mubr.msk.bf16.mxu1 %vm3500_vm0, %v3499_v0  ;;  %v2793_v41 = vld [vmem:[#allocation24 + $0x8] sm:$0xff]  }
 0xa17   : > { %2511 = vmatprep.subr.bf16.mxu1 %v3499_v0 }
 0xa87   : > { %v1607_v44 = vpop.permute.xlu0 %1606 }
 0xa88   : > { %2502 = vmatmul.mubr.msk.bf16.vlgmr.msra.gmra.mrb[20].mxu1 %vm1051_vm2, %v1607_v44 }
 0xa89   : > { %2515 = vmatprep.mubr.msk.bf16.mxu1 %vm3500_vm0, %v3499_v0  ;;  %2512 = vmatpush3.bf16.msra.mxu1 %v2790_v15 }
 0xa8a   : > { %2513 = vmatprep.subr.bf16.mxu1 %v3499_v0 }
 0xa8d   : > { %2514 = vmatpush3.bf16.msra.mxu1 %v2791_v16 }
 0xa8e   : > { %2527 = vmatprep.subr.bf16.mxu1 %v3499_v0 }
 0xae8   : > { %v1536_v45 = vpop.f32.mrb[16].mxu1 }
 0xae9   : > { %v2491_v46 = vpop.f32.mrb[17].mxu1  ;;  %v1542_v47 = vsel %vm1098_vm3, %v1536_v45, -inf }
 0xaea   : > { %1543 = vmax.xlane.f32.xlu0 %v1542_v47  ;;  %v1539_v48 = vpop.f32.mrb[18].mxu1  ;;  %v2361_v47 = vld [vmem:[#allocation21] ss:$0 sm:$0xff] }
 0xaeb   : > { %v2492_v49 = vpop.f32.mrb[19].mxu1 }
 0xaec   : > { %v2362_v49 = vld [vmem:[#allocation23] ss:$0 sm:$0xff] }
 0xb00   : > { %1668 = vrot.lane.b32.xlu0 %v1491_v32, %s3503_s25 }
 0xb5b   : > { %v1650_v50 = vpop.f32.mrb[20].mxu1 }
 0xb5c   : > { %v2503_v51 = vpop.f32.mrb[21].mxu1  ;;  %v1656_v52 = vsel %vm1098_vm3, %v1650_v50, -inf }
 0xb5d   : > { %1657 = vmax.xlane.f32.xlu1 %v1656_v52  ;;  %v1653_v53 = vpop.f32.mrb[22].mxu1 }
 0xb5e   : > { %v2504_v54 = vpop.f32.mrb[23].mxu1  ;;  %v2796_v53 = vld [vmem:[#allocation27 + $0x10] sm:$0xff]  }
 0xb5f   : > { %v2797_v54 = vld [vmem:[#allocation27 + $0x18] sm:$0xff]  }
 0xb77   : > { %v1544_v55 = vpop.xlane.xlu0 %1543 }
 0xb78   : > { %v1545_v56 = vsub.f32 %v1536_v45, %v1544_v55  ;;  %v2363_v55 = vld [vmem:[#allocation26] ss:$0 sm:$0xff] }
 0xb7a   : > { %v1546_v57 = vmul.f32 1.442695, %v1545_v56 }
 0xb7b   : > { %v1669_v9 = vpop.permute.xlu0 %1668 }
 0xb7c   : > { %2808 = vpow2.f32 %v1546_v57  ;;  %v1674_v11 = vsel %vm1117_vm4, %v1669_v9, 0 }
 0xb86   : > { %v2809_v58 = vpop.eup %2808 }
 0xb87   : > { %v1548_v59 = vsel %vm1098_vm3, %v2809_v58, 0.0 }
 0xb88   : > { %1549 = vadd.xlane.f32.xlu1 %v1548_v59 }
 0xbea   : > { %v1658_v60 = vpop.xlane.xlu1 %1657 }
 0xbeb   : > { %v1659_v61 = vsub.f32 %v1650_v50, %v1658_v60 }
 0xbed   : > { %v1660_v62 = vmul.f32 1.442695, %v1659_v61 }
 0xbef   : > { %2810 = vpow2.f32 %v1660_v62 }
 0xbf9   : > { %v2811_v63 = vpop.eup %2810 }
 0xbfa   : > { %v1662_v1 = vsel %vm1098_vm3, %v2811_v63, 0.0 }
 0xbfb   : > { %1663 = vadd.xlane.f32.xlu1 %v1662_v1 }
 0xc0c   : > { %1555 = vrot.lane.b32.xlu1 %v1491_v32, %s3502_s21 }
 0xc15   : > { %v1550_v2 = vpop.xlane.xlu1 %1549 }
 0xc16   : > { %2812 = vrcp.f32 %v1550_v2 }
 0xc20   : > { %v2813_v3 = vpop.eup %2812 }
 0xc21   : > { %v1552_v5 = vmul.f32 %v2813_v3, %v2809_v58 }
 0xc23   : > { %v1553_v10 = vpack.c.bf16 %v1552_v5, %v1552_v5 }
 0xc88   : > { %v1664_v4 = vpop.xlane.xlu1 %1663 }
 0xc89   : > { %2814 = vrcp.f32 %v1664_v4 }
 0xc8c   : > { %v1556_v7 = vpop.permute.xlu1 %1555 }
 0xc8d   : > { %v1561_v8 = vsel %vm1117_vm4, %v1556_v7, 0 }
 0xc8e   : > { %2494 = vmatpush3.bf16.msra.mxu0 %v1561_v8 }
 0xc8f   : > { %2505 = vmatprep.subr.bf16.mxu0 %v3499_v0 }
 0xc91   : > { %2496 = vmatmul.mubr.msk.bf16.vlgmr.msra.gmra.mrb[20].mxu0 %vm1098_vm3, %v1553_v10 }
 0xc92   : > { %2506 = vmatpush3.bf16.msra.mxu0 %v1674_v11  ;;  %2507 = vmatprep.mubr.msk.bf16.mxu0 %vm3500_vm0, %v3499_v0 }
 0xc93   : > { %v2815_v12 = vpop.eup %2814  ;;  %2519 = vmatprep.subr.bf16.mxu0 %v3499_v0 }
 0xc94   : > { %v1666_v13 = vmul.f32 %v2815_v12, %v2811_v63  ;;  %v2367_v63 = vld [vmem:[#allocation29] ss:$0 sm:$0xff] }
 0xc96   : > { %v1667_v14 = vpack.c.bf16 %v1666_v13, %v1666_v13 }
 0xc99   : > { %2508 = vmatmul.mubr.msk.bf16.vlgmr.msra.gmra.mrb[24].mxu0 %vm1098_vm3, %v1667_v14 }
 0xc9a   : > { %2523 = vmatprep.mubr.msk.bf16.mxu0 %vm3500_vm0, %v3499_v0  ;;  %2520 = vmatpush3.bf16.msra.mxu0 %v2792_v40 }
 0xc9b   : > { %2521 = vmatprep.subr.bf16.mxu0 %v3499_v0 }
 0xc9e   : > { %2522 = vmatpush3.bf16.msra.mxu0 %v2793_v41 }
 0xd64   : > { %v1597_v17 = vpop.f32.mrb[20].mxu0 }
 0xd65   : > { %v1603_v6 = vpack.c.bf16 %v1597_v17, %v1597_v17  ;;  %v2497_v18 = vpop.f32.mrb[21].mxu0  ;;  %v2373_v17 = vld [vmem:[#allocation30] ss:$0 sm:$0xff] }
 0xd66   : > { %v1600_v19 = vpop.f32.mrb[22].mxu0  ;;  %v2374_v18 = vld [vmem:[#allocation32] ss:$0 sm:$0xff] }
 0xd67   : > { %1604 = vst.msk [vmem:[#allocation2] sm:$0xf] %vm1162_vm5, %v1603_v6  ;;  %v2498_v20 = vpop.f32.mrb[23].mxu0 }
 0xd6c   : > { %v1710_v21 = vpop.f32.mrb[24].mxu0 }
 0xd6d   : > { %v2380_v22 = vpack.c.bf16 %v1710_v21, %v1710_v21  ;;  %v2509_v23 = vpop.f32.mrb[25].mxu0 }
 0xd6e   : > { %v1713_v24 = vpop.f32.mrb[26].mxu0 }
 0xd6f   : > { %1720 = vrot.lane.b32.xlu1 %v2380_v22, %s3504_s1  ;;  %v2510_v25 = vpop.f32.mrb[27].mxu0 }
 0xde1   : > { %v1721_v26 = vpop.permute.xlu1 %1720 }
 0xde2   : > { %1723 = vst.msk [vmem:[#allocation2] sm:$0xf] %vm1282_vm6, %v1721_v26 }
 0xde9   : > { %v1724_v27 = vld [vmem:[#allocation2] sm:$0xf] }
 0xdea   : > { %2516 = vmatmul.mubr.msk.bf16.vlgmr.msra.gmra.mrb[24].mxu1 %vm942_vm1, %v1724_v27 }
 0xdeb   : > { %2535 = vmatprep.mubr.msk.bf16.mxu1 %vm3500_vm0, %v3499_v0 }
 0xebd   : > { %v1774_v28 = vpop.f32.mrb[24].mxu1 }
 0xebe   : > { %v1775_v30 = vadd.f32 %v1774_v28, %v4260_v29  ;;  %v2517_v31 = vpop.f32.mrb[25].mxu1  ;;  %v2794_v29 = vld [vmem:[#allocation27] sm:$0xff]  }
 0xebf   : > { %v1777_v32 = vpop.f32.mrb[26].mxu1  ;;  %2528 = vmatpush3.bf16.msra.mxu1 %v2794_v29 }
 0xec0   : > { %v2518_v33 = vpop.f32.mrb[27].mxu1  ;;  %v1782_v34 = vsel %vm942_vm1, %v1775_v30, 0.0  ;;  %2529 = vmatprep.subr.bf16.mxu1 %v3499_v0 }
 0xec1   : > { %1783 = vadd.xlane.f32.xlu1 %v1782_v34 }
 0xec3   : > { %2530 = vmatpush3.bf16.msra.mxu1 %v2795_v42 }
 0xec4   : > { %2531 = vmatprep.subr.bf16.mxu1 %v3499_v0 }
 0xec7   : > { %2532 = vmatpush3.bf16.msra.mxu1 %v2796_v53 }
 0xec8   : > { %2533 = vmatprep.subr.bf16.mxu1 %v3499_v0 }
 0xecb   : > { %2534 = vmatpush3.bf16.msra.mxu1 %v2797_v54 }
 0xf4e   : > { %v1784_v35 = vpop.xlane.xlu1 %1783 }
 0xf4f   : > { %v1785_v36 = vmul.f32 0.03125, %v1784_v35 }
 0xf51   : > { %v1786_v37 = vsub.f32 %v1775_v30, %v1785_v36 }
 0xf53   : > { %v1787_v38 = vmul.f32 %v1786_v37, %v1786_v37 }
 0xf55   : > { %v1788_v39 = vsel %vm942_vm1, %v1787_v38, 0.0 }
 0xf56   : > { %1789 = vadd.xlane.f32.xlu0 %v1788_v39 }
 0xfe3   : > { %v1790_v43 = vpop.xlane.xlu0 %1789 }
 0xfe4   : > { %v1791_v44 = vmul.f32 0.03125, %v1790_v43 }
 0xfe6   : > { %v1792_v45 = vadd.f32 1e-05, %v1791_v44 }
 0xfe8   : > { %2816 = vrsqrt.f32 %v1792_v45 }
 0xff2   : > { %v2817_v46 = vpop.eup %2816 }
 0xff3   : > { %v1794_v48 = vmul.f32 %v2817_v46, %v1786_v37 }
 0xff5   : > { %v1801_v50 = vmul.f32 %v2361_v47, %v1794_v48 }
 0xff7   : > { %v1808_v51 = vadd.f32 %v2362_v49, %v1801_v50 }
 0xff9   : > { %v1823_v52 = vpack.c.bf16 %v1808_v51, %v1808_v51 }
 0xffb   : > { %2524 = vmatmul.mubr.msk.bf16.vlgmr.msra.gmra.mrb[28].mxu0 %vm942_vm1, %v1823_v52 }
0x10ce   : > { %v1879_v56 = vpop.f32.mrb[28].mxu0 }
0x10cf   : > { %v1880_v57 = vadd.f32 %v2363_v55, %v1879_v56  ;;  %v2525_v58 = vpop.f32.mrb[29].mxu0 }
0x10d0   : > { %v1882_v59 = vpop.f32.mrb[30].mxu0 }
0x10d1   : > { %v1885_v60 = vmax.f32 %v1880_v57, 0.0  ;;  %v2526_v61 = vpop.f32.mrb[31].mxu0 }
0x10d3   : > { %v1886_v62 = vpack.c.bf16 %v1885_v60, %v1885_v60 }
0x10d5   : > { %2536 = vmatmul.mubr.msk.bf16.vlgmr.msra.gmra.mrb[28].mxu1 %vm1917_vm7, %v1886_v62 }
0x11a8   : > { %v1955_v1 = vpop.f32.mrb[28].mxu1 }
0x11a9   : > { %v1956_v2 = vadd.f32 %v2367_v63, %v1955_v1  ;;  %v2537_v3 = vpop.f32.mrb[29].mxu1 }
0x11aa   : > { %v1958_v4 = vpop.f32.mrb[30].mxu1 }
0x11ab   : > { %v2538_v5 = vpop.f32.mrb[31].mxu1  ;;  %v1961_v7 = vadd.f32 %v1956_v2, %v1808_v51 }
0x11ad   : > { %v1964_v0 = vsel %vm942_vm1, %v1961_v7, 0.0 }
0x11ae   : > { %1965 = vadd.xlane.f32.xlu1 %v1964_v0 }
0x123b   : > { %v1966_v8 = vpop.xlane.xlu1 %1965 }
0x123c   : > { %v1967_v9 = vmul.f32 0.03125, %v1966_v8 }
0x123e   : > { %v1968_v10 = vsub.f32 %v1961_v7, %v1967_v9 }
0x1240   : > { %v1969_v11 = vmul.f32 %v1968_v10, %v1968_v10 }
0x1242   : > { %v1970_v12 = vsel %vm942_vm1, %v1969_v11, 0.0 }
0x1243   : > { %1971 = vadd.xlane.f32.xlu1 %v1970_v12 }
0x12d0   : > { %v1972_v13 = vpop.xlane.xlu1 %1971 }
0x12d1   : > { %v1973_v14 = vmul.f32 0.03125, %v1972_v13 }
0x12d3   : > { %v1974_v15 = vadd.f32 1e-05, %v1973_v14 }
0x12d5   : > { %2818 = vrsqrt.f32 %v1974_v15 }
0x12df   : > { %v2819_v16 = vpop.eup %2818 }
0x12e0   : > { %v1976_v6 = vmul.f32 %v2819_v16, %v1968_v10 }
0x12e2   : > { %v1983_v19 = vmul.f32 %v2373_v17, %v1976_v6 }
0x12e4   : > { %v1990_v20 = vadd.f32 %v2374_v18, %v1983_v19 }
0x12e6   : > { %v1991_v21 = vpack.c.bf16 %v1990_v20, %v1990_v20 }
0x12e8   : > { %1993 = vst.msk [vmem:[%s921_s6] sm:$0xf] %vm1992_vm8, %v1991_v21 }
0x12e9   : > { %3371 = shalt.err (!%p3368_p10)
}
0x12ea   : > { %s3372_s15 = scalar_lea.hbm %s4318_s18, 64  ;;  %s3376_s21 = scalar_lea.hbm %s4513_s10, 128 }
0x12eb   : > { %p3373_p1 = scmp.ne.s32.totalorder %s4318_s18, %s3372_s15  ;;  %p3377_p6 = scmp.lt.u32.totalorder %s4318_s18, %s4513_s10 }
0x12ec   : > { %p3378_p7 = scmp.lt.u32.totalorder %s3376_s21, %s3372_s15  ;;  %p3380_p13 = scmp.lt.u32.totalorder %s3372_s15, %s4318_s18 }
0x12ed   : > { %p3374_p5 = pnand %p3373_p1, %p4514_p2 }
0x12ee   : > { %p3379_p11 = por %p3378_p7, %p3377_p6 }
0x12ef   : > { %p3375_p0 = pneg %p3374_p5 }
0x12f0   : > { %p3381_p4 = por %p3380_p13, %p3379_p11 }
0x12f2   : > { %p3382_p8 = pnand %p3381_p4, %p3375_p0 }
0x12f4   : > { %3385 = shalt.err (!%p3382_p8)
}
0x12f5   : > { %2609 = dma.vmem_to_hbm [thread:$0]  (%p4514_p2), %s4320_s23, 64, %s4318_s18, %s1995_s12  }
0x12f6 PF: > { %s4515_s8 = sld [smem:[#allocation47_spill]]  ;;  %s2021_s16 = sand.u32 1, %s3456_s0  }
0x12f7   : > { %p4516_p12 = scmp.ne.s32.totalorder %s4470_s14, 0  ;;  %s2022_s6 = scalar_lea.sflag [#allocation5], %s2021_s16 }
0x12fc   : > { %p4517_p3 = scmp.ge.s32.totalorder %s4515_s8, 2 }
0x12fe   : > { %p2671_p9 = pnand %p4517_p3, %p4516_p12 }
0x1300   : > { %3451 = dma.done.wait (!%p2671_p9), %s2022_s6, 64  }
0x1301   : > { %3453 = vsyncadd (!%p2671_p9), %s2022_s6, 4294967232  ;;  %s46_s22 = sadd.s32 1, %s4515_s8   ;;  %s4518_s19 = sld [smem:[#allocation50_spill]] }
0x1302   : > { %p43_p10 = scmp.ge.s32.totalorder %s46_s22, 4   ;;  %s4519_s21 = sld [smem:[#allocation46_spill]] }
0x1303   : > { %s4520_s1 = sld [smem:[#allocation49_spill]]  ;;  %s4521_s0 = smov %s3460_s30 }
0x1304   : > { %s4522_s30 = smov %s3464_s20  ;;  %45 = sbr.rel (!%p43_p10) target bundleno = 37 (0x25), region = 229 }
0x1307   : > { %s4523_s20 = smov %s4518_s19 }
0x130b   :  { %2027 = vsyncpa [#allocation4], 1 }
0x130c   :  { %2029 = vsyncpa [#allocation4 + $0x1], 1 }
0x130d   :  { %2030 = vsyncpa [#allocation7], 1 }
0x130e   :  { %2032 = vsyncpa [#allocation7 + $0x1], 1 }
0x130f   :  { %2033 = vsyncpa [#allocation10], 1 }
0x1310   :  { %2034 = vsyncpa [#allocation13], 1 }
0x1311   :  { %2035 = vsyncpa [#allocation16], 1 }
0x1312   :  { %2036 = vsyncpa [#allocation19], 1 }
0x1313   :  { %2037 = vsyncpa [#allocation22], 1 }
0x1314   :  { %2038 = vsyncpa [#allocation25], 1 }
0x1315   :  { %2039 = vsyncpa [#allocation28], 1 }
0x1316   :  { %2040 = vsyncpa [#allocation31], 1 }
0x1317   :  { %2041 = vsyncpa [#allocation5], 1 }
0x1318   :  { %2043 = vsyncpa [#allocation5 + $0x1], 1 }

</bundles_post_ra>
